<compile_context>
chip_gen: v7x
topology: tpu7x:2x2x1
jax: 0.10.0
libtpu: 0.0.40
codegen_flags: <defaults>
</compile_context>

<pallas_src>
import jax
import jax.numpy as jnp
from jax import lax
from jax.experimental import pallas as pl
from jax.experimental.pallas import tpu as pltpu


# MXU operand dtype (f32 accumulation is kept via preferred_element_type).
# bf16 gives ~2x MXU throughput on v6e/v7x and halves the O(E) HBM edge stream.
MXU_DTYPE = jnp.bfloat16


def _round_up(x, m):
    return (x + m - 1) // m * m


def _leaky_relu(x, slope=0.01):  # PyTorch default negative_slope=0.01
    return jnp.where(x >= 0, x, slope * x)


# ---------------------------------------------------------------------------
# Pass 1: per-edge message computation (runs once per edge tile, O(E)).
# ---------------------------------------------------------------------------
def edge_pass_kernel(
    x_ref,        # [tE, 3D]  per-edge activations [hr | h_qr | hs]   (bf16)
    wfused_ref,   # [3D, 2D+A+D]  fused gate/attention/cand-from-hr weights (bf16)
    bfused_ref,   # [1, 2D+A+D]   fused biases (f32)
    wt2_ref,      # [D, D]    candidate weight for reset*hs (bf16)
    walpha_ref,   # [1, A]    attention output vector (f32, used on VPU)
    up_ref,       # [tE, D]   output: sigmoid(alpha) * message (bf16)
):
    D = wt2_ref.shape[0]
    A = walpha_ref.shape[1]

    x = x_ref[...]                                   # [tE, 3D] bf16 (MXU operand)
    hs = x[:, 2 * D:].astype(jnp.float32)            # elementwise path stays f32

    # single fused per-edge matmul: K=3D, N = 2D + A + D
    fused = (
        jnp.dot(x, wfused_ref[...], preferred_element_type=jnp.float32)
        + bfused_ref[...]
    )                                                # [tE, 2D+A+D] f32

    gates = jax.nn.sigmoid(fused[:, : 2 * D])
    update = gates[:, :D]
    reset = gates[:, D: 2 * D]
    att = _leaky_relu(fused[:, 2 * D: 2 * D + A])
    cand_hr = fused[:, 2 * D + A:]                   # hr @ Wt1^T + bt (pre-tanh)

    cand = jnp.tanh(
        cand_hr
        + jnp.dot((reset * hs).astype(MXU_DTYPE), wt2_ref[...],
                  preferred_element_type=jnp.float32)
    )
    message = (1.0 - update) * hs + update * cand

    # attention scalar: VPU/XLU row reduction instead of an N=1 MXU matmul
    alpha = jnp.sum(att * walpha_ref[...], axis=-1, keepdims=True)   # [tE, 1]
    up_ref[...] = (jax.nn.sigmoid(alpha) * message).astype(up_ref.dtype)


# ---------------------------------------------------------------------------
# Pass 2: one-hot scatter + degree + rsqrt-normalise + W_h projection.
# ---------------------------------------------------------------------------
def scatter_pass_kernel(
    obj_ref,      # [1, tE]   destination node ids (-1 for padded edges)
    up_ref,       # [tE, D]   per-edge messages from pass 1 (bf16)
    wh_ref,       # [D, out_pad]  final projection (zero-padded to 128 lanes, bf16)
    out_ref,      # [tN, out_pad] f32
    acc_ref,      # VMEM scratch [tN, D]  message aggregation (f32)
    deg_ref,      # VMEM scratch [tN, 1]  degree count (f32)
):
    tN = out_ref.shape[0]

    # program_id / num_programs hoisted to top level (never inside pl.when bodies).
    i = pl.program_id(0)
    j = pl.program_id(1)
    n_edge_steps = pl.num_programs(1)
    node_base = i * tN

    @pl.when(j == 0)
    def _init():
        acc_ref[...] = jnp.zeros_like(acc_ref)
        deg_ref[...] = jnp.zeros_like(deg_ref)

    # (tN,1) iota broadcast-compared against the (1,tE) obj row -> [tN, tE] mask.
    node_ids = lax.broadcasted_iota(jnp.int32, (tN, 1), 0) + node_base
    one_hot = (node_ids == obj_ref[...]).astype(jnp.float32)          # [tN, tE]

    # degree: XLU row-reduction (free slot); scatter-sum: one MXU matmul.
    deg_ref[...] += jnp.sum(one_hot, axis=1, keepdims=True)
    acc_ref[...] += jnp.dot(one_hot.astype(MXU_DTYPE), up_ref[...],
                            preferred_element_type=jnp.float32)
    # TODO(synk): for production graph sizes, pre-sort edges by obj in the wrapper and
    # scalar-prefetch per-node-tile edge offsets (CSR segment reduction) so the scatter
    # does O(E) work instead of O(N*E) one-hot compares/matmul.

    @pl.when(j == n_edge_steps - 1)
    def _finalize():
        agg = acc_ref[...] * lax.rsqrt(deg_ref[...] + 1e-4)
        out_ref[...] = jnp.dot(agg.astype(MXU_DTYPE), wh_ref[...],
                               preferred_element_type=jnp.float32
                               ).astype(out_ref.dtype)


# ---------------------------------------------------------------------------
# Wrapper
# ---------------------------------------------------------------------------
def gnn_layer6_forward(q_rel, hidden, edges, n_node, params, *,
                       tile_e=512, tile_n=128):
    """Embedding gathers (glue), padding, then the two Pallas passes.

    tile_n=128 suits v5e; use tile_n=256 on v6e/v7x for large graphs (keep
    n_node_pad/tile_n >= 2 on v7x so both TensorCores get node-tile work).
    """
    rela_embed = params["rela_embed"]          # [2*n_rel+1, D]
    sub = edges[:, 4]
    rel = edges[:, 2]
    obj = edges[:, 5]
    r_idx = edges[:, 0]

    # The unique(...)[reverse_indexes] construction in the reference is exactly
    # rela_embed(rel).
    hr = rela_embed[rel]                       # [E, D]
    hs = hidden[sub]                           # [E, D]
    h_qr = rela_embed[q_rel][r_idx]            # [E, D]

    # single per-edge activation, stored bf16 (halves the streamed edge bytes)
    x = jnp.concatenate([hr, h_qr, hs], axis=1).astype(MXU_DTYPE)    # [E, 3D]

    E = x.shape[0]
    D = hidden.shape[1]
    A = params["walpha_row"].shape[1]
    NF = params["w_fused"].shape[1]
    out_dim = params["out_dim"]
    out_pad = _round_up(out_dim, 128)          # lane-dense output stores

    E_pad = _round_up(E, tile_e)
    n_node_pad = _round_up(n_node, tile_n)

    x_p = jnp.pad(x, ((0, E_pad - E), (0, 0)))
    obj_p = jnp.full((1, E_pad), -1, jnp.int32).at[0, :E].set(obj.astype(jnp.int32))

    w_fused = params["w_fused"].astype(MXU_DTYPE)
    b_fused = params["b_fused"].astype(jnp.float32)
    wt2 = params["wt2_t"].astype(MXU_DTYPE)
    walpha = params["walpha_row"].astype(jnp.float32)
    wh_pad = jnp.pad(params["wh_t"],
                     ((0, 0), (0, out_pad - out_dim))).astype(MXU_DTYPE)

    # ---- pass 1: per-edge messages, each edge tile streamed exactly once ----
    up = pl.pallas_call(
        edge_pass_kernel,
        out_shape=jax.ShapeDtypeStruct((E_pad, D), MXU_DTYPE),
        grid_spec=pltpu.PrefetchScalarGridSpec(
            num_scalar_prefetch=0,
            grid=(E_pad // tile_e,),
            in_specs=[
                pl.BlockSpec((tile_e, 3 * D), lambda j: (j, 0)),   # streamed
                pl.BlockSpec((3 * D, NF), lambda j: (0, 0)),       # resident weights
                pl.BlockSpec((1, NF), lambda j: (0, 0)),
                pl.BlockSpec((D, D), lambda j: (0, 0)),
                pl.BlockSpec((1, A), lambda j: (0, 0)),
            ],
            out_specs=pl.BlockSpec((tile_e, D), lambda j: (j, 0)),
        ),
        compiler_params=pltpu.CompilerParams(
            dimension_semantics=("parallel",),
            vmem_limit_bytes=32 * 1024 * 1024,
        ),
    )(x_p, w_fused, b_fused, wt2, walpha)

    # ---- pass 2: scatter + degree + normalise + W_h ----
    grid = (n_node_pad // tile_n, E_pad // tile_e)
    out = pl.pallas_call(
        scatter_pass_kernel,
        out_shape=jax.ShapeDtypeStruct((n_node_pad, out_pad), jnp.float32),
        grid_spec=pltpu.PrefetchScalarGridSpec(
            num_scalar_prefetch=0,
            grid=grid,
            in_specs=[
                pl.BlockSpec((1, tile_e), lambda i, j: (0, j)),    # obj row
                pl.BlockSpec((tile_e, D), lambda i, j: (j, 0)),    # streamed messages
                pl.BlockSpec((D, out_pad), lambda i, j: (0, 0)),   # resident W_h
            ],
            # same node block across the edge axis => accumulator pattern
            out_specs=pl.BlockSpec((tile_n, out_pad), lambda i, j: (i, 0)),
            scratch_shapes=[
                pltpu.VMEM((tile_n, D), jnp.float32),   # message aggregation
                pltpu.VMEM((tile_n, 1), jnp.float32),   # degree
            ],
        ),
        compiler_params=pltpu.CompilerParams(
            dimension_semantics=("parallel", "arbitrary"),
            vmem_limit_bytes=32 * 1024 * 1024,
        ),
    )(obj_p, up, wh_pad)

    return out[:n_node, :out_dim]


# ---------------------------------------------------------------------------
# Parameters & pure-JAX reference
# ---------------------------------------------------------------------------
def make_params(key, in_dim, out_dim, attn_dim, n_rel):
    """Deterministic synthetic parameters (PyTorch Linear weights are [out,in];
    we pre-transpose / fuse them for the kernel)."""
    D, A = in_dim, attn_dim
    ks = jax.random.split(key, 12)
    scale = 0.1

    rela_embed = scale * jax.random.normal(ks[0], (2 * n_rel + 1, D), jnp.float32)

    # GateUnit.gate_W: Linear(3D -> 2D); input order is [hr, h_qr, hs]
    Wg = scale * jax.random.normal(ks[1], (2 * D, 3 * D), jnp.float32)
    bg = scale * jax.random.normal(ks[2], (2 * D,), jnp.float32)
    # GateUnit.hidden_trans: Linear(2D -> D); input order is [hr, reset*hs]
    Wt = scale * jax.random.normal(ks[3], (D, 2 * D), jnp.float32)
    bt = scale * jax.random.normal(ks[4], (D,), jnp.float32)

    Ws = scale * jax.random.normal(ks[5], (A, D), jnp.float32)
    Wr = scale * jax.random.normal(ks[6], (A, D), jnp.float32)
    Wqr = scale * jax.random.normal(ks[7], (A, D), jnp.float32)
    bqr = scale * jax.random.normal(ks[8], (A,), jnp.float32)
    Walpha = scale * jax.random.normal(ks[9], (1, A), jnp.float32)
    Wh = scale * jax.random.normal(ks[10], (out_dim, D), jnp.float32)

    # Fused edge matmul: x=[hr|hqr|hs] @ w_fused, columns = [gate(2D)|attn(A)|cand_hr(D)]
    gate_cols = Wg.T                                              # [3D, 2D]
    attn_cols = jnp.concatenate([Wr.T, Wqr.T, Ws.T], axis=0)      # [3D, A]
    cand_cols = jnp.concatenate(
        [Wt[:, :D].T, jnp.zeros((2 * D, D), jnp.float32)], axis=0)  # [3D, D]
    w_fused = jnp.concatenate([gate_cols, attn_cols, cand_cols], axis=1)
    b_fused = jnp.concatenate([bg, bqr, bt]).reshape(1, 2 * D + A + D)

    return {
        "rela_embed": rela_embed,
        "w_fused": w_fused, "b_fused": b_fused,
        "wt2_t": Wt[:, D:].T,
        "walpha_row": Walpha,            # [1, A]
        "wh_t": Wh.T,                    # [D, out_dim]
        "out_dim": out_dim,
        # keep raw mats for the reference check
        "_Wg": Wg, "_bg": bg, "_Wt": Wt, "_bt": bt,
        "_Ws": Ws, "_Wr": Wr, "_Wqr": Wqr, "_bqr": bqr,
        "_Walpha": Walpha, "_Wh": Wh,
    }


def reference_forward(q_rel, hidden, edges, n_node, p):
    """Pure-JAX f32 reference mirroring the PyTorch forward."""
    sub, rel, obj, r_idx = edges[:, 4], edges[:, 2], edges[:, 5], edges[:, 0]
    hr = p["rela_embed"][rel]
    hs = hidden[sub]
    h_qr = p["rela_embed"][q_rel][r_idx]
    D = hs.shape[1]

    factors = jnp.concatenate([hr, h_qr, hs], axis=1)
    gates = jax.nn.sigmoid(factors @ p["_Wg"].T + p["_bg"])
    update, reset = gates[:, :D], gates[:, D:]
    cand = jnp.tanh(jnp.concatenate([hr, reset * hs], axis=1) @ p["_Wt"].T + p["_bt"])
    message = (1.0 - update) * hs + update * cand

    att = _leaky_relu(hs @ p["_Ws"].T + hr @ p["_Wr"].T + h_qr @ p["_Wqr"].T + p["_bqr"])
    alpha = att @ p["_Walpha"].T
    up = jax.nn.sigmoid(alpha) * message

    agg = jnp.zeros((n_node, D), jnp.float32).at[obj].add(up)
    deg = jnp.zeros((n_node, 1), jnp.float32).at[obj].add(1.0)
    agg = agg / jnp.sqrt(deg + 1e-4)
    return agg @ p["_Wh"].T


if __name__ == "__main__":
    # Small shapes, chosen to exercise multiple node tiles (2) and edge tiles (3)
    # plus both padding paths with the enlarged tile sizes.
    in_dim, out_dim, attn_dim, n_rel = 32, 32, 16, 5
    n_node, n_edges, batch = 200, 1200, 2

    key = jax.random.PRNGKey(0)
    k_par, k_hid, k_e = jax.random.split(key, 3)
    params = make_params(k_par, in_dim, out_dim, attn_dim, n_rel)

    hidden = 0.1 * jax.random.normal(k_hid, (n_node, in_dim), jnp.float32)
    q_rel = jnp.array([1, 3], dtype=jnp.int32)            # [batch]
    q_sub = jnp.array([0, 5], dtype=jnp.int32)             # unused by the forward

    ke = jax.random.split(k_e, 4)
    edges = jnp.zeros((n_edges, 7), dtype=jnp.int32)
    edges = edges.at[:, 0].set(jax.random.randint(ke[0], (n_edges,), 0, batch))          # r_idx
    edges = edges.at[:, 2].set(jax.random.randint(ke[1], (n_edges,), 0, 2 * n_rel + 1))  # rel
    edges = edges.at[:, 4].set(jax.random.randint(ke[2], (n_edges,), 0, n_node))         # sub
    edges = edges.at[:, 5].set(jax.random.randint(ke[3], (n_edges,), 0, n_node))         # obj
    edges = edges.at[:, 6].set(jnp.arange(n_edges) % 7)                                  # time (unused)

    out = gnn_layer6_forward(q_rel, hidden, edges, n_node, params,
                             tile_e=512, tile_n=128)
    out = jax.block_until_ready(out)

    ref = reference_forward(q_rel, hidden, edges, n_node, params)
    assert out.shape == (n_node, out_dim)
    # bf16 MXU operands (per perf review) -> relaxed tolerance vs the f32 reference.
    assert jnp.allclose(out, ref, atol=2e-2, rtol=2e-2), "kernel mismatch vs reference"

    print("KERNEL_OK")
</pallas_src>

<mosaic_0001>
module attributes {stable_mosaic.version = 11 : i64} {
  func.func @edge_pass_kernel(%arg0: i32, %arg1: memref<512x96xbf16, #tpu.memory_space<vmem>>, %arg2: memref<96x112xbf16, #tpu.memory_space<vmem>>, %arg3: memref<1x112xf32, #tpu.memory_space<vmem>>, %arg4: memref<32x32xbf16, #tpu.memory_space<vmem>>, %arg5: memref<1x16xf32, #tpu.memory_space<vmem>>, %arg6: memref<512x32xbf16, #tpu.memory_space<vmem>>) attributes {dimension_semantics = [#tpu.dimension_semantics<parallel>], iteration_bounds = array<i64: 3>, scalar_prefetch = 0 : i64, scratch_operands = 0 : i64, tpu.core_type = #tpu.core_type<tc>, window_params = [{transform_indices = @transform_0, window_bounds = array<i64: 512, 96>}, {pipeline_mode = #tpu.pipeline_mode<synchronous>, transform_indices = @transform_1, window_bounds = array<i64: 96, 112>}, {pipeline_mode = #tpu.pipeline_mode<synchronous>, transform_indices = @transform_2, window_bounds = array<i64: 1, 112>}, {pipeline_mode = #tpu.pipeline_mode<synchronous>, transform_indices = @transform_3, window_bounds = array<i64: 32, 32>}, {pipeline_mode = #tpu.pipeline_mode<synchronous>, transform_indices = @transform_4, window_bounds = array<i64: 1, 16>}, {transform_indices = @transform_5, window_bounds = array<i64: 512, 32>}]} {
    %c0 = arith.constant 0 : index
    %c0_0 = arith.constant 0 : index
    %0 = vector.load %arg1[%c0, %c0_0] : memref<512x96xbf16, #tpu.memory_space<vmem>>, vector<512x96xbf16>
    %1 = vector.extract_strided_slice %0 {offsets = [0, 64], sizes = [512, 32], strides = [1, 1]} : vector<512x96xbf16> to vector<512x32xbf16>
    %2 = arith.extf %1 : vector<512x32xbf16> to vector<512x32xf32>
    %c0_1 = arith.constant 0 : index
    %c0_2 = arith.constant 0 : index
    %3 = vector.load %arg2[%c0_1, %c0_2] : memref<96x112xbf16, #tpu.memory_space<vmem>>, vector<96x112xbf16>
    %cst = arith.constant dense<0.000000e+00> : vector<512x112xf32>
    %4 = tpu.matmul %0, %3, %cst {dimension_numbers = #tpu.dot_dimension_numbers<[1], [0], [0], [1], [0, 0, 1, 1], [], []>} : vector<512x96xbf16>, vector<96x112xbf16>, vector<512x112xf32> -> vector<512x112xf32>
    %c0_3 = arith.constant 0 : index
    %c0_4 = arith.constant 0 : index
    %5 = vector.load %arg3[%c0_3, %c0_4] : memref<1x112xf32, #tpu.memory_space<vmem>>, vector<1x112xf32>
    %6 = vector.broadcast %5 : vector<1x112xf32> to vector<512x112xf32>
    %7 = arith.addf %4, %6 : vector<512x112xf32>
    %8 = vector.extract_strided_slice %7 {offsets = [0, 0], sizes = [512, 64], strides = [1, 1]} : vector<512x112xf32> to vector<512x64xf32>
    %9 = arith.negf %8 : vector<512x64xf32>
    %10 = math.exp %9 : vector<512x64xf32>
    %cst_5 = arith.constant 1.000000e+00 : f32
    %11 = vector.broadcast %cst_5 : f32 to vector<512x64xf32>
    %12 = arith.addf %11, %10 : vector<512x64xf32>
    %13 = arith.divf %11, %12 : vector<512x64xf32>
    %14 = vector.extract_strided_slice %13 {offsets = [0, 0], sizes = [512, 32], strides = [1, 1]} : vector<512x64xf32> to vector<512x32xf32>
    %15 = vector.extract_strided_slice %13 {offsets = [0, 32], sizes = [512, 32], strides = [1, 1]} : vector<512x64xf32> to vector<512x32xf32>
    %16 = vector.extract_strided_slice %7 {offsets = [0, 64], sizes = [512, 16], strides = [1, 1]} : vector<512x112xf32> to vector<512x16xf32>
    %cst_6 = arith.constant 0.000000e+00 : f32
    %17 = vector.broadcast %cst_6 : f32 to vector<512x16xf32>
    %18 = arith.cmpf oge, %16, %17 : vector<512x16xf32>
    %cst_7 = arith.constant 0.00999999977 : f32
    %19 = vector.broadcast %cst_7 : f32 to vector<512x16xf32>
    %20 = arith.mulf %19, %16 : vector<512x16xf32>
    %21 = arith.select %18, %16, %20 : vector<512x16xi1>, vector<512x16xf32>
    %22 = vector.extract_strided_slice %7 {offsets = [0, 80], sizes = [512, 32], strides = [1, 1]} : vector<512x112xf32> to vector<512x32xf32>
    %23 = arith.mulf %15, %2 : vector<512x32xf32>
    %24 = arith.truncf %23 : vector<512x32xf32> to vector<512x32xbf16>
    %c0_8 = arith.constant 0 : index
    %c0_9 = arith.constant 0 : index
    %25 = vector.load %arg4[%c0_8, %c0_9] : memref<32x32xbf16, #tpu.memory_space<vmem>>, vector<32x32xbf16>
    %cst_10 = arith.constant dense<0.000000e+00> : vector<512x32xf32>
    %26 = tpu.matmul %24, %25, %cst_10 {dimension_numbers = #tpu.dot_dimension_numbers<[1], [0], [0], [1], [0, 0, 1, 1], [], []>} : vector<512x32xbf16>, vector<32x32xbf16>, vector<512x32xf32> -> vector<512x32xf32>
    %27 = arith.addf %22, %26 : vector<512x32xf32>
    %28 = math.tanh %27 : vector<512x32xf32>
    %cst_11 = arith.constant 1.000000e+00 : f32
    %29 = vector.broadcast %cst_11 : f32 to vector<512x32xf32>
    %30 = arith.subf %29, %14 : vector<512x32xf32>
    %31 = arith.mulf %30, %2 : vector<512x32xf32>
    %32 = arith.mulf %14, %28 : vector<512x32xf32>
    %33 = arith.addf %31, %32 : vector<512x32xf32>
    %c0_12 = arith.constant 0 : index
    %c0_13 = arith.constant 0 : index
    %34 = vector.load %arg5[%c0_12, %c0_13] : memref<1x16xf32, #tpu.memory_space<vmem>>, vector<1x16xf32>
    %35 = vector.broadcast %34 : vector<1x16xf32> to vector<512x16xf32>
    %36 = arith.mulf %21, %35 : vector<512x16xf32>
    %cst_14 = arith.constant dense<0.000000e+00> : vector<512xf32>
    %37 = vector.multi_reduction <add>, %36, %cst_14 [1] : vector<512x16xf32> to vector<512xf32>
    %38 = vector.shape_cast %37 : vector<512xf32> to vector<512x1xf32>
    %39 = arith.negf %38 : vector<512x1xf32>
    %40 = math.exp %39 : vector<512x1xf32>
    %cst_15 = arith.constant 1.000000e+00 : f32
    %41 = vector.broadcast %cst_15 : f32 to vector<512x1xf32>
    %42 = arith.addf %41, %40 : vector<512x1xf32>
    %43 = arith.divf %41, %42 : vector<512x1xf32>
    %44 = vector.broadcast %43 : vector<512x1xf32> to vector<512x32xf32>
    %45 = arith.mulf %44, %33 : vector<512x32xf32>
    %46 = arith.truncf %45 : vector<512x32xf32> to vector<512x32xbf16>
    %c0_16 = arith.constant 0 : index
    %c0_17 = arith.constant 0 : index
    %47 = vector.load %arg6[%c0_16, %c0_17] : memref<512x32xbf16, #tpu.memory_space<vmem>>, vector<512x32xbf16>
    tpu.vector_store %arg6[%c0_16, %c0_17], %46 {strides = array<i32>} : memref<512x32xbf16, #tpu.memory_space<vmem>>, vector<512x32xbf16>,
    return
  }
  func.func @transform_0(%arg0: i32) -> (i32, i32) {
    %c0_i32 = arith.constant 0 : i32
    %c0_i32_0 = arith.constant 0 : i32
    return %arg0, %c0_i32 : i32, i32
  }
  func.func @transform_1(%arg0: i32) -> (i32, i32) {
    %c0_i32 = arith.constant 0 : i32
    %c0_i32_0 = arith.constant 0 : i32
    %c0_i32_1 = arith.constant 0 : i32
    return %c0_i32, %c0_i32_0 : i32, i32
  }
  func.func @transform_2(%arg0: i32) -> (i32, i32) {
    %c0_i32 = arith.constant 0 : i32
    %c0_i32_0 = arith.constant 0 : i32
    %c0_i32_1 = arith.constant 0 : i32
    return %c0_i32, %c0_i32_0 : i32, i32
  }
  func.func @transform_3(%arg0: i32) -> (i32, i32) {
    %c0_i32 = arith.constant 0 : i32
    %c0_i32_0 = arith.constant 0 : i32
    %c0_i32_1 = arith.constant 0 : i32
    return %c0_i32, %c0_i32_0 : i32, i32
  }
  func.func @transform_4(%arg0: i32) -> (i32, i32) {
    %c0_i32 = arith.constant 0 : i32
    %c0_i32_0 = arith.constant 0 : i32
    %c0_i32_1 = arith.constant 0 : i32
    return %c0_i32, %c0_i32_0 : i32, i32
  }
  func.func @transform_5(%arg0: i32) -> (i32, i32) {
    %c0_i32 = arith.constant 0 : i32
    %c0_i32_0 = arith.constant 0 : i32
    return %arg0, %c0_i32 : i32, i32
  }
}

</mosaic_0001>

<bundles_post_ra>
// kernel: tpu_custom_call.1
= control target key start
LH: loop header
LB: loop body
LE: loop exit
PB: predicated region body
PF: predicated region fallthrough
CT: control target
= control target key end

     0   :  { %s6495_s18 = smov 0   ;;  %s9643_s0 = inlined_call_operand.vmem [shape: bf16[1536,96], index: 0, kind: input, shape index: {}]   ;;  %s9644_s1 = inlined_call_operand.vmem [shape: bf16[96,112], index: 1, kind: input, shape index: {}]   ;;  %s9645_s2 = inlined_call_operand.vmem [shape: f32[1,112], index: 2, kind: input, shape index: {}]   ;;  %s9646_s3 = inlined_call_operand.vmem [shape: bf16[32,32], index: 3, kind: input, shape index: {}]   ;;  %s9647_s4 = inlined_call_operand.vmem [shape: f32[1,16], index: 4, kind: input, shape index: {}]   ;;  %s9648_s5 = inlined_call_operand.vmem [shape: bf16[1536,32], index: 5, kind: output, shape index: {}]  }
   0x1 LB: > { %s4819_s19 = sadd.s32 4294967295, %s6459_s18   ;;  %p4823_p0 = scmp.ge.s32.totalorder %s6459_s18, 1  ;;  %s6459_s18 = sphi %s6495_s18, %s15_s18  }
   0x2   : > { %p188_p1 = scmp.lt.s32.totalorder %s6459_s18, 4 }
   0x4   : > { %p189_p2 = pnand %p4823_p0, %p188_p1 }
   0x6   : > { %192 = sbr.rel (%p189_p2) target bundleno = 1362 (0x552), region = 40 }
   0xd   : > { %v5740_v0 = vld [vmem:[%s9644_s1] sm:$0xff]   ;;  %s4824_s22 = sshll.u32 %s4819_s19, 6  ;;  %v5741_v1 = vld [vmem:[%s9644_s1 + $0x8] sm:$0xff]   ;;  %v5742_v2 = vld [vmem:[%s9644_s1 + $0x10] sm:$0xff]   ;;  %vm572_vm0 = vcmask 785408   ;;  %s6461_s8 = smov 96  }
   0xe   : > { %p217_p3 = scmp.lt.s32.totalorder %s4824_s22, 191  ;;  %5264 = vmatprep.subr.bf16.mxu0 %v5740_v0  ;;  %v5743_v7 = vld [vmem:[%s9644_s1 + $0x18] sm:$0xff]   ;;  %v5744_v13 = vld [vmem:[%s9644_s1 + $0x20] sm:$0xff]   ;;  %v5745_v18 = vld [vmem:[%s9644_s1 + $0x28] sm:$0xff]   ;;  %s6462_s13 = smov 64  }
   0xf   : > { %5265 = vmatpush3.bf16.msra.mxu0 %v5740_v0  ;;  %s6463_s26 = smov 80   ;;  %s6464_s28 = smov 48  }
  0x10   : > { %s10418_s22 = smov (!%p217_p3, %s4824_s22), 191  ;;  %5266 = vmatprep.subr.bf16.mxu0 %v5741_v1 }
  0x11   : > { %s4825_s27 = sshll.u32 %s10418_s22, 2 }
  0x12   : > { %s6520_s30 = scalar_lea.vmem %s9643_s0, %s4825_s27  ;;  %s9092_s6 = scalar_lea.vmem %s9648_s5, %s4825_s27 }
  0x13   : > { %5267 = vmatpush3.bf16.msra.mxu0 %v5741_v1  ;;  %v229_v3 = vld [vmem:[%s6520_s30] sm:$0xff]   ;;  %v231_v4 = vld [vmem:[%s6520_s30 + $0x8] sm:$0xff]   ;;  %v6542_v16 = vld [vmem:[%s6520_s30 + $0x30] sm:$0xff]  }
  0x14   : > { %5268 = vmatprep.subr.bf16.mxu0 %v5742_v2  ;;  %v293_v5 = vunpack.c.l.bf16 %v229_v3  ;;  %v294_v6 = vunpack.c.h.bf16 %v229_v3  ;;  %v295_v8 = vunpack.c.l.bf16 %v231_v4  ;;  %v296_v9 = vunpack.c.h.bf16 %v231_v4  ;;  %v6528_v10 = vld [vmem:[%s6520_s30 + $0x20] sm:$0xff]   ;;  %5276 = vmatprep.mubr.msk.bf16.mxu0 %vm572_vm0, %v229_v3  ;;  %v6558_v22 = vld [vmem:[%s6520_s30 + $0x50] sm:$0xff]   ;;  %v235_v26 = vld [vmem:[%s6520_s30 + $0x18] sm:$0xff]  }
  0x15   : > { %v301_v14 = vunpack.c.l.bf16 %v6528_v10  ;;  %v302_v15 = vunpack.c.h.bf16 %v6528_v10  ;;  %v305_v19 = vunpack.c.l.bf16 %v6542_v16  ;;  %v306_v20 = vunpack.c.h.bf16 %v6542_v16  ;;  %v6555_v21 = vld [vmem:[%s6520_s30 + $0x40] sm:$0xff]   ;;  %v233_v25 = vld [vmem:[%s6520_s30 + $0x10] sm:$0xff]   ;;  %v239_v46 = vld [vmem:[%s6520_s30 + $0x28] sm:$0xff]  }
  0x16   : > { %v6530_v11 = vpack.i.bf16 %v294_v6, %v293_v5  ;;  %v6534_v12 = vpack.i.bf16 %v296_v9, %v295_v8  ;;  %v309_v23 = vunpack.c.l.bf16 %v6555_v21  ;;  %v310_v24 = vunpack.c.h.bf16 %v6555_v21  ;;  %v6569_v28 = vld [vmem:[%s6520_s30 + $0x60] sm:$0xff]   ;;  %v6574_v31 = vld [vmem:[%s6520_s30 + $0x70] sm:$0xff]   ;;  %v243_v1 = vld [vmem:[%s6520_s30 + $0x38] sm:$0xff]  }
  0x17   : > { %5269 = vmatpush3.bf16.msra.mxu0 %v5742_v2  ;;  %v6547_v17 = vpack.i.bf16 %v302_v15, %v301_v14  ;;  %v6566_v27 = vpack.i.bf16 %v306_v20, %v305_v19  ;;  %v313_v29 = vunpack.c.l.bf16 %v6558_v22  ;;  %v314_v30 = vunpack.c.h.bf16 %v6558_v22  ;;  %v6577_v32 = vld [vmem:[%s6520_s30 + $0x80] sm:$0xff]   ;;  %v6587_v37 = vld [vmem:[%s6520_s30 + $0x90] sm:$0xff]  }
  0x18   : > { %5421 = vrot.lane.b32.xlu0 %v6530_v11, %s6461_s8  ;;  %5270 = vmatprep.subr.bf16.mxu0 %v5743_v7  ;;  %v6579_v33 = vpack.i.bf16 %v310_v24, %v309_v23  ;;  %v317_v34 = vunpack.c.l.bf16 %v6569_v28  ;;  %v318_v35 = vunpack.c.h.bf16 %v6569_v28  ;;  %v321_v36 = vunpack.c.l.bf16 %v6574_v31  ;;  %v6596_v44 = vld [vmem:[%s6520_s30 + $0xa0] sm:$0xff]   ;;  %v6604_v48 = vld [vmem:[%s6520_s30 + $0xb0] sm:$0xff]   ;;  %v247_v23 = vld [vmem:[%s6520_s30 + $0x48] sm:$0xff]  }
  0x19   : > { %v297_v38 = vunpack.c.l.bf16 %v233_v25  ;;  %v298_v39 = vunpack.c.h.bf16 %v233_v25  ;;  %v6589_v40 = vpack.i.bf16 %v314_v30, %v313_v29  ;;  %v322_v41 = vunpack.c.h.bf16 %v6574_v31  ;;  %v6612_v53 = vld [vmem:[%s6520_s30 + $0xc0] sm:$0xff]   ;;  %v6627_v63 = vld [vmem:[%s6520_s30 + $0xd0] sm:$0xff]  }
  0x1a   : > { %v325_v42 = vunpack.c.l.bf16 %v6577_v32  ;;  %v326_v43 = vunpack.c.h.bf16 %v6577_v32  ;;  %v329_v47 = vunpack.c.l.bf16 %v6587_v37  ;;  %v6606_v49 = vpack.i.bf16 %v318_v35, %v317_v34  ;;  %v6642_v6 = vld [vmem:[%s6520_s30 + $0xf0] sm:$0xff]  }
  0x1b   : > { %5271 = vmatpush3.bf16.msra.mxu0 %v5743_v7  ;;  %v6598_v45 = vpack.i.bf16 %v298_v39, %v297_v38  ;;  %v299_v50 = vunpack.c.l.bf16 %v235_v26  ;;  %v300_v51 = vunpack.c.h.bf16 %v235_v26  ;;  %v330_v52 = vunpack.c.h.bf16 %v6587_v37 }
  0x1c   : > { %5426 = vrot.lane.b32.xlu0 %v6534_v12, %s6461_s8  ;;  %5272 = vmatprep.subr.bf16.mxu0 %v5744_v13  ;;  %v6616_v54 = vpack.i.bf16 %v322_v41, %v321_v36  ;;  %v303_v55 = vunpack.c.l.bf16 %v239_v46  ;;  %v304_v56 = vunpack.c.h.bf16 %v239_v46  ;;  %v333_v57 = vunpack.c.l.bf16 %v6596_v44  ;;  %v251_v36 = vld [vmem:[%s6520_s30 + $0x58] sm:$0xff]  }
  0x1d   : > { %5431 = vrot.lane.b32.xlu1 %v6598_v45, %s6461_s8  ;;  %v334_v58 = vunpack.c.h.bf16 %v6596_v44  ;;  %v6620_v59 = vpack.i.bf16 %v300_v51, %v299_v50  ;;  %v6622_v60 = vpack.i.bf16 %v326_v43, %v325_v42  ;;  %v337_v61 = vunpack.c.l.bf16 %v6604_v48  ;;  %v255_v42 = vld [vmem:[%s6520_s30 + $0x68] sm:$0xff]   ;;  %v6692_v51 = vld [vmem:[%s6520_s30 + $0x78] sm:$0xff]  }
  0x1e   : > { %v338_v62 = vunpack.c.h.bf16 %v6604_v48  ;;  %v6629_v0 = vpack.i.bf16 %v330_v52, %v329_v47  ;;  %v341_v2 = vunpack.c.l.bf16 %v6612_v53  ;;  %v342_v3 = vunpack.c.h.bf16 %v6612_v53 }
  0x1f   : > { %5273 = vmatpush3.bf16.msra.mxu0 %v5744_v13  ;;  %v6637_v5 = vpack.i.bf16 %v334_v58, %v333_v57  ;;  %v6646_v7 = vpack.i.bf16 %v304_v56, %v303_v55  ;;  %v307_v8 = vunpack.c.l.bf16 %v243_v1  ;;  %v308_v9 = vunpack.c.h.bf16 %v243_v1  ;;  %v263_v55 = vld [vmem:[%s6520_s30 + $0x88] sm:$0xff]  }
  0x20   : > { %5441 = vrot.lane.b32.xlu0 %v6547_v17, %s6461_s8  ;;  %5274 = vmatprep.subr.bf16.mxu0 %v5745_v18  ;;  %v6648_v13 = vpack.i.bf16 %v338_v62, %v337_v61  ;;  %v345_v14 = vunpack.c.l.bf16 %v6627_v63  ;;  %v346_v15 = vunpack.c.h.bf16 %v6627_v63  ;;  %v6655_v20 = vpack.i.bf16 %v342_v3, %v341_v2  ;;  %v267_v61 = vld [vmem:[%s6520_s30 + $0x98] sm:$0xff]   ;;  %v271_v2 = vld [vmem:[%s6520_s30 + $0xa8] sm:$0xff]  }
  0x21   : > { %5436 = vrot.lane.b32.xlu1 %v6620_v59, %s6461_s8  ;;  %v353_v24 = vunpack.c.l.bf16 %v6642_v6  ;;  %v311_v30 = vunpack.c.l.bf16 %v247_v23  ;;  %v312_v34 = vunpack.c.h.bf16 %v247_v23  ;;  %v315_v39 = vunpack.c.l.bf16 %v251_v36 }
  0x22   : > { %v6662_v29 = vpack.i.bf16 %v346_v15, %v345_v14  ;;  %v316_v41 = vunpack.c.h.bf16 %v251_v36  ;;  %v319_v47 = vunpack.c.l.bf16 %v255_v42  ;;  %v320_v50 = vunpack.c.h.bf16 %v255_v42  ;;  %v275_v14 = vld [vmem:[%s6520_s30 + $0xb8] sm:$0xff]  }
  0x23   : > { %5275 = vmatpush3.bf16.msra.mxu0 %v5745_v18  ;;  %v6679_v38 = vpack.i.bf16 %v312_v34, %v311_v30  ;;  %v324_v52 = vunpack.c.h.bf16 %v6692_v51  ;;  %v327_v57 = vunpack.c.l.bf16 %v263_v55  ;;  %v328_v58 = vunpack.c.h.bf16 %v263_v55  ;;  %v283_v30 = vld [vmem:[%s6520_s30 + $0xd8] sm:$0xff]  }
  0x24   : > { %5451 = vrot.lane.b32.xlu0 %v6566_v27, %s6461_s8  ;;  %v6689_v43 = vpack.i.bf16 %v316_v41, %v315_v39  ;;  %v331_v62 = vunpack.c.l.bf16 %v267_v61  ;;  %v339_v15 = vunpack.c.l.bf16 %v275_v14  ;;  %v347_v34 = vunpack.c.l.bf16 %v283_v30  ;;  %v287_v39 = vld [vmem:[%s6520_s30 + $0xe8] sm:$0xff]  }
  0x25   : > { %5446 = vrot.lane.b32.xlu1 %v6646_v7, %s6461_s8 }
  0x26   : > { %5277 = vmatmul.mubr.msk.bf16.vlgmr.msra.gmra.mrb[0].mxu0 %vm572_vm0, %v231_v4  ;;  %v6635_v4 = vld [vmem:[%s6520_s30 + $0xe0] sm:$0xff]  }
  0x27   : > { %5280 = vmatprep.mubr.msk.bf16.mxu0 %vm572_vm0, %v233_v25  ;;  %v349_v18 = vunpack.c.l.bf16 %v6635_v4  ;;  %v350_v19 = vunpack.c.h.bf16 %v6635_v4  ;;  %v354_v25 = vunpack.c.h.bf16 %v6642_v6 }
  0x28   : > { %5461 = vrot.lane.b32.xlu0 %v6579_v33, %s6461_s8 }
  0x29   : > { %v6670_v35 = vpack.i.bf16 %v350_v19, %v349_v18  ;;  %v340_v18 = vunpack.c.h.bf16 %v275_v14  ;;  %v279_v19 = vld [vmem:[%s6520_s30 + $0xc8] sm:$0xff]  }
  0x2c   : > { %5471 = vrot.lane.b32.xlu0 %v6589_v40, %s6461_s8 }
  0x2e   : > { %5281 = vmatmul.mubr.msk.bf16.gmra.mrb[4].mxu0 %vm572_vm0, %v235_v26  ;;  %v6668_v26 = vpack.i.bf16 %v308_v9, %v307_v8  ;;  %v335_v8 = vunpack.c.l.bf16 %v271_v2  ;;  %v336_v9 = vunpack.c.h.bf16 %v271_v2 }
  0x2f   : > { %5284 = vmatprep.mubr.msk.bf16.mxu0 %vm572_vm0, %v6528_v10  ;;  %v6672_v10 = vpack.i.bf16 %v354_v25, %v353_v24  ;;  %v343_v24 = vunpack.c.l.bf16 %v279_v19  ;;  %v344_v25 = vunpack.c.h.bf16 %v279_v19 }
  0x30   : > { %5481 = vrot.lane.b32.xlu0 %v6606_v49, %s6461_s8  ;;  %5456 = vrot.lane.b32.xlu1 %v6668_v26, %s6461_s8 }
  0x34   : > { %5491 = vrot.lane.b32.xlu0 %v6616_v54, %s6461_s8  ;;  %5466 = vrot.lane.b32.xlu1 %v6679_v38, %s6461_s8 }
  0x36   : > { %5285 = vmatmul.mubr.msk.bf16.gmra.mrb[8].mxu0 %vm572_vm0, %v239_v46  ;;  %v323_v46 = vunpack.c.l.bf16 %v6692_v51 }
  0x37   : > { %5288 = vmatprep.mubr.msk.bf16.mxu0 %vm572_vm0, %v6542_v16  ;;  %v6698_v16 = vpack.i.bf16 %v320_v50, %v319_v47  ;;  %v351_v47 = vunpack.c.l.bf16 %v287_v39  ;;  %v352_v50 = vunpack.c.h.bf16 %v287_v39 }
  0x38   : > { %5501 = vrot.lane.b32.xlu0 %v6622_v60, %s6461_s8  ;;  %5476 = vrot.lane.b32.xlu1 %v6689_v43, %s6461_s8  ;;  %v6710_v56 = vpack.i.bf16 %v324_v52, %v323_v46  ;;  %v291_v46 = vld [vmem:[%s6520_s30 + $0xf8] sm:$0xff]  }
  0x39   : > { %v355_v52 = vunpack.c.l.bf16 %v291_v46 }
  0x3c   : > { %5511 = vrot.lane.b32.xlu0 %v6629_v0, %s6461_s8  ;;  %5486 = vrot.lane.b32.xlu1 %v6698_v16, %s6461_s8 }
  0x3e   : > { %5289 = vmatmul.mubr.msk.bf16.gmra.mrb[12].mxu0 %vm572_vm0, %v243_v1  ;;  %v332_v1 = vunpack.c.h.bf16 %v267_v61 }
  0x3f   : > { %5292 = vmatprep.mubr.msk.bf16.mxu0 %vm572_vm0, %v6555_v21  ;;  %v6717_v21 = vpack.i.bf16 %v328_v58, %v327_v57 }
  0x40   : > { %5521 = vrot.lane.b32.xlu0 %v6637_v5, %s6461_s8  ;;  %5496 = vrot.lane.b32.xlu1 %v6710_v56, %s6461_s8  ;;  %v6727_v3 = vpack.i.bf16 %v332_v1, %v331_v62 }
  0x44   : > { %5531 = vrot.lane.b32.xlu0 %v6648_v13, %s6461_s8  ;;  %5506 = vrot.lane.b32.xlu1 %v6717_v21, %s6461_s8 }
  0x46   : > { %5293 = vmatmul.mubr.msk.bf16.gmra.mrb[16].mxu0 %vm572_vm0, %v247_v23  ;;  %v6744_v23 = vpack.i.bf16 %v340_v18, %v339_v15 }
  0x47   : > { %5296 = vmatprep.mubr.msk.bf16.mxu0 %vm572_vm0, %v6558_v22  ;;  %v6734_v22 = vpack.i.bf16 %v336_v9, %v335_v8 }
  0x48   : > { %5541 = vrot.lane.b32.xlu0 %v6655_v20, %s6461_s8  ;;  %5516 = vrot.lane.b32.xlu1 %v6727_v3, %s6461_s8 }
  0x4c   : > { %5551 = vrot.lane.b32.xlu0 %v6662_v29, %s6461_s8  ;;  %5526 = vrot.lane.b32.xlu1 %v6734_v22, %s6461_s8 }
  0x4e   : > { %5297 = vmatmul.mubr.msk.bf16.gmra.mrb[20].mxu0 %vm572_vm0, %v251_v36  ;;  %v348_v36 = vunpack.c.h.bf16 %v283_v30 }
  0x4f   : > { %5300 = vmatprep.mubr.msk.bf16.mxu0 %vm572_vm0, %v6569_v28  ;;  %v6751_v28 = vpack.i.bf16 %v344_v25, %v343_v24 }
  0x50   : > { %5561 = vrot.lane.b32.xlu0 %v6670_v35, %s6461_s8  ;;  %5536 = vrot.lane.b32.xlu1 %v6744_v23, %s6461_s8  ;;  %v5555_v41 = vpack.i.bf16 %v348_v36, %v347_v34 }
  0x54   : > { %5571 = vrot.lane.b32.xlu0 %v6672_v10, %s6461_s8  ;;  %5546 = vrot.lane.b32.xlu1 %v6751_v28, %s6461_s8 }
  0x56   : > { %5301 = vmatmul.mubr.msk.bf16.gmra.mrb[24].mxu0 %vm572_vm0, %v255_v42  ;;  %v5565_v42 = vpack.i.bf16 %v352_v50, %v351_v47 }
  0x57   : > { %5304 = vmatprep.mubr.msk.bf16.mxu0 %vm572_vm0, %v6574_v31  ;;  %v356_v31 = vunpack.c.h.bf16 %v291_v46 }
  0x58   : > { %5581 = vrot.lane.b32.xlu0 %v6530_v11, %s6462_s13  ;;  %5556 = vrot.lane.b32.xlu1 %v5555_v41, %s6461_s8 }
  0x59   : > { %v5575_v11 = vpack.i.bf16 %v356_v31, %v355_v52 }
  0x5c   : > { %5591 = vrot.lane.b32.xlu0 %v6598_v45, %s6462_s13  ;;  %5566 = vrot.lane.b32.xlu1 %v5565_v42, %s6461_s8 }
  0x5e   : > { %5305 = vmatmul.mubr.msk.bf16.gmra.mrb[28].mxu0 %vm572_vm0, %v6692_v51 }
  0x5f   : > { %5308 = vmatprep.mubr.msk.bf16.mxu0 %vm572_vm0, %v6577_v32  ;;  %v4997_v32 = vld [vmem:[%s9647_s4] ss:$0 sm:$0xff] }
  0x60   : > { %5601 = vrot.lane.b32.xlu0 %v6547_v17, %s6462_s13  ;;  %5576 = vrot.lane.b32.xlu1 %v5575_v11, %s6461_s8 }
  0x64   : > { %5611 = vrot.lane.b32.xlu0 %v6566_v27, %s6462_s13  ;;  %5586 = vrot.lane.b32.xlu1 %v6534_v12, %s6462_s13 }
  0x66   : > { %5309 = vmatmul.mubr.msk.bf16.gmra.mrb[32].mxu0 %vm572_vm0, %v263_v55 }
  0x67   : > { %5312 = vmatprep.mubr.msk.bf16.mxu0 %vm572_vm0, %v6587_v37 }
  0x68   : > { %5621 = vrot.lane.b32.xlu0 %v6579_v33, %s6462_s13  ;;  %5596 = vrot.lane.b32.xlu1 %v6620_v59, %s6462_s13 }
  0x6c   : > { %5631 = vrot.lane.b32.xlu0 %v6589_v40, %s6462_s13  ;;  %5606 = vrot.lane.b32.xlu1 %v6646_v7, %s6462_s13 }
  0x6e   : > { %5313 = vmatmul.mubr.msk.bf16.gmra.mrb[36].mxu0 %vm572_vm0, %v267_v61 }
  0x6f   : > { %5316 = vmatprep.mubr.msk.bf16.mxu0 %vm572_vm0, %v6596_v44 }
  0x70   : > { %5641 = vrot.lane.b32.xlu0 %v6606_v49, %s6462_s13  ;;  %5616 = vrot.lane.b32.xlu1 %v6668_v26, %s6462_s13 }
  0x74   : > { %5651 = vrot.lane.b32.xlu0 %v6616_v54, %s6462_s13  ;;  %5626 = vrot.lane.b32.xlu1 %v6679_v38, %s6462_s13 }
  0x76   : > { %5317 = vmatmul.mubr.msk.bf16.gmra.mrb[40].mxu0 %vm572_vm0, %v271_v2 }
  0x77   : > { %5320 = vmatprep.mubr.msk.bf16.mxu0 %vm572_vm0, %v6604_v48 }
  0x78   : > { %5661 = vrot.lane.b32.xlu0 %v6622_v60, %s6462_s13  ;;  %5636 = vrot.lane.b32.xlu1 %v6689_v43, %s6462_s13 }
  0x7c   : > { %5671 = vrot.lane.b32.xlu0 %v6629_v0, %s6462_s13  ;;  %5646 = vrot.lane.b32.xlu1 %v6698_v16, %s6462_s13 }
  0x7e   : > { %5321 = vmatmul.mubr.msk.bf16.gmra.mrb[44].mxu0 %vm572_vm0, %v275_v14  ;;  %v6933_v14 = vld [vmem:[%s9645_s2] ss:$0 sm:$0xff] }
  0x7f   : > { %5324 = vmatprep.mubr.msk.bf16.mxu0 %vm572_vm0, %v6612_v53 }
  0x80   : > { %5681 = vrot.lane.b32.xlu0 %v6637_v5, %s6462_s13  ;;  %5656 = vrot.lane.b32.xlu1 %v6710_v56, %s6462_s13 }
  0x84   : > { %5691 = vrot.lane.b32.xlu0 %v6648_v13, %s6462_s13  ;;  %5666 = vrot.lane.b32.xlu1 %v6717_v21, %s6462_s13 }
  0x86   : > { %5325 = vmatmul.mubr.msk.bf16.gmra.mrb[48].mxu0 %vm572_vm0, %v279_v19 }
  0x87   : > { %5328 = vmatprep.mubr.msk.bf16.mxu0 %vm572_vm0, %v6627_v63 }
  0x88   : > { %5701 = vrot.lane.b32.xlu0 %v6655_v20, %s6462_s13  ;;  %5676 = vrot.lane.b32.xlu1 %v6727_v3, %s6462_s13 }
  0x8a   : > { %v6826_v12 = vpop.permute.xlu0 %5421 }
  0x8c   : > { %5711 = vrot.lane.b32.xlu0 %v6662_v29, %s6462_s13  ;;  %5686 = vrot.lane.b32.xlu1 %v6734_v22, %s6462_s13 }
  0x8e   : > { %v6832_v17 = vpop.permute.xlu0 %5426  ;;  %5329 = vmatmul.mubr.msk.bf16.gmra.mrb[52].mxu0 %vm572_vm0, %v283_v30 }
  0x8f   : > { %5332 = vmatprep.mubr.msk.bf16.mxu0 %vm572_vm0, %v6635_v4  ;;  %v6888_v5 = vpop.permute.xlu1 %5431 }
  0x90   : > { %5721 = vrot.lane.b32.xlu0 %v6670_v35, %s6462_s13  ;;  %5696 = vrot.lane.b32.xlu1 %v6744_v23, %s6462_s13 }
  0x92   : > { %v6841_v27 = vpop.permute.xlu0 %5441 }
  0x93   : > { %v6894_v13 = vpop.permute.xlu1 %5436 }
  0x94   : > { %5731 = vrot.lane.b32.xlu0 %v6672_v10, %s6462_s13  ;;  %5706 = vrot.lane.b32.xlu1 %v6751_v28, %s6462_s13 }
  0x96   : > { %v6850_v33 = vpop.permute.xlu0 %5451  ;;  %5333 = vmatmul.mubr.msk.bf16.gmra.mrb[56].mxu0 %vm572_vm0, %v287_v39 }
  0x97   : > { %5336 = vmatprep.mubr.msk.bf16.mxu0 %vm572_vm0, %v6642_v6  ;;  %v6898_v29 = vpop.permute.xlu1 %5446 }
  0x98   : > { %3478 = vrot.lane.b32.xlu0 %v4997_v32, %s6462_s13  ;;  %5716 = vrot.lane.b32.xlu1 %v5555_v41, %s6462_s13 }
  0x9a   : > { %v6858_v37 = vpop.permute.xlu0 %5461 }
  0x9c   : > { %5726 = vrot.lane.b32.xlu1 %v5565_v42, %s6462_s13 }
  0x9e   : > { %v6861_v40 = vpop.permute.xlu0 %5471  ;;  %5337 = vmatmul.mubr.msk.bf16.gmra.mrb[60].mxu0 %vm572_vm0, %v291_v46 }
  0xa0   : > { %5736 = vrot.lane.b32.xlu1 %v5575_v11, %s6462_s13 }
  0xa2   : > { %v6865_v44 = vpop.permute.xlu0 %5481  ;;  %v6904_v10 = vpop.permute.xlu1 %5456 }
  0xa6   : > { %v6868_v45 = vpop.permute.xlu0 %5491  ;;  %v6908_v43 = vpop.permute.xlu1 %5466 }
  0xaa   : > { %v6870_v48 = vpop.permute.xlu0 %5501  ;;  %v6914_v55 = vpop.permute.xlu1 %5476 }
  0xae   : > { %v6872_v49 = vpop.permute.xlu0 %5511  ;;  %v6918_v57 = vpop.permute.xlu1 %5486 }
  0xb2   : > { %v6874_v53 = vpop.permute.xlu0 %5521  ;;  %v6924_v21 = vpop.permute.xlu1 %5496 }
  0xb6   : > { %v6876_v54 = vpop.permute.xlu0 %5531  ;;  %v6928_v9 = vpop.permute.xlu1 %5506 }
  0xba   : > { %v6878_v59 = vpop.permute.xlu0 %5541  ;;  %v6948_v28 = vpop.permute.xlu1 %5516 }
  0xbe   : > { %v6880_v60 = vpop.permute.xlu0 %5551  ;;  %v6962_v31 = vpop.permute.xlu1 %5526 }
  0xbf   : > { %9895 = vst [vmem:[#allocation2_spill] sm:$0xff] %v6880_v60 }
  0xc2   : > { %v6882_v63 = vpop.permute.xlu0 %5561 }
  0xc3   : > { %9896 = vst [vmem:[#allocation3_spill] sm:$0xff] %v6882_v63  ;;  %v5443_v63 = vunpack.i.l.bf16 %v6841_v27 }
  0xc6   : > { %v6884_v0 = vpop.permute.xlu0 %5571 }
  0xc7   : > { %9897 = vst [vmem:[#allocation4_spill] sm:$0xff] %v6884_v0 }
  0xca   : > { %v6886_v4 = vpop.permute.xlu0 %5581 }
  0xcb   : > { %9898 = vst [vmem:[#allocation5_spill] sm:$0xff] %v6886_v4 }
  0xce   : > { %v6890_v6 = vpop.permute.xlu0 %5591 }
  0xcf   : > { %9899 = vst [vmem:[#allocation6_spill] sm:$0xff] %v6890_v6 }
  0xd2   : > { %v6892_v7 = vpop.permute.xlu0 %5601 }
  0xd3   : > { %9900 = vst [vmem:[#allocation7_spill] sm:$0xff] %v6892_v7 }
  0xd6   : > { %v6896_v20 = vpop.permute.xlu0 %5611 }
  0xd7   : > { %9901 = vst [vmem:[#allocation8_spill] sm:$0xff] %v6896_v20 }
  0xda   : > { %v6900_v26 = vpop.permute.xlu0 %5621 }
  0xdb   : > { %9902 = vst [vmem:[#allocation9_spill] sm:$0xff] %v6900_v26 }
  0xde   : > { %v6902_v35 = vpop.permute.xlu0 %5631 }
  0xdf   : > { %9903 = vst [vmem:[#allocation10_spill] sm:$0xff] %v6902_v35 }
  0xe2   : > { %v6906_v38 = vpop.permute.xlu0 %5641 }
  0xe3   : > { %9904 = vst [vmem:[#allocation11_spill] sm:$0xff] %v6906_v38 }
  0xe6   : > { %v6910_v51 = vpop.permute.xlu0 %5651 }
  0xe7   : > { %9905 = vst [vmem:[#allocation12_spill] sm:$0xff] %v6910_v51 }
  0xea   : > { %v6912_v16 = vpop.permute.xlu0 %5661 }
  0xeb   : > { %9906 = vst [vmem:[#allocation13_spill] sm:$0xff] %v6912_v16 }
  0xee   : > { %v6916_v56 = vpop.permute.xlu0 %5671 }
  0xef   : > { %9907 = vst [vmem:[#allocation14_spill] sm:$0xff] %v6916_v56 }
  0xf2   : > { %v6920_v58 = vpop.permute.xlu0 %5681 }
  0xf3   : > { %9908 = vst [vmem:[#allocation15_spill] sm:$0xff] %v6920_v58 }
  0xf6   : > { %v6922_v61 = vpop.permute.xlu0 %5691 }
  0xf7   : > { %9909 = vst [vmem:[#allocation16_spill] sm:$0xff] %v6922_v61  ;;  %v6994_v61 = vpop.permute.xlu1 %5536 }
  0xf9   : > { %v5278_v62 = vpop.f32.mrb[0].mxu0 }
  0xfa   : > { %v6926_v1 = vpop.permute.xlu0 %5701  ;;  %v703_v2 = vpop.f32.mrb[1].mxu0  ;;  %v6951_v36 = vadd.f32 %v5278_v62, %v6933_v14 }
  0xfb   : > { %9910 = vst [vmem:[#allocation17_spill] sm:$0xff] %v6926_v1  ;;  %v5279_v3 = vpop.f32.mrb[2].mxu0  ;;  %v6938_v15 = vadd.f32 %v6933_v14, %v703_v2 }
  0xfc   : > { %v706_v8 = vpop.f32.mrb[3].mxu0  ;;  %v6946_v25 = vadd.f32 %v5279_v3, %v6933_v14  ;;  %9916 = vst [vmem:[#allocation23_spill] sm:$0xff] %v6951_v36  ;;  %v1408_v42 = vmul.f32 0.01, %v6951_v36  ;;  %v4901_v52 = vmul.f32 -1.442695, %v6951_v36 }
  0xfd   : > { %9912 = vst [vmem:[#allocation19_spill] sm:$0xff] %v6938_v15  ;;  %v6941_v19 = vadd.f32 %v6933_v14, %v706_v8  ;;  %v4899_v39 = vmul.f32 -1.442695, %v6938_v15  ;;  %vm1344_vm2 = vcmp.ge.f32.partialorder %v6951_v36, 0.0  ;;  %vm1342_vm3 = vcmp.ge.f32.partialorder %v6938_v15, 0.0 }
  0xfe   : > { %v6935_v22 = vpop.permute.xlu0 %5711  ;;  %9915 = vst [vmem:[#allocation22_spill] sm:$0xff] %v6946_v25  ;;  %v1409_v50 = vmul.f32 0.01, %v6946_v25  ;;  %v4902_v46 = vmul.f32 -1.442695, %v6946_v25  ;;  %vm1345_vm1 = vcmp.ge.f32.partialorder %v6946_v25, 0.0 }
  0xff   : > { %9911 = vst [vmem:[#allocation18_spill] sm:$0xff] %v6935_v22  ;;  %9913 = vst [vmem:[#allocation20_spill] sm:$0xff] %v6941_v19  ;;  %v4900_v41 = vmul.f32 -1.442695, %v6941_v19  ;;  %5812 = vpow2.f32 %v4899_v39  ;;  %v1407_v8 = vmul.f32 0.01, %v6941_v19 }
 0x100   : > { %v1473_v3 = vsel %vm1345_vm1, %v6946_v25, %v1409_v50  ;;  %vm1343_vm4 = vcmp.ge.f32.partialorder %v6941_v19, 0.0  ;;  %v1472_v50 = vsel %vm1344_vm2, %v6951_v36, %v1408_v42 }
 0x101   : > { %v5282_v18 = vpop.f32.mrb[4].mxu0  ;;  %5814 = vpow2.f32 %v4900_v41 }
 0x102   : > { %v6943_v23 = vpop.permute.xlu0 %5721  ;;  %v719_v24 = vpop.f32.mrb[5].mxu0  ;;  %5816 = vpow2.f32 %v4902_v46  ;;  %v6977_v41 = vadd.f32 %v5282_v18, %v6933_v14  ;;  %v1471_v18 = vsel %vm1343_vm4, %v6941_v19, %v1407_v8 }
 0x103   : > { %9914 = vst [vmem:[#allocation21_spill] sm:$0xff] %v6943_v23  ;;  %v5283_v30 = vpop.f32.mrb[6].mxu0  ;;  %v1406_v23 = vmul.f32 0.01, %v6938_v15  ;;  %5818 = vpow2.f32 %v4901_v52 }
 0x104   : > { %v722_v34 = vpop.f32.mrb[7].mxu0  ;;  %v6967_v32 = vadd.f32 %v5283_v30, %v6933_v14  ;;  %9919 = vst [vmem:[#allocation26_spill] sm:$0xff] %v6977_v41  ;;  %vm1348_vm6 = vcmp.ge.f32.partialorder %v6977_v41, 0.0 }
 0x105   : > { %v6980_v30 = vadd.f32 %v6933_v14, %v722_v34  ;;  %v1412_v34 = vmul.f32 0.01, %v6977_v41 }
 0x106   : > { %v6955_v47 = vpop.permute.xlu0 %5731  ;;  %9918 = vst [vmem:[#allocation25_spill] sm:$0xff] %v6967_v32  ;;  %v1413_v46 = vmul.f32 0.01, %v6967_v32  ;;  %vm1349_vm5 = vcmp.ge.f32.partialorder %v6967_v32, 0.0  ;;  %v4906_v51 = vmul.f32 -1.442695, %v6967_v32 }
 0x107   : > { %9917 = vst [vmem:[#allocation24_spill] sm:$0xff] %v6955_v47  ;;  %9920 = vst [vmem:[#allocation27_spill] sm:$0xff] %v6980_v30  ;;  %vm1347_vm7 = vcmp.ge.f32.partialorder %v6980_v30, 0.0  ;;  %v4904_v7 = vmul.f32 -1.442695, %v6980_v30 }
 0x108   : > { %v1477_v8 = vsel %vm1349_vm5, %v6967_v32, %v1413_v46 }
 0x109   : > { %v5286_v11 = vpop.f32.mrb[8].mxu0  ;;  %v5813_v16 = vpop.eup %5812 }
 0x10a   : > { %v6969_v62 = vpop.permute.xlu0 %3478  ;;  %v735_v2 = vpop.f32.mrb[9].mxu0 }
 0x10b   : > { %v5287_v39 = vpop.f32.mrb[10].mxu0  ;;  %v3484_v47 = vmul.f32 %v6969_v62, %v1473_v3  ;;  %v6987_v3 = vadd.f32 %v6933_v14, %v719_v24  ;;  %v3483_v1 = vmul.f32 %v6969_v62, %v1472_v50  ;;  %v3482_v42 = vmul.f32 %v6969_v62, %v1471_v18  ;;  %v5815_v38 = vpop.eup %5814 }
 0x10c   : > { %v738_v22 = vpop.f32.mrb[11].mxu0  ;;  %v1470_v24 = vsel %vm1342_vm3, %v6938_v15, %v1406_v23  ;;  %v7004_v52 = vadd.f32 %v5287_v39, %v6933_v14  ;;  %v1411_v50 = vmul.f32 0.01, %v6980_v30  ;;  %v7013_v23 = vadd.f32 %v5286_v11, %v6933_v14  ;;  %v5817_v20 = vpop.eup %5816 }
 0x10d   : > { %9921 = vst [vmem:[#allocation28_spill] sm:$0xff] %v6987_v3  ;;  %3615 = vrot.lane.b32.xlu0 %v3484_v47, %s6462_s13  ;;  %3613 = vrot.lane.b32.xlu1 %v3483_v1, %s6462_s13  ;;  %v4905_v47 = vmul.f32 -1.442695, %v6977_v41  ;;  %v4903_v58 = vmul.f32 -1.442695, %v6987_v3  ;;  %v3481_v1 = vmul.f32 %v6969_v62, %v1470_v24  ;;  %v1476_v39 = vsel %vm1348_vm6, %v6977_v41, %v1412_v34  ;;  %v5819_v6 = vpop.eup %5818 }
 0x10e   : > { %9922 = vst [vmem:[#allocation29_spill] sm:$0xff] %v7004_v52  ;;  %9923 = vst [vmem:[#allocation30_spill] sm:$0xff] %v7013_v23  ;;  %v1410_v46 = vmul.f32 0.01, %v6987_v3  ;;  %v3488_v24 = vmul.f32 %v6969_v62, %v1477_v8  ;;  %vm1346_vm8 = vcmp.ge.f32.partialorder %v6987_v3, 0.0  ;;  %v7024_v11 = vadd.f32 %v6933_v14, %v738_v22 }
 0x10f   : > { %5820 = vpow2.f32 %v4905_v47  ;;  %v1475_v34 = vsel %vm1347_vm7, %v6980_v30, %v1411_v50  ;;  %v1417_v26 = vmul.f32 0.01, %v7004_v52  ;;  %v3487_v8 = vmul.f32 %v6969_v62, %v1476_v39 }
 0x110   : > { %9924 = vst [vmem:[#allocation31_spill] sm:$0xff] %v7024_v11  ;;  %5822 = vpow2.f32 %v4903_v58  ;;  %vm1353_vm9 = vcmp.ge.f32.partialorder %v7004_v52, 0.0  ;;  %v1150_v47 = vadd.f32 1.0, %v5813_v16  ;;  %v7035_v22 = vadd.f32 %v6933_v14, %v735_v2 }
 0x111   : > { %3611 = vrot.lane.b32.xlu0 %v3482_v42, %s6462_s13  ;;  %v5290_v18 = vpop.f32.mrb[12].mxu0  ;;  %3609 = vrot.lane.b32.xlu1 %v3481_v1, %s6462_s13  ;;  %v7029_v1 = vpop.permute.xlu1 %5546  ;;  %v1474_v50 = vsel %vm1346_vm8, %v6987_v3, %v1410_v46  ;;  %v1416_v58 = vmul.f32 0.01, %v7013_v23  ;;  %v1151_v4 = vadd.f32 1.0, %v5815_v38  ;;  %5824 = vpow2.f32 %v4906_v51 }
 0x112   : > { %v7015_v56 = vpop.f32.mrb[13].mxu0  ;;  %9925 = vst [vmem:[#allocation32_spill] sm:$0xff] %v7035_v22  ;;  %vm1352_vm10 = vcmp.ge.f32.partialorder %v7013_v23, 0.0  ;;  %v1153_v39 = vadd.f32 1.0, %v5817_v20  ;;  %v1481_v2 = vsel %vm1353_vm9, %v7004_v52, %v1417_v26  ;;  %v1415_v30 = vmul.f32 0.01, %v7024_v11 }
 0x113   : > { %v5291_v42 = vpop.f32.mrb[14].mxu0  ;;  %5826 = vpow2.f32 %v4904_v7  ;;  %v3485_v38 = vmul.f32 %v6969_v62, %v1474_v50  ;;  %vm1351_vm11 = vcmp.ge.f32.partialorder %v7024_v11, 0.0  ;;  %v1152_v46 = vadd.f32 1.0, %v5819_v6 }
 0x114   : > { %v754_v35 = vpop.f32.mrb[15].mxu0  ;;  %v7045_v16 = vadd.f32 %v5291_v42, %v6933_v14  ;;  %5828 = vrcp.f32 %v1150_v47  ;;  %v1480_v20 = vsel %vm1352_vm10, %v7013_v23, %v1416_v58  ;;  %v1414_v42 = vmul.f32 0.01, %v7035_v22 }
 0x115   : > { %3623 = vrot.lane.b32.xlu0 %v3488_v24, %s6462_s13  ;;  %3621 = vrot.lane.b32.xlu1 %v3487_v8, %s6462_s13  ;;  %v3486_v24 = vmul.f32 %v6969_v62, %v1475_v34  ;;  %5830 = vrcp.f32 %v1151_v4  ;;  %v7059_v26 = vadd.f32 %v5290_v18, %v6933_v14  ;;  %v7061_v7 = vpop.permute.xlu1 %5556  ;;  %v3492_v50 = vmul.f32 %v6969_v62, %v1481_v2 }
 0x116   : > { %9926 = vst [vmem:[#allocation33_spill] sm:$0xff] %v7045_v16  ;;  %9928 = vst [vmem:[#allocation35_spill] sm:$0xff] %v7061_v7  ;;  %vm1350_vm12 = vcmp.ge.f32.partialorder %v7035_v22, 0.0  ;;  %5832 = vrcp.f32 %v1153_v39  ;;  %v7067_v6 = vadd.f32 %v6933_v14, %v754_v35  ;;  %v1479_v4 = vsel %vm1351_vm11, %v7024_v11, %v1415_v30 }
 0x117   : > { %9927 = vst [vmem:[#allocation34_spill] sm:$0xff] %v7059_v26  ;;  %v1421_v18 = vmul.f32 0.01, %v7045_v16  ;;  %v4909_v58 = vmul.f32 -1.442695, %v7013_v23  ;;  %vm1357_vm13 = vcmp.ge.f32.partialorder %v7045_v16, 0.0  ;;  %5834 = vrcp.f32 %v1152_v46 }
 0x118   : > { %9929 = vst [vmem:[#allocation36_spill] sm:$0xff] %v7067_v6  ;;  %v4907_v35 = vmul.f32 -1.442695, %v7035_v22  ;;  %v7082_v2 = vadd.f32 %v6933_v14, %v7015_v56  ;;  %v1478_v30 = vsel %vm1350_vm12, %v7035_v22, %v1414_v42  ;;  %v4910_v3 = vmul.f32 -1.442695, %v7004_v52 }
 0x119   : > { %3619 = vrot.lane.b32.xlu0 %v3486_v24, %s6462_s13  ;;  %v7051_v51 = vpop.f32.mrb[16].mxu0  ;;  %3617 = vrot.lane.b32.xlu1 %v3485_v38, %s6462_s13  ;;  %v3491_v24 = vmul.f32 %v6969_v62, %v1480_v20  ;;  %v5821_v39 = vpop.eup %5820  ;;  %vm1356_vm14 = vcmp.ge.f32.partialorder %v7059_v26, 0.0  ;;  %v1420_v20 = vmul.f32 0.01, %v7059_v26  ;;  %v4908_v46 = vmul.f32 -1.442695, %v7024_v11 }
 0x11a   : > { %v7054_v34 = vpop.f32.mrb[17].mxu0  ;;  %9930 = vst [vmem:[#allocation37_spill] sm:$0xff] %v7082_v2  ;;  %v5823_v38 = vpop.eup %5822  ;;  %v1485_v23 = vsel %vm1357_vm13, %v7045_v16, %v1421_v18  ;;  %v1419_v56 = vmul.f32 0.01, %v7067_v6  ;;  %v1156_v41 = vadd.f32 1.0, %v5821_v39  ;;  %5836 = vpow2.f32 %v4909_v58  ;;  %v5778_v11 = vld [vmem:[%s9646_s3] sm:$0xff]  }
 0x11b   : > { %v5295_v8 = vpop.f32.mrb[18].mxu0  ;;  %v5825_v32 = vpop.eup %5824  ;;  %vm1355_vm15 = vcmp.ge.f32.partialorder %v7067_v6, 0.0  ;;  %5838 = vpow2.f32 %v4907_v35  ;;  %v1484_v58 = vsel %vm1356_vm14, %v7059_v26, %v1420_v20  ;;  %v1418_v39 = vmul.f32 0.01, %v7082_v2  ;;  %5340 = vmatprep.subr.bf16.mxu1 %v5778_v11 }
 0x11c   : > { %v7069_v47 = vpop.f32.mrb[19].mxu0  ;;  %v7093_v42 = vpop.permute.xlu1 %5566  ;;  %v1154_v22 = vadd.f32 1.0, %v5823_v38  ;;  %5840 = vpow2.f32 %v4910_v3  ;;  %v3496_v52 = vmul.f32 %v6969_v62, %v1485_v23  ;;  %vm1354_vm0 = vcmp.ge.f32.partialorder %v7082_v2, 0.0  ;;  %5341 = vmatpush3.bf16.msra.mxu1 %v5778_v11 }
 0x11d   : > { %3631 = vrot.lane.b32.xlu0 %v3492_v50, %s6462_s13  ;;  %3629 = vrot.lane.b32.xlu1 %v3491_v24, %s6462_s13  ;;  %v3490_v50 = vmul.f32 %v6969_v62, %v1479_v4  ;;  %9931 = vst [vmem:[#allocation38_spill] sm:$0xff] %v7093_v42  ;;  %v3489_v24 = vmul.f32 %v6969_v62, %v1478_v30  ;;  %v1157_v19 = vadd.f32 1.0, %v5825_v32  ;;  %5842 = vpow2.f32 %v4908_v46  ;;  %v5779_v32 = vld [vmem:[%s9646_s3 + $0x8] sm:$0xff]  }
 0x11e   : > { %v1483_v38 = vsel %vm1355_vm15, %v7067_v6, %v1419_v56  ;;  %v5424_v20 = vunpack.i.h.bf16 %v6826_v12  ;;  %5844 = vrcp.f32 %v1156_v41  ;;  %v3495_v23 = vmul.f32 %v6969_v62, %v1484_v58  ;;  %5342 = vmatprep.subr.bf16.mxu1 %v5779_v32 }
 0x11f   : > { %v7133_v56 = vadd.f32 %v7051_v51, %v6933_v14  ;;  %v7136_v11 = vadd.f32 %v5295_v8, %v6933_v14  ;;  %v1482_v41 = vsel %vm1354_vm0, %v7082_v2, %v1418_v39  ;;  %v5429_v58 = vunpack.i.h.bf16 %v6832_v17 }
 0x120   : > { %5846 = vrcp.f32 %v1154_v22  ;;  %v7143_v25 = vpop.permute.xlu1 %5576  ;;  %v5428_v8 = vunpack.i.l.bf16 %v6832_v17  ;;  %5343 = vmatpush3.bf16.msra.mxu1 %v5779_v32  ;;  %v3493_v22 = vmul.f32 %v6969_v62, %v1482_v41  ;;  %v7160_v17 = vadd.f32 %v6933_v14, %v7054_v34 }
 0x121   : > { %3627 = vrot.lane.b32.xlu0 %v3490_v50, %s6462_s13  ;;  %v7097_v4 = vpop.f32.mrb[20].mxu0  ;;  %v5827_v50 = vpop.eup %5826  ;;  %3625 = vrot.lane.b32.xlu1 %v3489_v24, %s6462_s13  ;;  %9935 = vst [vmem:[#allocation42_spill] sm:$0xff] %v7133_v56  ;;  %9936 = vst [vmem:[#allocation43_spill] sm:$0xff] %v7136_v11  ;;  %5848 = vrcp.f32 %v1157_v19  ;;  %v1425_v32 = vmul.f32 0.01, %v7136_v11  ;;  %vm1360_vm1 = vcmp.ge.f32.partialorder %v7133_v56, 0.0  ;;  %v5449_v42 = vunpack.i.h.bf16 %v6898_v29 }
 0x122   : > { %v7103_v18 = vpop.f32.mrb[21].mxu0  ;;  %v7114_v35 = vpop.eup %5828  ;;  %v1155_v24 = vadd.f32 1.0, %v5827_v50  ;;  %9937 = vst [vmem:[#allocation44_spill] sm:$0xff] %v7143_v25  ;;  %v3494_v50 = vmul.f32 %v6969_v62, %v1483_v38  ;;  %9939 = vst [vmem:[#allocation46_spill] sm:$0xff] %v7160_v17  ;;  %vm1361_vm2 = vcmp.ge.f32.partialorder %v7136_v11, 0.0  ;;  %vm1358_vm3 = vcmp.ge.f32.partialorder %v7160_v17, 0.0 }
 0x123   : > { %v7110_v30 = vpop.f32.mrb[22].mxu0  ;;  %9932 = vst [vmem:[#allocation39_spill] sm:$0xff] %v7114_v35  ;;  %v7121_v3 = vpop.eup %5830 }
 0x124   : > { %v7116_v15 = vpop.f32.mrb[23].mxu0  ;;  %9933 = vst [vmem:[#allocation40_spill] sm:$0xff] %v7121_v3  ;;  %v7129_v46 = vpop.eup %5832  ;;  %v1791_v36 = vmul.f32 %v7121_v3, %v5424_v20  ;;  %5850 = vrcp.f32 %v1155_v24  ;;  %v1424_v20 = vmul.f32 0.01, %v7133_v56  ;;  %v7174_v24 = vadd.f32 %v6933_v14, %v7069_v47 }
 0x125   : > { %3639 = vrot.lane.b32.xlu0 %v3496_v52, %s6462_s13  ;;  %9934 = vst [vmem:[#allocation41_spill] sm:$0xff] %v7129_v46  ;;  %v5423_v52 = vunpack.i.l.bf16 %v6826_v12  ;;  %3637 = vrot.lane.b32.xlu1 %v3495_v23, %s6462_s13  ;;  %v7147_v51 = vpop.eup %5834  ;;  %v4913_v12 = vmul.f32 -1.442695, %v7059_v26  ;;  %v1793_v23 = vmul.f32 %v7129_v46, %v5429_v58  ;;  %v4911_v46 = vmul.f32 -1.442695, %v7082_v2 }
 0x126   : > { %9938 = vst [vmem:[#allocation45_spill] sm:$0xff] %v7147_v51  ;;  %v1792_v58 = vmul.f32 %v7147_v51, %v5428_v8  ;;  %9940 = vst [vmem:[#allocation47_spill] sm:$0xff] %v7174_v24  ;;  %v4914_v8 = vmul.f32 -1.442695, %v7045_v16  ;;  %v1489_v51 = vsel %vm1361_vm2, %v7136_v11, %v1425_v32  ;;  %v4912_v47 = vmul.f32 -1.442695, %v7067_v6 }
 0x127   : > { %v1790_v38 = vmul.f32 %v7114_v35, %v5423_v52  ;;  %5852 = vpow2.f32 %v4913_v12  ;;  %v3500_v2 = vmul.f32 %v6969_v62, %v1489_v51  ;;  %vm1359_vm4 = vcmp.ge.f32.partialorder %v7174_v24, 0.0 }
 0x128   : > { %v1855_v26 = vpack.c.bf16 %v1793_v23, %v1792_v58  ;;  %5854 = vpow2.f32 %v4911_v46  ;;  %v5439_v46 = vunpack.i.h.bf16 %v6894_v13 }
 0x129   : > { %3635 = vrot.lane.b32.xlu0 %v3494_v50, %s6462_s13  ;;  %v7154_v39 = vpop.f32.mrb[24].mxu0  ;;  %v5837_v50 = vpop.eup %5836  ;;  %3633 = vrot.lane.b32.xlu1 %v3493_v22, %s6462_s13  ;;  %v1854_v3 = vpack.c.bf16 %v1791_v36, %v1790_v38  ;;  %v1488_v38 = vsel %vm1360_vm1, %v7133_v56, %v1424_v20  ;;  %v1423_v20 = vmul.f32 0.01, %v7174_v24  ;;  %5856 = vpow2.f32 %v4914_v8 }
 0x12a   : > { %v7162_v19 = vpop.f32.mrb[25].mxu0  ;;  %v5839_v34 = vpop.eup %5838  ;;  %v1160_v32 = vadd.f32 1.0, %v5837_v50  ;;  %5858 = vpow2.f32 %v4912_v47  ;;  %v5434_v8 = vunpack.i.h.bf16 %v6888_v5  ;;  %v5438_v47 = vunpack.i.l.bf16 %v6894_v13 }
 0x12b   : > { %v7167_v41 = vpop.f32.mrb[26].mxu0  ;;  %v5841_v35 = vpop.eup %5840  ;;  %v1158_v50 = vadd.f32 1.0, %v5839_v34  ;;  %v7225_v34 = vadd.f32 %v7110_v30, %v6933_v14 }
 0x12c   : > { %v7176_v52 = vpop.f32.mrb[27].mxu0  ;;  %v7179_v22 = vpop.permute.xlu1 %5586  ;;  %v1161_v23 = vadd.f32 1.0, %v5841_v35 }
 0x12d   : > { %9941 = vst [vmem:[#allocation48_spill] sm:$0xff] %v7179_v22  ;;  %1922 = vrot.lane.b32.xlu0 %v1854_v3, %s6461_s8  ;;  %v5843_v36 = vpop.eup %5842  ;;  %1924 = vrot.lane.b32.xlu1 %v1855_v26, %s6461_s8  ;;  %v1422_v3 = vmul.f32 0.01, %v7160_v17  ;;  %v3499_v22 = vmul.f32 %v6969_v62, %v1488_v38  ;;  %9948 = vst [vmem:[#allocation55_spill] sm:$0xff] %v7225_v34  ;;  %vm1365_vm6 = vcmp.ge.f32.partialorder %v7225_v34, 0.0 }
 0x12e   : > { %v7185_v0 = vpop.eup %5844  ;;  %v1159_v35 = vadd.f32 1.0, %v5843_v36  ;;  %5860 = vrcp.f32 %v1161_v23  ;;  %v5433_v23 = vunpack.i.l.bf16 %v6888_v5 }
 0x12f   : > { %9942 = vst [vmem:[#allocation49_spill] sm:$0xff] %v7185_v0  ;;  %v7194_v58 = vpop.eup %5846  ;;  %v1486_v16 = vsel %vm1358_vm3, %v7160_v17, %v1422_v3  ;;  %v7221_v3 = vadd.f32 %v7097_v4, %v6933_v14  ;;  %5862 = vrcp.f32 %v1160_v32  ;;  %v7237_v4 = vadd.f32 %v6933_v14, %v7103_v18 }
 0x130   : > { %9943 = vst [vmem:[#allocation50_spill] sm:$0xff] %v7194_v58  ;;  %v7196_v12 = vpop.permute.xlu1 %5596  ;;  %v7202_v51 = vpop.eup %5848  ;;  %5864 = vrcp.f32 %v1159_v35  ;;  %v1796_v13 = vmul.f32 %v7185_v0, %v5438_v47 }
 0x131   : > { %9944 = vst [vmem:[#allocation51_spill] sm:$0xff] %v7196_v12  ;;  %3647 = vrot.lane.b32.xlu0 %v3500_v2, %s6462_s13  ;;  %v7200_v26 = vpop.f32.mrb[28].mxu0  ;;  %9945 = vst [vmem:[#allocation52_spill] sm:$0xff] %v7202_v51  ;;  %3645 = vrot.lane.b32.xlu1 %v3499_v22, %s6462_s13  ;;  %v1487_v2 = vsel %vm1359_vm4, %v7174_v24, %v1423_v20  ;;  %v7216_v36 = vpop.eup %5850  ;;  %v3497_v20 = vmul.f32 %v6969_v62, %v1486_v16  ;;  %5866 = vrcp.f32 %v1158_v50 }
 0x132   : > { %v7204_v6 = vpop.f32.mrb[29].mxu0  ;;  %9946 = vst [vmem:[#allocation53_spill] sm:$0xff] %v7216_v36  ;;  %9947 = vst [vmem:[#allocation54_spill] sm:$0xff] %v7221_v3  ;;  %v1797_v25 = vmul.f32 %v7202_v51, %v5439_v46  ;;  %v3498_v30 = vmul.f32 %v6969_v62, %v1487_v2  ;;  %v1795_v32 = vmul.f32 %v7216_v36, %v5434_v8  ;;  %vm1364_vm5 = vcmp.ge.f32.partialorder %v7221_v3, 0.0  ;;  %v5853_v18 = vpop.eup %5852 }
 0x133   : > { %v7211_v38 = vpop.f32.mrb[30].mxu0  ;;  %9950 = vst [vmem:[#allocation57_spill] sm:$0xff] %v7237_v4  ;;  %v1794_v16 = vmul.f32 %v7194_v58, %v5433_v23  ;;  %v1428_v5 = vmul.f32 0.01, %v7221_v3  ;;  %v1429_v2 = vmul.f32 0.01, %v7225_v34  ;;  %v5855_v36 = vpop.eup %5854 }
 0x134   : > { %v7227_v22 = vpop.f32.mrb[31].mxu0  ;;  %v7230_v12 = vpop.permute.xlu1 %5606  ;;  %v1857_v46 = vpack.c.bf16 %v1797_v25, %v1796_v13  ;;  %v4917_v8 = vmul.f32 -1.442695, %v7133_v56  ;;  %v4915_v58 = vmul.f32 -1.442695, %v7160_v17  ;;  %vm1362_vm7 = vcmp.ge.f32.partialorder %v7237_v4, 0.0 }
 0x135   : > { %9949 = vst [vmem:[#allocation56_spill] sm:$0xff] %v7230_v12  ;;  %3641 = vrot.lane.b32.xlu1 %v3497_v20, %s6462_s13  ;;  %3643 = vrot.lane.b32.xlu0 %v3498_v30, %s6462_s13  ;;  %v1856_v47 = vpack.c.bf16 %v1795_v32, %v1794_v16  ;;  %v1492_v23 = vsel %vm1364_vm5, %v7221_v3, %v1428_v5  ;;  %v1426_v30 = vmul.f32 0.01, %v7237_v4  ;;  %v5857_v13 = vpop.eup %5856  ;;  %v4918_v32 = vmul.f32 -1.442695, %v7136_v11 }
 0x136   : > { %v1493_v25 = vsel %vm1365_vm6, %v7225_v34, %v1429_v2  ;;  %v7267_v16 = vadd.f32 %v6933_v14, %v7116_v15  ;;  %v5859_v0 = vpop.eup %5858  ;;  %v3503_v2 = vmul.f32 %v6969_v62, %v1492_v23  ;;  %v1164_v11 = vadd.f32 1.0, %v5853_v18 }
 0x137   : > { %5868 = vpow2.f32 %v4917_v8  ;;  %v3504_v15 = vmul.f32 %v6969_v62, %v1493_v25  ;;  %v1490_v56 = vsel %vm1362_vm7, %v7237_v4, %v1426_v30  ;;  %v1165_v60 = vadd.f32 1.0, %v5857_v13 }
 0x138   : > { %v7248_v35 = vpop.permute.xlu1 %5616  ;;  %9952 = vst [vmem:[#allocation59_spill] sm:$0xff] %v7267_v16  ;;  %v7277_v17 = vpop.eup %5860  ;;  %5870 = vpow2.f32 %v4915_v58  ;;  %vm1363_vm8 = vcmp.ge.f32.partialorder %v7267_v16, 0.0  ;;  %v1427_v18 = vmul.f32 0.01, %v7267_v16  ;;  %v3501_v30 = vmul.f32 %v6969_v62, %v1490_v56 }
 0x139   : > { %9951 = vst [vmem:[#allocation58_spill] sm:$0xff] %v7248_v35  ;;  %v7250_v50 = vpop.f32.mrb[32].mxu0  ;;  %1928 = vrot.lane.b32.xlu1 %v1857_v46, %s6461_s8  ;;  %1926 = vrot.lane.b32.xlu0 %v1856_v47, %s6461_s8  ;;  %v5444_v46 = vunpack.i.h.bf16 %v6841_v27  ;;  %v4916_v35 = vmul.f32 -1.442695, %v7174_v24  ;;  %9954 = vst [vmem:[#allocation61_spill] sm:$0xff] %v7277_v17  ;;  %v7281_v47 = vpop.eup %5862  ;;  %5872 = vpow2.f32 %v4918_v32  ;;  %v5448_v27 = vunpack.i.l.bf16 %v6898_v29 }
 0x13a   : > { %v7254_v20 = vpop.f32.mrb[33].mxu0  ;;  %9955 = vst [vmem:[#allocation62_spill] sm:$0xff] %v7281_v47  ;;  %v7286_v23 = vpop.eup %5864  ;;  %v1801_v25 = vmul.f32 %v7277_v17, %v5449_v42  ;;  %v7302_v32 = vadd.f32 %v7154_v39, %v6933_v14  ;;  %v7315_v39 = vadd.f32 %v6933_v14, %v7162_v19 }
 0x13b   : > { %v7260_v51 = vpop.f32.mrb[34].mxu0  ;;  %9956 = vst [vmem:[#allocation63_spill] sm:$0xff] %v7286_v23  ;;  %v7291_v8 = vpop.eup %5866  ;;  %5874 = vpow2.f32 %v4916_v35  ;;  %v1800_v42 = vmul.f32 %v7281_v47, %v5448_v27  ;;  %v4919_v27 = vmul.f32 -1.442695, %v7237_v4  ;;  %v5454_v4 = vunpack.i.h.bf16 %v6850_v33 }
 0x13c   : > { %v7270_v5 = vpop.f32.mrb[35].mxu0  ;;  %v7275_v12 = vpop.permute.xlu1 %5626  ;;  %9957 = vst [vmem:[#allocation64_spill] sm:$0xff] %v7291_v8  ;;  %5876 = vrcp.f32 %v1164_v11  ;;  %9959 = vst [vmem:[#allocation66_spill] sm:$0xff] %v7302_v32  ;;  %v1799_v11 = vmul.f32 %v7286_v23, %v5444_v46  ;;  %vm1368_vm9 = vcmp.ge.f32.partialorder %v7302_v32, 0.0  ;;  %vm1366_vm11 = vcmp.ge.f32.partialorder %v7315_v39, 0.0 }
 0x13d   : > { %9953 = vst [vmem:[#allocation60_spill] sm:$0xff] %v7275_v12  ;;  %3653 = vrot.lane.b32.xlu1 %v3503_v2, %s6462_s13  ;;  %v1163_v12 = vadd.f32 1.0, %v5859_v0  ;;  %3655 = vrot.lane.b32.xlu0 %v3504_v15, %s6462_s13  ;;  %v1162_v0 = vadd.f32 1.0, %v5855_v36  ;;  %v1491_v2 = vsel %vm1363_vm8, %v7267_v16, %v1427_v18  ;;  %5878 = vrcp.f32 %v1165_v60  ;;  %9960 = vst [vmem:[#allocation67_spill] sm:$0xff] %v7315_v39 }
 0x13e   : > { %v3502_v29 = vmul.f32 %v6969_v62, %v1491_v2  ;;  %v7319_v36 = vadd.f32 %v7167_v41, %v6933_v14  ;;  %v1859_v35 = vpack.c.bf16 %v1801_v25, %v1800_v42  ;;  %v1798_v18 = vmul.f32 %v7291_v8, %v5443_v63 }
 0x13f   : > { %5880 = vrcp.f32 %v1163_v12  ;;  %v4921_v12 = vmul.f32 -1.442695, %v7221_v3  ;;  %v1432_v41 = vmul.f32 0.01, %v7302_v32  ;;  %v7338_v2 = vadd.f32 %v6933_v14, %v7176_v52 }
 0x140   : > { %v7298_v13 = vpop.permute.xlu1 %5636  ;;  %9961 = vst [vmem:[#allocation68_spill] sm:$0xff] %v7319_v36  ;;  %5882 = vrcp.f32 %v1162_v0  ;;  %v1858_v19 = vpack.c.bf16 %v1799_v11, %v1798_v18  ;;  %vm1369_vm10 = vcmp.ge.f32.partialorder %v7319_v36, 0.0  ;;  %v1433_v25 = vmul.f32 0.01, %v7319_v36 }
 0x141   : > { %v7295_v58 = vpop.f32.mrb[36].mxu0  ;;  %9958 = vst [vmem:[#allocation65_spill] sm:$0xff] %v7298_v13  ;;  %3649 = vrot.lane.b32.xlu1 %v3501_v30, %s6462_s13  ;;  %3651 = vrot.lane.b32.xlu0 %v3502_v29, %s6462_s13  ;;  %v5869_v46 = vpop.eup %5868  ;;  %v4922_v0 = vmul.f32 -1.442695, %v7225_v34  ;;  %9963 = vst [vmem:[#allocation70_spill] sm:$0xff] %v7338_v2  ;;  %v1496_v29 = vsel %vm1368_vm9, %v7302_v32, %v1432_v41  ;;  %5884 = vpow2.f32 %v4921_v12  ;;  %vm1367_vm12 = vcmp.ge.f32.partialorder %v7338_v2, 0.0 }
 0x142   : > { %v7305_v15 = vpop.f32.mrb[37].mxu0  ;;  %v5871_v63 = vpop.eup %5870  ;;  %v1430_v11 = vmul.f32 0.01, %v7315_v39  ;;  %v4920_v18 = vmul.f32 -1.442695, %v7267_v16  ;;  %v3507_v23 = vmul.f32 %v6969_v62, %v1496_v29  ;;  %v1497_v8 = vsel %vm1369_vm10, %v7319_v36, %v1433_v25 }
 0x143   : > { %v7309_v56 = vpop.f32.mrb[38].mxu0  ;;  %v1168_v52 = vadd.f32 1.0, %v5869_v46  ;;  %v5459_v29 = vunpack.i.h.bf16 %v6904_v10  ;;  %5886 = vpow2.f32 %v4919_v27  ;;  %v1166_v46 = vadd.f32 1.0, %v5871_v63 }
 0x144   : > { %v7321_v60 = vpop.f32.mrb[39].mxu0  ;;  %v7325_v30 = vpop.permute.xlu1 %5646  ;;  %v1494_v41 = vsel %vm1366_vm11, %v7315_v39, %v1430_v11  ;;  %5888 = vpow2.f32 %v4922_v0 }
 0x145   : > { %9962 = vst [vmem:[#allocation69_spill] sm:$0xff] %v7325_v30  ;;  %1932 = vrot.lane.b32.xlu1 %v1859_v35, %s6461_s8  ;;  %1930 = vrot.lane.b32.xlu0 %v1858_v19, %s6461_s8  ;;  %v5873_v35 = vpop.eup %5872  ;;  %v3508_v19 = vmul.f32 %v6969_v62, %v1497_v8  ;;  %v5458_v8 = vunpack.i.l.bf16 %v6904_v10  ;;  %5890 = vpow2.f32 %v4920_v18  ;;  %v3505_v27 = vmul.f32 %v6969_v62, %v1494_v41 }
 0x146   : > { %v5875_v47 = vpop.eup %5874  ;;  %5892 = vrcp.f32 %v1168_v52  ;;  %v7376_v10 = vadd.f32 %v7200_v26, %v6933_v14  ;;  %v5453_v41 = vunpack.i.l.bf16 %v6850_v33 }
 0x147   : > { %v7358_v16 = vpop.eup %5876  ;;  %v1167_v0 = vadd.f32 1.0, %v5875_v47  ;;  %5894 = vrcp.f32 %v1166_v46 }
 0x148   : > { %v7356_v13 = vpop.permute.xlu1 %5656  ;;  %9965 = vst [vmem:[#allocation72_spill] sm:$0xff] %v7358_v16  ;;  %v7364_v12 = vpop.eup %5878  ;;  %9968 = vst [vmem:[#allocation75_spill] sm:$0xff] %v7376_v10  ;;  %vm1372_vm13 = vcmp.ge.f32.partialorder %v7376_v10, 0.0 }
 0x149   : > { %v7342_v42 = vpop.f32.mrb[40].mxu0  ;;  %9964 = vst [vmem:[#allocation71_spill] sm:$0xff] %v7356_v13  ;;  %3661 = vrot.lane.b32.xlu1 %v3507_v23, %s6462_s13  ;;  %9966 = vst [vmem:[#allocation73_spill] sm:$0xff] %v7364_v12  ;;  %3663 = vrot.lane.b32.xlu0 %v3508_v19, %s6462_s13  ;;  %v7369_v11 = vpop.eup %5880  ;;  %v1169_v13 = vadd.f32 1.0, %v5873_v35  ;;  %v1431_v23 = vmul.f32 0.01, %v7338_v2  ;;  %v1804_v35 = vmul.f32 %v7358_v16, %v5458_v8 }
 0x14a   : > { %v7348_v17 = vpop.f32.mrb[41].mxu0  ;;  %9967 = vst [vmem:[#allocation74_spill] sm:$0xff] %v7369_v11  ;;  %v7378_v63 = vpop.eup %5882  ;;  %v1805_v18 = vmul.f32 %v7364_v12, %v5459_v29  ;;  %v1803_v34 = vmul.f32 %v7369_v11, %v5454_v4  ;;  %v7395_v8 = vadd.f32 %v7211_v38, %v6933_v14  ;;  %v1436_v4 = vmul.f32 0.01, %v7376_v10 }
 0x14b   : > { %v7351_v30 = vpop.f32.mrb[42].mxu0  ;;  %9969 = vst [vmem:[#allocation76_spill] sm:$0xff] %v7378_v63  ;;  %v1495_v19 = vsel %vm1367_vm12, %v7338_v2, %v1431_v23  ;;  %5896 = vrcp.f32 %v1169_v13  ;;  %v1802_v33 = vmul.f32 %v7378_v63, %v5453_v41  ;;  %v7405_v13 = vadd.f32 %v6933_v14, %v7204_v6  ;;  %v5885_v38 = vpop.eup %5884 }
 0x14c   : > { %v7362_v25 = vpop.f32.mrb[43].mxu0  ;;  %v3506_v52 = vmul.f32 %v6969_v62, %v1495_v19  ;;  %v7389_v3 = vpop.permute.xlu1 %5666  ;;  %v1861_v47 = vpack.c.bf16 %v1805_v18, %v1804_v35  ;;  %9971 = vst [vmem:[#allocation78_spill] sm:$0xff] %v7395_v8  ;;  %5898 = vrcp.f32 %v1167_v0  ;;  %v7412_v23 = vadd.f32 %v6933_v14, %v7227_v22 }
 0x14d   : > { %3657 = vrot.lane.b32.xlu1 %v3505_v27, %s6462_s13  ;;  %9970 = vst [vmem:[#allocation77_spill] sm:$0xff] %v7389_v3  ;;  %9972 = vst [vmem:[#allocation79_spill] sm:$0xff] %v7405_v13  ;;  %v1860_v19 = vpack.c.bf16 %v1803_v34, %v1802_v33  ;;  %v5887_v35 = vpop.eup %5886  ;;  %v4925_v18 = vmul.f32 -1.442695, %v7302_v32  ;;  %v1500_v41 = vsel %vm1372_vm13, %v7376_v10, %v1436_v4  ;;  %vm1373_vm14 = vcmp.ge.f32.partialorder %v7395_v8, 0.0 }
 0x14e   : > { %3659 = vrot.lane.b32.xlu0 %v3506_v52, %s6462_s13  ;;  %9973 = vst [vmem:[#allocation80_spill] sm:$0xff] %v7412_v23  ;;  %v5889_v0 = vpop.eup %5888  ;;  %v4923_v52 = vmul.f32 -1.442695, %v7315_v39  ;;  %v3511_v6 = vmul.f32 %v6969_v62, %v1500_v41  ;;  %v4926_v22 = vmul.f32 -1.442695, %v7319_v36  ;;  %vm1370_vm15 = vcmp.ge.f32.partialorder %v7405_v13, 0.0 }
 0x14f   : > { %v5891_v11 = vpop.eup %5890  ;;  %v1437_v34 = vmul.f32 0.01, %v7395_v8  ;;  %v5464_v4 = vunpack.i.h.bf16 %v6858_v37  ;;  %v4924_v63 = vmul.f32 -1.442695, %v7338_v2  ;;  %vm1371_vm0 = vcmp.ge.f32.partialorder %v7412_v23, 0.0 }
 0x150   : > { %v7425_v33 = vpop.eup %5892  ;;  %v1173_v12 = vadd.f32 1.0, %v5889_v0  ;;  %5900 = vpow2.f32 %v4925_v18  ;;  %v1171_v36 = vadd.f32 1.0, %v5891_v11  ;;  %v1172_v18 = vadd.f32 1.0, %v5885_v38 }
 0x151   : > { %v7387_v26 = vpop.f32.mrb[44].mxu0  ;;  %1936 = vrot.lane.b32.xlu1 %v1861_v47, %s6461_s8  ;;  %v7420_v47 = vpop.permute.xlu1 %5676  ;;  %9975 = vst [vmem:[#allocation82_spill] sm:$0xff] %v7425_v33  ;;  %v1501_v16 = vsel %vm1373_vm14, %v7395_v8, %v1437_v34  ;;  %5902 = vpow2.f32 %v4923_v52  ;;  %v5468_v52 = vunpack.i.l.bf16 %v6908_v43  ;;  %v1170_v7 = vadd.f32 1.0, %v5887_v35 }
 0x152   : > { %v7391_v27 = vpop.f32.mrb[45].mxu0  ;;  %1934 = vrot.lane.b32.xlu0 %v1860_v19, %s6461_s8  ;;  %9974 = vst [vmem:[#allocation81_spill] sm:$0xff] %v7420_v47  ;;  %v1434_v19 = vmul.f32 0.01, %v7405_v13  ;;  %v1435_v47 = vmul.f32 0.01, %v7412_v23  ;;  %v7438_v39 = vpop.eup %5894  ;;  %5904 = vpow2.f32 %v4926_v22  ;;  %v7468_v22 = vadd.f32 %v7260_v51, %v6933_v14 }
 0x153   : > { %v7399_v29 = vpop.f32.mrb[46].mxu0  ;;  %9976 = vst [vmem:[#allocation83_spill] sm:$0xff] %v7438_v39  ;;  %5906 = vpow2.f32 %v4924_v63  ;;  %v1808_v63 = vmul.f32 %v7425_v33, %v5468_v52  ;;  %v5479_v33 = vunpack.i.h.bf16 %v6914_v55 }
 0x154   : > { %v7408_v46 = vpop.f32.mrb[47].mxu0  ;;  %v1498_v2 = vsel %vm1370_vm15, %v7405_v13, %v1434_v19  ;;  %v1499_v24 = vsel %vm1371_vm0, %v7412_v23, %v1435_v47  ;;  %5908 = vrcp.f32 %v1173_v12  ;;  %v7464_v47 = vadd.f32 %v7250_v50, %v6933_v14  ;;  %9981 = vst [vmem:[#allocation88_spill] sm:$0xff] %v7468_v22 }
 0x155   : > { %3669 = vrot.lane.b32.xlu1 %v3511_v6, %s6462_s13  ;;  %v3512_v6 = vmul.f32 %v6969_v62, %v1501_v16  ;;  %v7446_v0 = vpop.eup %5896  ;;  %v3509_v34 = vmul.f32 %v6969_v62, %v1498_v2  ;;  %v5469_v16 = vunpack.i.h.bf16 %v6908_v43  ;;  %v7457_v19 = vpop.permute.xlu1 %5686  ;;  %v5463_v2 = vunpack.i.l.bf16 %v6858_v37 }
 0x156   : > { %9977 = vst [vmem:[#allocation84_spill] sm:$0xff] %v7446_v0  ;;  %9978 = vst [vmem:[#allocation85_spill] sm:$0xff] %v7457_v19  ;;  %v7459_v38 = vpop.eup %5898  ;;  %5910 = vrcp.f32 %v1171_v36  ;;  %v3510_v43 = vmul.f32 %v6969_v62, %v1499_v24  ;;  %v4929_v37 = vmul.f32 -1.442695, %v7376_v10  ;;  %vm1376_vm1 = vcmp.ge.f32.partialorder %v7464_v47, 0.0 }
 0x157   : > { %3671 = vrot.lane.b32.xlu0 %v3512_v6, %s6462_s13  ;;  %9979 = vst [vmem:[#allocation86_spill] sm:$0xff] %v7459_v38  ;;  %9980 = vst [vmem:[#allocation87_spill] sm:$0xff] %v7464_v47  ;;  %v1809_v35 = vmul.f32 %v7446_v0, %v5469_v16  ;;  %5912 = vrcp.f32 %v1172_v18  ;;  %v1806_v12 = vmul.f32 %v7438_v39, %v5463_v2  ;;  %v1440_v24 = vmul.f32 0.01, %v7464_v47 }
 0x158   : > { %5914 = vrcp.f32 %v1170_v7  ;;  %v1807_v51 = vmul.f32 %v7459_v38, %v5464_v4  ;;  %vm1377_vm2 = vcmp.ge.f32.partialorder %v7468_v22, 0.0  ;;  %v4930_v18 = vmul.f32 -1.442695, %v7395_v8 }
 0x159   : > { %v7432_v41 = vpop.f32.mrb[48].mxu0  ;;  %3665 = vrot.lane.b32.xlu1 %v3509_v34, %s6462_s13  ;;  %v1863_v50 = vpack.c.bf16 %v1809_v35, %v1808_v63  ;;  %v7488_v7 = vadd.f32 %v6933_v14, %v7254_v20  ;;  %v1441_v4 = vmul.f32 0.01, %v7468_v22  ;;  %v7494_v52 = vpop.permute.xlu1 %5696  ;;  %v1504_v63 = vsel %vm1376_vm1, %v7464_v47, %v1440_v24 }
 0x15a   : > { %v7436_v3 = vpop.f32.mrb[49].mxu0  ;;  %v1862_v34 = vpack.c.bf16 %v1807_v51, %v1806_v12  ;;  %9983 = vst [vmem:[#allocation90_spill] sm:$0xff] %v7494_v52  ;;  %v5901_v2 = vpop.eup %5900  ;;  %v4928_v38 = vmul.f32 -1.442695, %v7412_v23  ;;  %5916 = vpow2.f32 %v4929_v37  ;;  %v5474_v24 = vunpack.i.h.bf16 %v6861_v40 }
 0x15b   : > { %v7444_v32 = vpop.f32.mrb[50].mxu0  ;;  %3667 = vrot.lane.b32.xlu0 %v3510_v43, %s6462_s13  ;;  %9982 = vst [vmem:[#allocation89_spill] sm:$0xff] %v7488_v7  ;;  %v7498_v43 = vadd.f32 %v6933_v14, %v7270_v5  ;;  %v5903_v20 = vpop.eup %5902  ;;  %v1505_v12 = vsel %vm1377_vm2, %v7468_v22, %v1441_v4  ;;  %v4927_v14 = vmul.f32 -1.442695, %v7405_v13  ;;  %5918 = vpow2.f32 %v4930_v18 }
 0x15c   : > { %v7452_v11 = vpop.f32.mrb[51].mxu0  ;;  %v5905_v51 = vpop.eup %5904  ;;  %v3516_v39 = vmul.f32 %v6969_v62, %v1505_v12  ;;  %vm1374_vm3 = vcmp.ge.f32.partialorder %v7488_v7, 0.0  ;;  %v1176_v0 = vadd.f32 1.0, %v5901_v2  ;;  %v1438_v4 = vmul.f32 0.01, %v7488_v7 }
 0x15d   : > { %1940 = vrot.lane.b32.xlu1 %v1863_v50, %s6461_s8  ;;  %9984 = vst [vmem:[#allocation91_spill] sm:$0xff] %v7498_v43  ;;  %v3515_v50 = vmul.f32 %v6969_v62, %v1504_v63  ;;  %v5907_v5 = vpop.eup %5906  ;;  %v5473_v63 = vunpack.i.l.bf16 %v6861_v40  ;;  %vm1375_vm4 = vcmp.ge.f32.partialorder %v7498_v43, 0.0  ;;  %v1174_v18 = vadd.f32 1.0, %v5903_v20  ;;  %v7526_v52 = vpop.permute.xlu1 %5706 }
 0x15e   : > { %5920 = vpow2.f32 %v4928_v38  ;;  %9987 = vst [vmem:[#allocation94_spill] sm:$0xff] %v7526_v52  ;;  %v5478_v2 = vunpack.i.l.bf16 %v6914_v55  ;;  %v1177_v19 = vadd.f32 1.0, %v5905_v51  ;;  %v1502_v23 = vsel %vm1374_vm3, %v7488_v7, %v1438_v4  ;;  %v7548_v51 = vld [vmem:[%s9645_s2] ss:$0 sm:$0xff] }
 0x15f   : > { %1938 = vrot.lane.b32.xlu0 %v1862_v34, %s6461_s8  ;;  %v7514_v34 = vpop.eup %5908  ;;  %5922 = vpow2.f32 %v4927_v14  ;;  %v3513_v13 = vmul.f32 %v6969_v62, %v1502_v23  ;;  %v7552_v14 = vadd.f32 %v7548_v51, %v7295_v58 }
 0x160   : > { %9985 = vst [vmem:[#allocation92_spill] sm:$0xff] %v7514_v34  ;;  %v7519_v37 = vpop.eup %5910  ;;  %v1813_v8 = vmul.f32 %v7514_v34, %v5479_v33  ;;  %5924 = vrcp.f32 %v1176_v0  ;;  %v4933_v0 = vmul.f32 -1.442695, %v7464_v47 }
 0x161   : > { %v7478_v6 = vpop.f32.mrb[52].mxu0  ;;  %3677 = vrot.lane.b32.xlu1 %v3515_v50, %s6462_s13  ;;  %9986 = vst [vmem:[#allocation93_spill] sm:$0xff] %v7519_v37  ;;  %v1439_v50 = vmul.f32 0.01, %v7498_v43  ;;  %v7528_v40 = vpop.eup %5912  ;;  %9990 = vst [vmem:[#allocation97_spill] sm:$0xff] %v7552_v14  ;;  %5926 = vrcp.f32 %v1174_v18  ;;  %vm1380_vm5 = vcmp.ge.f32.partialorder %v7552_v14, 0.0 }
 0x162   : > { %v7483_v36 = vpop.f32.mrb[53].mxu0  ;;  %9988 = vst [vmem:[#allocation95_spill] sm:$0xff] %v7528_v40  ;;  %v7536_v38 = vpop.eup %5914  ;;  %v1812_v33 = vmul.f32 %v7528_v40, %v5478_v2  ;;  %5928 = vrcp.f32 %v1177_v19  ;;  %v7572_v19 = vadd.f32 %v7548_v51, %v7305_v15 }
 0x163   : > { %v7492_v16 = vpop.f32.mrb[54].mxu0  ;;  %3679 = vrot.lane.b32.xlu0 %v3516_v39, %s6462_s13  ;;  %9989 = vst [vmem:[#allocation96_spill] sm:$0xff] %v7536_v38  ;;  %v1175_v39 = vadd.f32 1.0, %v5907_v5  ;;  %v1503_v52 = vsel %vm1375_vm4, %v7498_v43, %v1439_v50  ;;  %v1811_v5 = vmul.f32 %v7519_v37, %v5474_v24  ;;  %v7563_v50 = vadd.f32 %v7548_v51, %v7309_v56  ;;  %v7568_v18 = vpop.permute.xlu1 %5716 }
 0x164   : > { %v7501_v35 = vpop.f32.mrb[55].mxu0  ;;  %v3514_v23 = vmul.f32 %v6969_v62, %v1503_v52  ;;  %v1810_v58 = vmul.f32 %v7536_v38, %v5473_v63  ;;  %v4934_v52 = vmul.f32 -1.442695, %v7468_v22  ;;  %v1865_v24 = vpack.c.bf16 %v1813_v8, %v1812_v33  ;;  %9992 = vst [vmem:[#allocation99_spill] sm:$0xff] %v7568_v18  ;;  %9993 = vst [vmem:[#allocation100_spill] sm:$0xff] %v7572_v19 }
 0x165   : > { %3673 = vrot.lane.b32.xlu1 %v3513_v13, %s6462_s13  ;;  %9991 = vst [vmem:[#allocation98_spill] sm:$0xff] %v7563_v50  ;;  %5930 = vrcp.f32 %v1175_v39  ;;  %v5917_v13 = vpop.eup %5916  ;;  %v1444_v56 = vmul.f32 0.01, %v7552_v14  ;;  %v7579_v63 = vadd.f32 %v7548_v51, %v7321_v60  ;;  %vm1381_vm6 = vcmp.ge.f32.partialorder %v7563_v50, 0.0 }
 0x166   : > { %v1864_v2 = vpack.c.bf16 %v1811_v5, %v1810_v58  ;;  %v5919_v37 = vpop.eup %5918  ;;  %5932 = vpow2.f32 %v4933_v0  ;;  %v4931_v33 = vmul.f32 -1.442695, %v7488_v7  ;;  %v1445_v58 = vmul.f32 0.01, %v7563_v50 }
 0x167   : > { %3675 = vrot.lane.b32.xlu0 %v3514_v23, %s6462_s13  ;;  %v4932_v23 = vmul.f32 -1.442695, %v7498_v43  ;;  %9994 = vst [vmem:[#allocation101_spill] sm:$0xff] %v7579_v63  ;;  %v1508_v15 = vsel %vm1380_vm5, %v7552_v14, %v1444_v56  ;;  %5934 = vpow2.f32 %v4934_v52  ;;  %v1180_v0 = vadd.f32 1.0, %v5917_v13 }
 0x168   : > { %v5921_v5 = vpop.eup %5920  ;;  %v3519_v60 = vmul.f32 %v6969_v62, %v1508_v15  ;;  %v1181_v34 = vadd.f32 1.0, %v5919_v37  ;;  %vm1378_vm7 = vcmp.ge.f32.partialorder %v7572_v19, 0.0  ;;  %v1509_v56 = vsel %vm1381_vm6, %v7563_v50, %v1445_v58  ;;  %v7601_v15 = vpop.permute.xlu1 %5726 }
 0x169   : > { %v7524_v12 = vpop.f32.mrb[56].mxu0  ;;  %1944 = vrot.lane.b32.xlu1 %v1865_v24, %s6461_s8  ;;  %v5923_v38 = vpop.eup %5922  ;;  %5936 = vpow2.f32 %v4932_v23  ;;  %v1442_v52 = vmul.f32 0.01, %v7572_v19  ;;  %vm1379_vm8 = vcmp.ge.f32.partialorder %v7579_v63, 0.0  ;;  %9995 = vst [vmem:[#allocation102_spill] sm:$0xff] %v7601_v15  ;;  %v1179_v18 = vadd.f32 1.0, %v5921_v5 }
 0x16a   : > { %v7534_v20 = vpop.f32.mrb[57].mxu0  ;;  %v7603_v40 = vpop.eup %5924  ;;  %v3520_v37 = vmul.f32 %v6969_v62, %v1509_v56  ;;  %v1443_v13 = vmul.f32 0.01, %v7579_v63  ;;  %v5484_v23 = vunpack.i.h.bf16 %v6865_v44  ;;  %5938 = vpow2.f32 %v4931_v33 }
 0x16b   : > { %v7543_v55 = vpop.f32.mrb[58].mxu0  ;;  %1942 = vrot.lane.b32.xlu0 %v1864_v2, %s6461_s8  ;;  %9996 = vst [vmem:[#allocation103_spill] sm:$0xff] %v7603_v40  ;;  %v7607_v43 = vpop.eup %5926  ;;  %v1506_v58 = vsel %vm1378_vm7, %v7572_v19, %v1442_v52  ;;  %v1178_v15 = vadd.f32 1.0, %v5923_v38  ;;  %5940 = vrcp.f32 %v1181_v34  ;;  %v5488_v33 = vunpack.i.l.bf16 %v6918_v57 }
 0x16c   : > { %v7556_v4 = vpop.f32.mrb[59].mxu0  ;;  %9997 = vst [vmem:[#allocation104_spill] sm:$0xff] %v7607_v43  ;;  %v7614_v7 = vpop.eup %5928  ;;  %v3517_v5 = vmul.f32 %v6969_v62, %v1506_v58  ;;  %v1507_v56 = vsel %vm1379_vm8, %v7579_v63, %v1443_v13  ;;  %5942 = vrcp.f32 %v1180_v0  ;;  %v4937_v52 = vmul.f32 -1.442695, %v7552_v14 }
 0x16d   : > { %3685 = vrot.lane.b32.xlu1 %v3519_v60, %s6462_s13  ;;  %v5483_v60 = vunpack.i.l.bf16 %v6865_v44  ;;  %9998 = vst [vmem:[#allocation105_spill] sm:$0xff] %v7614_v7  ;;  %v5489_v44 = vunpack.i.h.bf16 %v6918_v57  ;;  %5944 = vrcp.f32 %v1179_v18  ;;  %v7628_v34 = vadd.f32 %v7548_v51, %v7342_v42  ;;  %v7640_v58 = vpop.permute.xlu1 %5736 }
 0x16e   : > { %v7632_v38 = vadd.f32 %v7548_v51, %v7351_v30  ;;  %v4938_v57 = vmul.f32 -1.442695, %v7563_v50  ;;  %v1816_v0 = vmul.f32 %v7603_v40, %v5488_v33  ;;  %10002 = vst [vmem:[#allocation109_spill] sm:$0xff] %v7640_v58  ;;  %5946 = vrcp.f32 %v1178_v15 }
 0x16f   : > { %3687 = vrot.lane.b32.xlu0 %v3520_v37, %s6462_s13  ;;  %v7621_v22 = vpop.eup %5930  ;;  %10000 = vst [vmem:[#allocation107_spill] sm:$0xff] %v7628_v34  ;;  %v3518_v37 = vmul.f32 %v6969_v62, %v1507_v56  ;;  %v1817_v18 = vmul.f32 %v7614_v7, %v5489_v44  ;;  %v4936_v30 = vmul.f32 -1.442695, %v7579_v63  ;;  %5948 = vpow2.f32 %v4937_v52 }
 0x170   : > { %9999 = vst [vmem:[#allocation106_spill] sm:$0xff] %v7621_v22  ;;  %10001 = vst [vmem:[#allocation108_spill] sm:$0xff] %v7632_v38  ;;  %v5933_v42 = vpop.eup %5932  ;;  %v1814_v33 = vmul.f32 %v7607_v43, %v5483_v60  ;;  %v1815_v44 = vmul.f32 %v7621_v22, %v5484_v23  ;;  %v7653_v58 = vadd.f32 %v7548_v51, %v7362_v25  ;;  %vm1384_vm9 = vcmp.ge.f32.partialorder %v7628_v34, 0.0 }
 0x171   : > { %v7582_v8 = vpop.f32.mrb[60].mxu0  ;;  %3681 = vrot.lane.b32.xlu1 %v3517_v5, %s6462_s13  ;;  %v7646_v5 = vadd.f32 %v7548_v51, %v7348_v17  ;;  %v5935_v56 = vpop.eup %5934  ;;  %v1867_v13 = vpack.c.bf16 %v1817_v18, %v1816_v0  ;;  %v1448_v15 = vmul.f32 0.01, %v7628_v34  ;;  %vm1385_vm10 = vcmp.ge.f32.partialorder %v7632_v38, 0.0 }
 0x172   : > { %v7587_v39 = vpop.f32.mrb[61].mxu0  ;;  %10004 = vst [vmem:[#allocation111_spill] sm:$0xff] %v7653_v58  ;;  %5950 = vpow2.f32 %v4938_v57  ;;  %v1866_v52 = vpack.c.bf16 %v1815_v44, %v1814_v33  ;;  %v1449_v60 = vmul.f32 0.01, %v7632_v38  ;;  %v1184_v0 = vadd.f32 1.0, %v5933_v42 }
 0x173   : > { %v7592_v24 = vpop.f32.mrb[62].mxu0  ;;  %10003 = vst [vmem:[#allocation110_spill] sm:$0xff] %v7646_v5  ;;  %3683 = vrot.lane.b32.xlu0 %v3518_v37, %s6462_s13  ;;  %v5937_v17 = vpop.eup %5936  ;;  %v4935_v37 = vmul.f32 -1.442695, %v7572_v19  ;;  %v1185_v25 = vadd.f32 1.0, %v5935_v56  ;;  %v1512_v18 = vsel %vm1384_vm9, %v7628_v34, %v1448_v15  ;;  %vm1382_vm11 = vcmp.ge.f32.partialorder %v7646_v5, 0.0 }
 0x174   : > { %v7595_v2 = vpop.f32.mrb[63].mxu0  ;;  %v5939_v14 = vpop.eup %5938  ;;  %5952 = vpow2.f32 %v4936_v30  ;;  %v3523_v22 = vmul.f32 %v6969_v62, %v1512_v18  ;;  %v1446_v57 = vmul.f32 0.01, %v7646_v5  ;;  %v1183_v56 = vadd.f32 1.0, %v5937_v17 }
 0x175   : > { %1948 = vrot.lane.b32.xlu1 %v1867_v13, %s6461_s8  ;;  %v1513_v13 = vsel %vm1385_vm10, %v7632_v38, %v1449_v60  ;;  %v7673_v42 = vpop.eup %5940  ;;  %v7677_v44 = vadd.f32 %v7548_v51, %v7387_v26  ;;  %vm1383_vm12 = vcmp.ge.f32.partialorder %v7653_v58, 0.0  ;;  %v1447_v30 = vmul.f32 0.01, %v7653_v58 }
 0x176   : > { %10005 = vst [vmem:[#allocation112_spill] sm:$0xff] %v7673_v42  ;;  %v7681_v15 = vpop.eup %5942  ;;  %5954 = vpow2.f32 %v4935_v37  ;;  %v3524_v60 = vmul.f32 %v6969_v62, %v1513_v13  ;;  %v1510_v17 = vsel %vm1382_vm11, %v7646_v5, %v1446_v57  ;;  %v1182_v43 = vadd.f32 1.0, %v5939_v14 }
 0x177   : > { %1946 = vrot.lane.b32.xlu0 %v1866_v52, %s6461_s8  ;;  %10006 = vst [vmem:[#allocation113_spill] sm:$0xff] %v7677_v44  ;;  %10007 = vst [vmem:[#allocation114_spill] sm:$0xff] %v7681_v15  ;;  %v5499_v52 = vunpack.i.h.bf16 %v6924_v21  ;;  %v7691_v26 = vpop.eup %5944  ;;  %5956 = vrcp.f32 %v1185_v25  ;;  %v7695_v7 = vadd.f32 %v7548_v51, %v7399_v29  ;;  %v1511_v37 = vsel %vm1383_vm12, %v7653_v58, %v1447_v30 }
 0x178   : > { %10008 = vst [vmem:[#allocation115_spill] sm:$0xff] %v7691_v26  ;;  %5958 = vrcp.f32 %v1184_v0  ;;  %v3521_v13 = vmul.f32 %v6969_v62, %v1510_v17  ;;  %v7704_v63 = vpop.eup %5946  ;;  %v4942_v14 = vmul.f32 -1.442695, %v7632_v38  ;;  %v7709_v29 = vadd.f32 %v7548_v51, %v7391_v27 }
 0x179   : > { %3693 = vrot.lane.b32.xlu1 %v3523_v22, %s6462_s13  ;;  %10009 = vst [vmem:[#allocation116_spill] sm:$0xff] %v7695_v7  ;;  %v5498_v22 = vunpack.i.l.bf16 %v6924_v21  ;;  %v1821_v57 = vmul.f32 %v7673_v42, %v5499_v52  ;;  %10010 = vst [vmem:[#allocation117_spill] sm:$0xff] %v7704_v63  ;;  %5960 = vrcp.f32 %v1183_v56  ;;  %v1452_v21 = vmul.f32 0.01, %v7677_v44  ;;  %v5949_v0 = vpop.eup %5948 }
 0x17a   : > { %10011 = vst [vmem:[#allocation118_spill] sm:$0xff] %v7709_v29  ;;  %v3522_v25 = vmul.f32 %v6969_v62, %v1511_v37  ;;  %v10012_v52 = vunpack.i.h.bf16 %v6868_v45  ;;  %vm1388_vm13 = vcmp.ge.f32.partialorder %v7677_v44, 0.0  ;;  %5962 = vrcp.f32 %v1182_v43 }
 0x17b   : > { %3695 = vrot.lane.b32.xlu0 %v3524_v60, %s6462_s13  ;;  %v1820_v30 = vmul.f32 %v7681_v15, %v5498_v22  ;;  %v4941_v27 = vmul.f32 -1.442695, %v7628_v34  ;;  %v7724_v17 = vadd.f32 %v7548_v51, %v7408_v46  ;;  %v4940_v22 = vmul.f32 -1.442695, %v7653_v58 }
 0x17c   : > { %v1819_v60 = vmul.f32 %v7691_v26, %v10012_v52  ;;  %v5951_v37 = vpop.eup %5950  ;;  %v10014_v52 = vunpack.i.l.bf16 %v6868_v45  ;;  %vm1389_vm14 = vcmp.ge.f32.partialorder %v7695_v7, 0.0  ;;  %v1516_v15 = vsel %vm1388_vm13, %v7677_v44, %v1452_v21 }
 0x17d   : > { %3689 = vrot.lane.b32.xlu1 %v3521_v13, %s6462_s13  ;;  %10013 = vst [vmem:[#allocation119_spill] sm:$0xff] %v7724_v17  ;;  %v1453_v13 = vmul.f32 0.01, %v7695_v7  ;;  %v1869_v42 = vpack.c.bf16 %v1821_v57, %v1820_v30  ;;  %v1450_v46 = vmul.f32 0.01, %v7709_v29  ;;  %5964 = vpow2.f32 %v4942_v14 }
 0x17e   : > { %v1818_v26 = vmul.f32 %v7704_v63, %v10014_v52  ;;  %v5953_v38 = vpop.eup %5952  ;;  %v4939_v34 = vmul.f32 -1.442695, %v7646_v5  ;;  %vm1386_vm15 = vcmp.ge.f32.partialorder %v7709_v29, 0.0  ;;  %v1189_v57 = vadd.f32 1.0, %v5951_v37 }
 0x17f   : > { %v7661_v23 = vpop.permute.xlu0 %3615  ;;  %v7671_v33 = vpop.permute.xlu1 %3613  ;;  %3691 = vrot.lane.b32.xlu0 %v3522_v25, %s6462_s13  ;;  %5966 = vpow2.f32 %v4941_v27  ;;  %v1517_v30 = vsel %vm1389_vm14, %v7695_v7, %v1453_v13  ;;  %v1451_v52 = vmul.f32 0.01, %v7724_v17  ;;  %v1188_v63 = vadd.f32 1.0, %v5949_v0 }
 0x180   : > { %v1868_v25 = vpack.c.bf16 %v1819_v60, %v1818_v26  ;;  %v5955_v21 = vpop.eup %5954  ;;  %5968 = vpow2.f32 %v4940_v22  ;;  %v3527_v14 = vmul.f32 %v6969_v62, %v1516_v15  ;;  %vm1387_vm0 = vcmp.ge.f32.partialorder %v7724_v17, 0.0 }
 0x181   : > { %1952 = vrot.lane.b32.xlu1 %v1869_v42, %s6461_s8  ;;  %v7749_v26 = vpop.eup %5956  ;;  %v5504_v60 = vunpack.i.h.bf16 %v6870_v48  ;;  %v1187_v27 = vadd.f32 1.0, %v5953_v38  ;;  %v7754_v13 = vadd.f32 %v7548_v51, %v7432_v41  ;;  %v1514_v0 = vsel %vm1386_vm15, %v7709_v29, %v1450_v46 }
 0x182   : > { %10015 = vst [vmem:[#allocation120_spill] sm:$0xff] %v7749_v26  ;;  %v7759_v37 = vpop.eup %5958  ;;  %v5503_v15 = vunpack.i.l.bf16 %v6870_v48  ;;  %v5509_v22 = vunpack.i.h.bf16 %v6928_v9  ;;  %5970 = vpow2.f32 %v4939_v34  ;;  %v1186_v41 = vadd.f32 1.0, %v5955_v21 }
 0x183   : > { %v7689_v18 = vpop.permute.xlu0 %3611  ;;  %v7702_v40 = vpop.permute.xlu1 %3609  ;;  %1950 = vrot.lane.b32.xlu0 %v1868_v25, %s6461_s8  ;;  %10016 = vst [vmem:[#allocation121_spill] sm:$0xff] %v7754_v13  ;;  %10017 = vst [vmem:[#allocation122_spill] sm:$0xff] %v7759_v37  ;;  %v3528_v25 = vmul.f32 %v6969_v62, %v1517_v30  ;;  %5972 = vrcp.f32 %v1189_v57  ;;  %v7771_v46 = vadd.f32 %v7548_v51, %v7444_v32  ;;  %v5508_v34 = vunpack.i.l.bf16 %v6928_v9 }
 0x184   : > { %v7767_v58 = vpop.eup %5960  ;;  %v1515_v48 = vsel %vm1387_vm0, %v7724_v17, %v1451_v52  ;;  %5974 = vrcp.f32 %v1188_v63  ;;  %v3525_v30 = vmul.f32 %v6969_v62, %v1514_v0  ;;  %v4946_v32 = vmul.f32 -1.442695, %v7695_v7 }
 0x185   : > { %3701 = vrot.lane.b32.xlu1 %v3527_v14, %s6462_s13  ;;  %10018 = vst [vmem:[#allocation123_spill] sm:$0xff] %v7767_v58  ;;  %10019 = vst [vmem:[#allocation124_spill] sm:$0xff] %v7771_v46  ;;  %v1825_v14 = vmul.f32 %v7749_v26, %v5509_v22  ;;  %v7782_v57 = vpop.eup %5962  ;;  %5976 = vrcp.f32 %v1187_v27  ;;  %v7787_v21 = vadd.f32 %v7548_v51, %v7436_v3  ;;  %v1456_v9 = vmul.f32 0.01, %v7754_v13 }
 0x186   : > { %10020 = vst [vmem:[#allocation125_spill] sm:$0xff] %v7782_v57  ;;  %v3526_v63 = vmul.f32 %v6969_v62, %v1515_v48  ;;  %v1824_v52 = vmul.f32 %v7759_v37, %v5508_v34  ;;  %v1823_v0 = vmul.f32 %v7767_v58, %v5504_v60  ;;  %vm1392_vm1 = vcmp.ge.f32.partialorder %v7754_v13, 0.0 }
 0x187   : > { %v7719_v56 = vpop.permute.xlu0 %3623  ;;  %v7733_v43 = vpop.permute.xlu1 %3621  ;;  %3703 = vrot.lane.b32.xlu0 %v3528_v25, %s6462_s13  ;;  %10021 = vst [vmem:[#allocation126_spill] sm:$0xff] %v7787_v21  ;;  %5978 = vrcp.f32 %v1186_v41  ;;  %v4945_v27 = vmul.f32 -1.442695, %v7677_v44  ;;  %v7800_v3 = vadd.f32 %v7548_v51, %v7452_v11  ;;  %v1457_v25 = vmul.f32 0.01, %v7771_v46 }
 0x188   : > { %v4944_v48 = vmul.f32 -1.442695, %v7724_v17  ;;  %v1871_v34 = vpack.c.bf16 %v1825_v14, %v1824_v52  ;;  %v1822_v60 = vmul.f32 %v7782_v57, %v5503_v15  ;;  %vm1393_vm2 = vcmp.ge.f32.partialorder %v7771_v46, 0.0 }
 0x189   : > { %3697 = vrot.lane.b32.xlu1 %v3525_v30, %s6462_s13  ;;  %10022 = vst [vmem:[#allocation127_spill] sm:$0xff] %v7800_v3  ;;  %v5965_v30 = vpop.eup %5964  ;;  %v1520_v26 = vsel %vm1392_vm1, %v7754_v13, %v1456_v9  ;;  %v1454_v11 = vmul.f32 0.01, %v7787_v21  ;;  %v4943_v7 = vmul.f32 -1.442695, %v7709_v29  ;;  %5980 = vpow2.f32 %v4946_v32 }
 0x18a   : > { %v5967_v41 = vpop.eup %5966  ;;  %v1870_v17 = vpack.c.bf16 %v1823_v0, %v1822_v60  ;;  %vm1390_vm3 = vcmp.ge.f32.partialorder %v7787_v21, 0.0  ;;  %v1193_v15 = vadd.f32 1.0, %v5965_v30  ;;  %5982 = vpow2.f32 %v4945_v27 }
 0x18b   : > { %v7740_v45 = vpop.permute.xlu0 %3619  ;;  %v7747_v42 = vpop.permute.xlu1 %3617  ;;  %3699 = vrot.lane.b32.xlu0 %v3526_v63, %s6462_s13  ;;  %v1521_v63 = vsel %vm1393_vm2, %v7771_v46, %v1457_v25  ;;  %v1455_v52 = vmul.f32 0.01, %v7800_v3  ;;  %v1192_v57 = vadd.f32 1.0, %v5967_v41  ;;  %5984 = vpow2.f32 %v4944_v48 }
 0x18c   : > { %v5969_v37 = vpop.eup %5968  ;;  %v3531_v32 = vmul.f32 %v6969_v62, %v1520_v26  ;;  %vm1391_vm4 = vcmp.ge.f32.partialorder %v7800_v3, 0.0  ;;  %v5514_v30 = vunpack.i.h.bf16 %v6872_v49  ;;  %v7828_v25 = vadd.f32 %v7548_v51, %v7478_v6 }
 0x18d   : > { %1956 = vrot.lane.b32.xlu1 %v1871_v34, %s6461_s8  ;;  %v5971_v9 = vpop.eup %5970  ;;  %v1191_v27 = vadd.f32 1.0, %v5969_v37  ;;  %v1518_v48 = vsel %vm1390_vm3, %v7787_v21, %v1454_v11  ;;  %v5519_v26 = vunpack.i.h.bf16 %v6948_v28  ;;  %v5518_v60 = vunpack.i.l.bf16 %v6948_v28 }
 0x18e   : > { %v7823_v34 = vpop.eup %5972  ;;  %10024 = vst [vmem:[#allocation129_spill] sm:$0xff] %v7828_v25  ;;  %5986 = vpow2.f32 %v4943_v7  ;;  %v3532_v41 = vmul.f32 %v6969_v62, %v1521_v63  ;;  %v1190_v6 = vadd.f32 1.0, %v5971_v9  ;;  %v7845_v11 = vadd.f32 %v7548_v51, %v7492_v16 }
 0x18f   : > { %v7765_v38 = vpop.permute.xlu0 %3631  ;;  %v7780_v5 = vpop.permute.xlu1 %3629  ;;  %1954 = vrot.lane.b32.xlu0 %v1870_v17, %s6461_s8  ;;  %10023 = vst [vmem:[#allocation128_spill] sm:$0xff] %v7823_v34  ;;  %5988 = vrcp.f32 %v1193_v15  ;;  %v1519_v44 = vsel %vm1391_vm4, %v7800_v3, %v1455_v52  ;;  %v3529_v28 = vmul.f32 %v6969_v62, %v1518_v48  ;;  %v1829_v7 = vmul.f32 %v7823_v34, %v5519_v26 }
 0x190   : > { %v7833_v17 = vpop.eup %5974  ;;  %10027 = vst [vmem:[#allocation132_spill] sm:$0xff] %v7845_v11  ;;  %5990 = vrcp.f32 %v1192_v57  ;;  %vm1998_vm5 = vcmask 261120   ;;  %v5513_v15 = vunpack.i.l.bf16 %v6872_v49  ;;  %v7860_v16 = vadd.f32 %v7548_v51, %v7483_v36 }
 0x191   : > { %10025 = vst [vmem:[#allocation130_spill] sm:$0xff] %v7833_v17  ;;  %3709 = vrot.lane.b32.xlu1 %v3531_v32, %s6462_s13  ;;  %v7841_v29 = vpop.eup %5976  ;;  %5992 = vrcp.f32 %v1191_v27  ;;  %v1460_v57 = vmul.f32 0.01, %v7828_v25  ;;  %v3530_v52 = vmul.f32 %v6969_v62, %v1519_v44  ;;  %v1828_v32 = vmul.f32 %v7833_v17, %v5518_v60 }
 0x192   : > { %10026 = vst [vmem:[#allocation131_spill] sm:$0xff] %v7841_v29  ;;  %v7855_v9 = vpop.eup %5978  ;;  %10029 = vst [vmem:[#allocation134_spill] sm:$0xff] %v7860_v16  ;;  %v1827_v48 = vmul.f32 %v7841_v29, %v5514_v30  ;;  %vm1396_vm6 = vcmp.ge.f32.partialorder %v7828_v25, 0.0  ;;  %5994 = vrcp.f32 %v1190_v6  ;;  %v7870_v49 = vadd.f32 %v7548_v51, %v7501_v35 }
 0x193   : > { %v7795_v22 = vpop.permute.xlu0 %3627  ;;  %v7807_v58 = vpop.permute.xlu1 %3625  ;;  %3711 = vrot.lane.b32.xlu0 %v3532_v41, %s6462_s13  ;;  %10028 = vst [vmem:[#allocation133_spill] sm:$0xff] %v7855_v9  ;;  %v1461_v36 = vmul.f32 0.01, %v7845_v11  ;;  %v1873_v44 = vpack.c.bf16 %v1829_v7, %v1828_v32  ;;  %v1826_v60 = vmul.f32 %v7855_v9, %v5513_v15  ;;  %vm1397_vm7 = vcmp.ge.f32.partialorder %v7845_v11, 0.0 }
 0x194   : > { %10030 = vst [vmem:[#allocation135_spill] sm:$0xff] %v7870_v49  ;;  %v5981_v27 = vpop.eup %5980  ;;  %v1524_v6 = vsel %vm1396_vm6, %v7828_v25, %v1460_v57  ;;  %vm1394_vm8 = vcmp.ge.f32.partialorder %v7860_v16, 0.0  ;;  %v1459_v15 = vmul.f32 0.01, %v7870_v49  ;;  %vm1395_vm9 = vcmp.ge.f32.partialorder %v7870_v49, 0.0 }
 0x195   : > { %3705 = vrot.lane.b32.xlu1 %v3529_v28, %s6462_s13  ;;  %v5983_v41 = vpop.eup %5982  ;;  %v1458_v28 = vmul.f32 0.01, %v7860_v16  ;;  %v1525_v7 = vsel %vm1397_vm7, %v7845_v11, %v1461_v36  ;;  %v3535_v57 = vmul.f32 %v6969_v62, %v1524_v6  ;;  %v7895_v36 = vadd.f32 %v7548_v51, %v7524_v12 }
 0x196   : > { %v5985_v35 = vpop.eup %5984  ;;  %v1196_v9 = vadd.f32 1.0, %v5983_v41  ;;  %v5524_v41 = vunpack.i.h.bf16 %v6874_v53  ;;  %v3536_v6 = vmul.f32 %v6969_v62, %v1525_v7  ;;  %v7908_v12 = vadd.f32 %v7548_v51, %v7543_v55 }
 0x197   : > { %v7814_v14 = vpop.permute.xlu0 %3639  ;;  %v7821_v0 = vpop.permute.xlu1 %3637  ;;  %3707 = vrot.lane.b32.xlu0 %v3530_v52, %s6462_s13  ;;  %v1197_v52 = vadd.f32 1.0, %v5981_v27  ;;  %10032 = vst [vmem:[#allocation137_spill] sm:$0xff] %v7895_v36  ;;  %v1522_v27 = vsel %vm1394_vm8, %v7860_v16, %v1458_v28  ;;  %v1523_v28 = vsel %vm1395_vm9, %v7870_v49, %v1459_v15  ;;  %v7922_v55 = vadd.f32 %v7548_v51, %v7534_v20 }
 0x198   : > { %v5987_v29 = vpop.eup %5986  ;;  %10035 = vst [vmem:[#allocation140_spill] sm:$0xff] %v7908_v12  ;;  %v3533_v19 = vmul.f32 %v6969_v62, %v1522_v27  ;;  %vm1400_vm10 = vcmp.ge.f32.partialorder %v7895_v36, 0.0  ;;  %v1465_v20 = vmul.f32 0.01, %v7908_v12  ;;  %vm1401_vm11 = vcmp.ge.f32.partialorder %v7908_v12, 0.0 }
 0x199   : > { %1960 = vrot.lane.b32.xlu1 %v1873_v44, %s6461_s8  ;;  %v1195_v44 = vadd.f32 1.0, %v5985_v35  ;;  %v1194_v17 = vadd.f32 1.0, %v5987_v29  ;;  %5996 = vrcp.f32 %v1197_v52  ;;  %v5528_v35 = vunpack.i.l.bf16 %v6962_v31  ;;  %10037 = vst [vmem:[#allocation142_spill] sm:$0xff] %v7922_v55 }
 0x19a   : > { %5998 = vrcp.f32 %v1196_v9  ;;  %v5523_v29 = vunpack.i.l.bf16 %v6874_v53  ;;  %v3534_v9 = vmul.f32 %v6969_v62, %v1523_v28  ;;  %v7934_v53 = vadd.f32 %v7548_v51, %v7556_v4 }
 0x19b   : > { %v7839_v37 = vpop.permute.xlu0 %3635  ;;  %v7853_v63 = vpop.permute.xlu1 %3633  ;;  %6000 = vrcp.f32 %v1195_v44  ;;  %v1462_v28 = vmul.f32 0.01, %v7922_v55  ;;  %vm1398_vm12 = vcmp.ge.f32.partialorder %v7922_v55, 0.0  ;;  %v1529_v4 = vsel %vm1401_vm11, %v7908_v12, %v1465_v20 }
 0x19c   : > { %6002 = vrcp.f32 %v1194_v17  ;;  %10038 = vst [vmem:[#allocation143_spill] sm:$0xff] %v7934_v53  ;;  %vm1399_vm13 = vcmp.ge.f32.partialorder %v7934_v53, 0.0  ;;  %v5539_v20 = vunpack.i.h.bf16 %v6994_v61  ;;  %vm3801_vm14 = vcmask 130048  }
 0x19d   : > { %3717 = vrot.lane.b32.xlu1 %v3535_v57, %s6462_s13  ;;  %vm4698_vm3 = vcmask 257024  }
 0x19f   : > { %v1923_v26 = vpop.permute.xlu0 %1922  ;;  %v1925_v30 = vpop.permute.xlu1 %1924 }
 0x1a0   : > { %5344 = vmatprep.mubr.msk.bf16.mxu1 %vm1998_vm5, %v1923_v26  ;;  %v1872_v26 = vpack.c.bf16 %v1827_v48, %v1826_v60  ;;  %v7891_v48 = vpop.eup %5988 }
 0x1a1   : > { %5345 = vmatmul.mubr.msk.bf16.vlgmr.msra.gmra.mrb[0].mxu1 %vm1998_vm5, %v1925_v30  ;;  %10031 = vst [vmem:[#allocation136_spill] sm:$0xff] %v7891_v48  ;;  %v7898_v60 = vpop.eup %5990  ;;  %3713 = vrot.lane.b32.xlu1 %v3533_v19, %s6462_s13 }
 0x1a2   : > { %1958 = vrot.lane.b32.xlu0 %v1872_v26, %s6461_s8  ;;  %10033 = vst [vmem:[#allocation138_spill] sm:$0xff] %v7898_v60  ;;  %v5529_v26 = vunpack.i.h.bf16 %v6962_v31  ;;  %v7904_v34 = vpop.eup %5992  ;;  %v1464_v31 = vmul.f32 0.01, %v7895_v36  ;;  %v1832_v15 = vmul.f32 %v7898_v60, %v5528_v35  ;;  %v1463_v35 = vmul.f32 0.01, %v7934_v53 }
 0x1a3   : > { %v7884_v32 = vpop.permute.xlu0 %3647  ;;  %v7889_v30 = vpop.permute.xlu1 %3645  ;;  %10034 = vst [vmem:[#allocation139_spill] sm:$0xff] %v7904_v34  ;;  %v1831_v27 = vmul.f32 %v7904_v34, %v5524_v41  ;;  %v3802_v60 = vsel %vm3801_vm14, %v7702_v40, 0.0 }
 0x1a4   : > { %v1833_v57 = vmul.f32 %v7891_v48, %v5529_v26  ;;  %v7917_v50 = vpop.eup %5994 }
 0x1a5   : > { %10036 = vst [vmem:[#allocation141_spill] sm:$0xff] %v7917_v50  ;;  %v1830_v19 = vmul.f32 %v7917_v50, %v5523_v29 }
 0x1a6   : > { %3719 = vrot.lane.b32.xlu0 %v3536_v6, %s6462_s13  ;;  %v1875_v44 = vpack.c.bf16 %v1833_v57, %v1832_v15  ;;  %v1528_v6 = vsel %vm1400_vm10, %v7895_v36, %v1464_v31  ;;  %v7953_v31 = vpop.eup %5996 }
 0x1a7   : > { %v7915_v7 = vpop.permute.xlu1 %3641  ;;  %v7924_v52 = vpop.permute.xlu0 %3643  ;;  %v1874_v17 = vpack.c.bf16 %v1831_v27, %v1830_v19  ;;  %v3539_v57 = vmul.f32 %v6969_v62, %v1528_v6  ;;  %10039 = vst [vmem:[#allocation144_spill] sm:$0xff] %v7953_v31  ;;  %v5534_v6 = vunpack.i.h.bf16 %v6876_v54 }
 0x1a8   : > { %1964 = vrot.lane.b32.xlu1 %v1875_v44, %s6461_s8  ;;  %v7958_v27 = vpop.eup %5998  ;;  %v3540_v44 = vmul.f32 %v6969_v62, %v1529_v4  ;;  %v5533_v4 = vunpack.i.l.bf16 %v6876_v54 }
 0x1a9   : > { %10040 = vst [vmem:[#allocation145_spill] sm:$0xff] %v7958_v27  ;;  %v7963_v19 = vpop.eup %6000 }
 0x1aa   : > { %3715 = vrot.lane.b32.xlu0 %v3534_v9, %s6462_s13  ;;  %v1526_v9 = vsel %vm1398_vm12, %v7922_v55, %v1462_v28  ;;  %10041 = vst [vmem:[#allocation146_spill] sm:$0xff] %v7963_v19  ;;  %v7973_v50 = vpop.eup %6002 }
 0x1ab   : > { %v1929_v26 = vpop.permute.xlu1 %1928  ;;  %v1927_v41 = vpop.permute.xlu0 %1926  ;;  %v3537_v28 = vmul.f32 %v6969_v62, %v1526_v9  ;;  %10042 = vst [vmem:[#allocation147_spill] sm:$0xff] %v7973_v50 }
 0x1ac   : > { %5348 = vmatprep.mubr.msk.bf16.mxu1 %vm1998_vm5, %v1927_v41  ;;  %3725 = vrot.lane.b32.xlu1 %v3539_v57, %s6462_s13  ;;  %v5538_v41 = vunpack.i.l.bf16 %v6994_v61  ;;  %v1835_v61 = vmul.f32 %v7963_v19, %v5534_v6 }
 0x1ad   : > { %5349 = vmatmul.mubr.msk.bf16.gmra.mrb[4].mxu1 %vm1998_vm5, %v1929_v26  ;;  %v1527_v26 = vsel %vm1399_vm13, %v7934_v53, %v1463_v35 }
 0x1ae   : > { %1962 = vrot.lane.b32.xlu0 %v1874_v17, %s6461_s8  ;;  %v1837_v17 = vmul.f32 %v7953_v31, %v5539_v20  ;;  %v3538_v35 = vmul.f32 %v6969_v62, %v1527_v26  ;;  %v1836_v57 = vmul.f32 %v7958_v27, %v5538_v41  ;;  %v1834_v20 = vmul.f32 %v7973_v50, %v5533_v4 }
 0x1af   : > { %v7951_v29 = vpop.permute.xlu1 %3653  ;;  %v7956_v15 = vpop.permute.xlu0 %3655  ;;  %v3808_v50 = vsel %vm3801_vm14, %v7671_v33, 0.0  ;;  %v3811_v33 = vsel %vm3801_vm14, %v7661_v23, 0.0 }
 0x1b0   : > { %3721 = vrot.lane.b32.xlu1 %v3537_v28, %s6462_s13  ;;  %v1877_v9 = vpack.c.bf16 %v1837_v17, %v1836_v57  ;;  %v1876_v31 = vpack.c.bf16 %v1835_v61, %v1834_v20  ;;  %v4949_v20 = vmul.f32 -1.442695, %v7754_v13 }
 0x1b2   : > { %3727 = vrot.lane.b32.xlu0 %v3540_v44, %s6462_s13 }
 0x1b3   : > { %v7971_v34 = vpop.permute.xlu1 %3649  ;;  %v7980_v48 = vpop.permute.xlu0 %3651 }
 0x1b4   : > { %1968 = vrot.lane.b32.xlu1 %v1877_v9, %s6461_s8  ;;  %v4950_v9 = vmul.f32 -1.442695, %v7771_v46 }
 0x1b6   : > { %3723 = vrot.lane.b32.xlu0 %v3538_v35, %s6462_s13  ;;  %6004 = vpow2.f32 %v4950_v9  ;;  %v3805_v9 = vsel %vm3801_vm14, %v7689_v18, 0.0 }
 0x1b7   : > { %v1933_v44 = vpop.permute.xlu1 %1932  ;;  %v1931_v54 = vpop.permute.xlu0 %1930  ;;  %6006 = vpow2.f32 %v4949_v20 }
 0x1b8   : > { %5352 = vmatprep.mubr.msk.bf16.mxu1 %vm1998_vm5, %v1931_v54  ;;  %v4948_v54 = vmul.f32 -1.442695, %v7800_v3 }
 0x1b9   : > { %5353 = vmatmul.mubr.msk.bf16.gmra.mrb[8].mxu1 %vm1998_vm5, %v1933_v44 }
 0x1ba   : > { %1966 = vrot.lane.b32.xlu0 %v1876_v31, %s6461_s8  ;;  %6008 = vpow2.f32 %v4948_v54 }
 0x1bb   : > { %v7988_v26 = vpop.permute.xlu1 %3661  ;;  %v7990_v6 = vpop.permute.xlu0 %3663 }
 0x1bf   : > { %v7992_v41 = vpop.permute.xlu1 %3657 }
 0x1c0   : > { %v7994_v28 = vpop.permute.xlu0 %3659 }
 0x1c3   : > { %v1937_v17 = vpop.permute.xlu1 %1936 }
 0x1c4   : > { %v1935_v4 = vpop.permute.xlu0 %1934 }
 0x1c5   : > { %5356 = vmatprep.mubr.msk.bf16.mxu1 %vm1998_vm5, %v1935_v4  ;;  %v4947_v4 = vmul.f32 -1.442695, %v7787_v21 }
 0x1c6   : > { %5357 = vmatmul.mubr.msk.bf16.gmra.mrb[12].mxu1 %vm1998_vm5, %v1937_v17 }
 0x1c7   : > { %v7998_v35 = vpop.permute.xlu1 %3669  ;;  %6010 = vpow2.f32 %v4947_v4 }
 0x1c9   : > { %v8000_v57 = vpop.permute.xlu0 %3671 }
 0x1cb   : > { %v8002_v31 = vpop.permute.xlu1 %3665 }
 0x1cd   : > { %v8004_v61 = vpop.permute.xlu0 %3667 }
 0x1cf   : > { %v1941_v44 = vpop.permute.xlu1 %1940 }
 0x1d1   : > { %v1939_v19 = vpop.permute.xlu0 %1938 }
 0x1d2   : > { %5360 = vmatprep.mubr.msk.bf16.mxu1 %vm1998_vm5, %v1939_v19 }
 0x1d3   : > { %5361 = vmatmul.mubr.msk.bf16.gmra.mrb[16].mxu1 %vm1998_vm5, %v1941_v44  ;;  %v8012_v17 = vpop.permute.xlu1 %3677  ;;  %v6005_v44 = vpop.eup %6004 }
 0x1d4   : > { %v6007_v54 = vpop.eup %6006  ;;  %v1201_v21 = vadd.f32 1.0, %v6005_v44 }
 0x1d5   : > { %v8016_v27 = vpop.permute.xlu0 %3679  ;;  %v1200_v18 = vadd.f32 1.0, %v6007_v54 }
 0x1d6   : > { %6012 = vrcp.f32 %v1201_v21  ;;  %v8052_v21 = vadd.f32 %v7548_v51, %v7595_v2 }
 0x1d7   : > { %v8022_v19 = vpop.permute.xlu1 %3673  ;;  %6014 = vrcp.f32 %v1200_v18 }
 0x1d8   : > { %3803 = vadd.xlane.f32.xlu1 %v3802_v60  ;;  %10049 = vst [vmem:[#allocation154_spill] sm:$0xff] %v8052_v21  ;;  %vm1403_vm2 = vcmp.ge.f32.partialorder %v8052_v21, 0.0 }
 0x1d9   : > { %3809 = vadd.xlane.f32.xlu0 %v3808_v50  ;;  %v8024_v20 = vpop.permute.xlu0 %3675  ;;  %v6009_v50 = vpop.eup %6008 }
 0x1da   : > { %v6011_v40 = vpop.eup %6010  ;;  %v1199_v60 = vadd.f32 1.0, %v6009_v50 }
 0x1db   : > { %v1945_v4 = vpop.permute.xlu1 %1944  ;;  %v1198_v23 = vadd.f32 1.0, %v6011_v40 }
 0x1dc   : > { %3812 = vadd.xlane.f32.xlu1 %v3811_v33  ;;  %v8038_v33 = vadd.f32 %v7548_v51, %v7592_v24  ;;  %6016 = vrcp.f32 %v1199_v60  ;;  %v1467_v60 = vmul.f32 0.01, %v8052_v21 }
 0x1dd   : > { %3806 = vadd.xlane.f32.xlu0 %v3805_v9  ;;  %v1943_v3 = vpop.permute.xlu0 %1942  ;;  %v8032_v9 = vadd.f32 %v7548_v51, %v7582_v8  ;;  %6018 = vrcp.f32 %v1198_v23 }
 0x1de   : > { %5364 = vmatprep.mubr.msk.bf16.mxu1 %vm1998_vm5, %v1943_v3  ;;  %10045 = vst [vmem:[#allocation150_spill] sm:$0xff] %v8038_v33  ;;  %v8044_v3 = vadd.f32 %v7548_v51, %v7587_v39  ;;  %v1469_v24 = vmul.f32 0.01, %v8038_v33  ;;  %vm1405_vm0 = vcmp.ge.f32.partialorder %v8038_v33, 0.0 }
 0x1df   : > { %5365 = vmatmul.mubr.msk.bf16.gmra.mrb[20].mxu1 %vm1998_vm5, %v1945_v4  ;;  %10043 = vst [vmem:[#allocation148_spill] sm:$0xff] %v8032_v9  ;;  %v8034_v46 = vpop.permute.xlu1 %3685  ;;  %v1468_v54 = vmul.f32 0.01, %v8032_v9  ;;  %vm1404_vm15 = vcmp.ge.f32.partialorder %v8032_v9, 0.0 }
 0x1e0   : > { %10044 = vst [vmem:[#allocation149_spill] sm:$0xff] %v8034_v46  ;;  %10047 = vst [vmem:[#allocation152_spill] sm:$0xff] %v8044_v3  ;;  %v1466_v50 = vmul.f32 0.01, %v8044_v3  ;;  %vm1402_vm1 = vcmp.ge.f32.partialorder %v8044_v3, 0.0  ;;  %v1533_v18 = vsel %vm1405_vm0, %v8038_v33, %v1469_v24  ;;  %v8065_v2 = vpop.eup %6012 }
 0x1e1   : > { %v8040_v44 = vpop.permute.xlu0 %3687  ;;  %v1532_v39 = vsel %vm1404_vm15, %v8032_v9, %v1468_v54  ;;  %10051 = vst [vmem:[#allocation156_spill] sm:$0xff] %v8065_v2  ;;  %v8068_v47 = vpop.eup %6014  ;;  %v5549_v54 = vunpack.i.h.bf16 %v7029_v1  ;;  %v3544_v24 = vmul.f32 %v6969_v62, %v1533_v18 }
 0x1e2   : > { %10046 = vst [vmem:[#allocation151_spill] sm:$0xff] %v8040_v44  ;;  %v3543_v51 = vmul.f32 %v6969_v62, %v1532_v39  ;;  %v1530_v13 = vsel %vm1402_vm1, %v8044_v3, %v1466_v50  ;;  %10052 = vst [vmem:[#allocation157_spill] sm:$0xff] %v8068_v47  ;;  %v5544_v50 = vunpack.i.h.bf16 %v6878_v59 }
 0x1e3   : > { %v8047_v8 = vpop.permute.xlu1 %3681 }
 0x1e4   : > { %10048 = vst [vmem:[#allocation153_spill] sm:$0xff] %v8047_v8  ;;  %v5548_v8 = vunpack.i.l.bf16 %v7029_v1 }
 0x1e5   : > { %v8055_v4 = vpop.permute.xlu0 %3683 }
 0x1e6   : > { %10050 = vst [vmem:[#allocation155_spill] sm:$0xff] %v8055_v4  ;;  %v8074_v10 = vpop.eup %6016  ;;  %v1531_v4 = vsel %vm1403_vm2, %v8052_v21, %v1467_v60 }
 0x1e7   : > { %v1949_v40 = vpop.permute.xlu1 %1948  ;;  %10053 = vst [vmem:[#allocation158_spill] sm:$0xff] %v8074_v10  ;;  %v8085_v44 = vpop.eup %6018  ;;  %v3542_v60 = vmul.f32 %v6969_v62, %v1531_v4  ;;  %v1839_v1 = vmul.f32 %v8074_v10, %v5544_v50 }
 0x1e8   : > { %10055 = vst [vmem:[#allocation160_spill] sm:$0xff] %v8085_v44 }
 0x1e9   : > { %v1947_v23 = vpop.permute.xlu0 %1946 }
 0x1ea   : > { %5368 = vmatprep.mubr.msk.bf16.mxu1 %vm1998_vm5, %v1947_v23  ;;  %v3541_v23 = vmul.f32 %v6969_v62, %v1530_v13 }
 0x1eb   : > { %5369 = vmatmul.mubr.msk.bf16.gmra.mrb[24].mxu1 %vm1998_vm5, %v1949_v40  ;;  %v8077_v39 = vpop.permute.xlu1 %3693  ;;  %v5543_v40 = vunpack.i.l.bf16 %v6878_v59 }
 0x1ec   : > { %10054 = vst [vmem:[#allocation159_spill] sm:$0xff] %v8077_v39  ;;  %v1840_v39 = vmul.f32 %v8068_v47, %v5548_v8 }
 0x1ed   : > { %3733 = vrot.lane.b32.xlu1 %v3543_v51, %s6462_s13  ;;  %v1841_v51 = vmul.f32 %v8065_v2, %v5549_v54  ;;  %v8087_v18 = vpop.permute.xlu0 %3695  ;;  %v1838_v54 = vmul.f32 %v8085_v44, %v5543_v40  ;;  %v4954_v40 = vmul.f32 -1.442695, %v7845_v11 }
 0x1ef   : > { %v8094_v46 = vpop.permute.xlu1 %3689  ;;  %v1879_v13 = vpack.c.bf16 %v1841_v51, %v1840_v39  ;;  %v1878_v59 = vpack.c.bf16 %v1839_v1, %v1838_v54  ;;  %v4952_v1 = vmul.f32 -1.442695, %v7870_v49  ;;  %v4951_v54 = vmul.f32 -1.442695, %v7860_v16 }
 0x1f0   : > { %6020 = vpow2.f32 %v4954_v40  ;;  %v3820_v40 = vsel %vm3801_vm14, %v7733_v43, 0.0 }
 0x1f1   : > { %3729 = vrot.lane.b32.xlu1 %v3541_v23, %s6462_s13 }
 0x1f3   : > { %3735 = vrot.lane.b32.xlu0 %v3544_v24, %s6462_s13  ;;  %v8098_v24 = vpop.permute.xlu0 %3691  ;;  %v1953_v2 = vpop.permute.xlu1 %1952 }
 0x1f5   : > { %1972 = vrot.lane.b32.xlu1 %v1879_v13, %s6461_s8 }
 0x1f7   : > { %3731 = vrot.lane.b32.xlu0 %v3542_v60, %s6462_s13  ;;  %v1951_v62 = vpop.permute.xlu0 %1950  ;;  %v8104_v8 = vpop.permute.xlu1 %3701 }
 0x1f8   : > { %5372 = vmatprep.mubr.msk.bf16.mxu1 %vm1998_vm5, %v1951_v62 }
 0x1f9   : > { %5373 = vmatmul.mubr.msk.bf16.gmra.mrb[28].mxu1 %vm1998_vm5, %v1953_v2  ;;  %v4953_v2 = vmul.f32 -1.442695, %v7828_v25 }
 0x1fa   : > { %v6021_v44 = vpop.eup %6020 }
 0x1fb   : > { %1970 = vrot.lane.b32.xlu0 %v1878_v59, %s6461_s8  ;;  %v8106_v4 = vpop.permute.xlu0 %3703  ;;  %v8108_v39 = vpop.permute.xlu1 %3697  ;;  %6022 = vpow2.f32 %v4953_v2 }
 0x1fc   : > { %6024 = vpow2.f32 %v4952_v1 }
 0x1fd   : > { %6026 = vpow2.f32 %v4951_v54  ;;  %v1205_v54 = vadd.f32 1.0, %v6021_v44  ;;  %v3817_v44 = vsel %vm3801_vm14, %v7740_v45, 0.0  ;;  %v10066_v45 = vld [vmem:[#allocation35_spill] sm:$0xff] }
 0x1ff   : > { %v8110_v50 = vpop.permute.xlu0 %3699  ;;  %v1957_v23 = vpop.permute.xlu1 %1956  ;;  %6028 = vrcp.f32 %v1205_v54 }
 0x203   : > { %v1955_v51 = vpop.permute.xlu0 %1954  ;;  %v8115_v60 = vpop.permute.xlu1 %3709 }
 0x204   : > { %5376 = vmatprep.mubr.msk.bf16.mxu1 %vm1998_vm5, %v1955_v51 }
 0x205   : > { %5377 = vmatmul.mubr.msk.bf16.gmra.mrb[32].mxu1 %vm1998_vm5, %v1957_v23  ;;  %v6023_v49 = vpop.eup %6022 }
 0x206   : > { %v6025_v2 = vpop.eup %6024  ;;  %v1204_v11 = vadd.f32 1.0, %v6023_v49 }
 0x207   : > { %v8119_v13 = vpop.permute.xlu0 %3711  ;;  %v8122_v59 = vpop.permute.xlu1 %3705 }
 0x208   : > { %v6027_v16 = vpop.eup %6026  ;;  %6030 = vrcp.f32 %v1204_v11 }
 0x209   : > { %v1202_v43 = vadd.f32 1.0, %v6027_v16  ;;  %v8154_v11 = vpop.eup %6028 }
 0x20a   : > { %10064 = vst [vmem:[#allocation169_spill] sm:$0xff] %v8154_v11 }
 0x20b   : > { %v8124_v62 = vpop.permute.xlu0 %3707  ;;  %v1961_v51 = vpop.permute.xlu1 %1960 }
 0x20f   : > { %v8128_v10 = vpop.permute.xlu1 %3717 }
 0x210   : > { %10056 = vst [vmem:[#allocation161_spill] sm:$0xff] %v8128_v10 }
 0x212   : > { %v8156_v49 = vpop.eup %6030 }
 0x213   : > { %v8134_v1 = vpop.permute.xlu1 %3713  ;;  %10065 = vst [vmem:[#allocation170_spill] sm:$0xff] %v8156_v49 }
 0x214   : > { %v1959_v23 = vpop.permute.xlu0 %1958  ;;  %10058 = vst [vmem:[#allocation163_spill] sm:$0xff] %v8134_v1 }
 0x215   : > { %5380 = vmatprep.mubr.msk.bf16.mxu1 %vm1998_vm5, %v1959_v23  ;;  %v1203_v23 = vadd.f32 1.0, %v6025_v2  ;;  %v5559_v2 = vunpack.i.h.bf16 %v10066_v45 }
 0x216   : > { %5381 = vmatmul.mubr.msk.bf16.gmra.mrb[36].mxu1 %vm1998_vm5, %v1961_v51  ;;  %v3823_v51 = vsel %vm3801_vm14, %v7719_v56, 0.0 }
 0x217   : > { %6032 = vrcp.f32 %v1203_v23  ;;  %v10068_v23 = vld [vmem:[#allocation2_spill] sm:$0xff] }
 0x218   : > { %v8130_v47 = vpop.permute.xlu0 %3719  ;;  %6034 = vrcp.f32 %v1202_v43 }
 0x219   : > { %10057 = vst [vmem:[#allocation162_spill] sm:$0xff] %v8130_v47  ;;  %v3814_v47 = vsel %vm3801_vm14, %v7747_v42, 0.0  ;;  %3824 = vadd.xlane.f32.xlu1 %v3823_v51 }
 0x21a   : > { %3821 = vadd.xlane.f32.xlu0 %v3820_v40  ;;  %v1965_v10 = vpop.permute.xlu1 %1964 }
 0x21c   : > { %v8136_v25 = vpop.permute.xlu0 %3715 }
 0x21d   : > { %10059 = vst [vmem:[#allocation164_spill] sm:$0xff] %v8136_v25  ;;  %3818 = vadd.xlane.f32.xlu1 %v3817_v44  ;;  %v1845_v44 = vmul.f32 %v8154_v11, %v5559_v2  ;;  %v4958_v2 = vmul.f32 -1.442695, %v7908_v12 }
 0x21e   : > { %3815 = vadd.xlane.f32.xlu0 %v3814_v47  ;;  %v8146_v56 = vpop.permute.xlu1 %3725 }
 0x21f   : > { %10060 = vst [vmem:[#allocation165_spill] sm:$0xff] %v8146_v56  ;;  %6036 = vpow2.f32 %v4958_v2  ;;  %v3826_v2 = vsel %vm3801_vm14, %v7807_v58, 0.0  ;;  %v10074_v58 = vld [vmem:[#allocation3_spill] sm:$0xff] }
 0x220   : > { %v1963_v40 = vpop.permute.xlu0 %1962 }
 0x221   : > { %5384 = vmatprep.mubr.msk.bf16.mxu1 %vm1998_vm5, %v1963_v40  ;;  %v8159_v54 = vpop.eup %6032  ;;  %v5558_v40 = vunpack.i.l.bf16 %v10066_v45 }
 0x222   : > { %5385 = vmatmul.mubr.msk.bf16.gmra.mrb[40].mxu1 %vm1998_vm5, %v1965_v10  ;;  %v8150_v47 = vpop.permute.xlu1 %3721  ;;  %10067 = vst [vmem:[#allocation35_spill] sm:$0xff] %v8159_v54  ;;  %v5554_v10 = vunpack.i.h.bf16 %v10068_v23 }
 0x223   : > { %10062 = vst [vmem:[#allocation167_spill] sm:$0xff] %v8150_v47  ;;  %v1844_v47 = vmul.f32 %v8156_v49, %v5558_v40 }
 0x224   : > { %v8148_v42 = vpop.permute.xlu0 %3727  ;;  %v1843_v56 = vmul.f32 %v8159_v54, %v5554_v10 }
 0x225   : > { %10061 = vst [vmem:[#allocation166_spill] sm:$0xff] %v8148_v42  ;;  %v8164_v42 = vpop.eup %6034  ;;  %v1881_v25 = vpack.c.bf16 %v1845_v44, %v1844_v47  ;;  %v3835_v44 = vsel %vm3801_vm14, %v7765_v38, 0.0  ;;  %v10072_v38 = vld [vmem:[#allocation38_spill] sm:$0xff] }
 0x226   : > { %v1969_v51 = vpop.permute.xlu1 %1968  ;;  %10069 = vst [vmem:[#allocation2_spill] sm:$0xff] %v8164_v42 }
 0x228   : > { %v8152_v16 = vpop.permute.xlu0 %3723 }
 0x229   : > { %10063 = vst [vmem:[#allocation168_spill] sm:$0xff] %v8152_v16  ;;  %v5553_v16 = vunpack.i.l.bf16 %v10068_v23  ;;  %v4956_v23 = vmul.f32 -1.442695, %v7934_v53  ;;  %v6037_v47 = vpop.eup %6036 }
 0x22b   : > { %v1842_v1 = vmul.f32 %v8164_v42, %v5553_v16 }
 0x22c   : > { %v1967_v43 = vpop.permute.xlu0 %1966 }
 0x22d   : > { %5388 = vmatprep.mubr.msk.bf16.mxu1 %vm1998_vm5, %v1967_v43  ;;  %v1880_v45 = vpack.c.bf16 %v1843_v56, %v1842_v1  ;;  %v4957_v43 = vmul.f32 -1.442695, %v7895_v36  ;;  %v1209_v56 = vadd.f32 1.0, %v6037_v47  ;;  %v5569_v47 = vunpack.i.h.bf16 %v10072_v38 }
 0x22e   : > { %5389 = vmatmul.mubr.msk.bf16.gmra.mrb[44].mxu1 %vm1998_vm5, %v1969_v51  ;;  %1976 = vrot.lane.b32.xlu1 %v1881_v25, %s6461_s8  ;;  %v4955_v51 = vmul.f32 -1.442695, %v7922_v55  ;;  %v3832_v25 = vsel %vm3801_vm14, %v7780_v5, 0.0  ;;  %v3829_v5 = vsel %vm3801_vm14, %v7795_v22, 0.0 }
 0x22f   : > { %6038 = vpow2.f32 %v4957_v43 }
 0x230   : > { %6040 = vpow2.f32 %v4956_v23 }
 0x231   : > { %6042 = vpow2.f32 %v4955_v51 }
 0x232   : > { %6044 = vrcp.f32 %v1209_v56 }
 0x234   : > { %1974 = vrot.lane.b32.xlu0 %v1880_v45, %s6461_s8 }
 0x239   : > { %v6039_v10 = vpop.eup %6038 }
 0x23a   : > { %v6041_v1 = vpop.eup %6040  ;;  %v1208_v40 = vadd.f32 1.0, %v6039_v10 }
 0x23b   : > { %v6043_v16 = vpop.eup %6042  ;;  %v1207_v45 = vadd.f32 1.0, %v6041_v1  ;;  %v5568_v1 = vunpack.i.l.bf16 %v10072_v38 }
 0x23c   : > { %v1206_v43 = vadd.f32 1.0, %v6043_v16  ;;  %6046 = vrcp.f32 %v1208_v40  ;;  %v8186_v23 = vpop.eup %6044  ;;  %v5563_v40 = vunpack.i.l.bf16 %v10074_v58 }
 0x23d   : > { %6048 = vrcp.f32 %v1207_v45  ;;  %10070 = vst [vmem:[#allocation171_spill] sm:$0xff] %v8186_v23  ;;  %v1849_v56 = vmul.f32 %v8186_v23, %v5569_v47 }
 0x23e   : > { %6050 = vrcp.f32 %v1206_v43 }
 0x246   : > { %v8188_v51 = vpop.eup %6046 }
 0x247   : > { %10071 = vst [vmem:[#allocation172_spill] sm:$0xff] %v8188_v51  ;;  %v8191_v10 = vpop.eup %6048 }
 0x248   : > { %10073 = vst [vmem:[#allocation38_spill] sm:$0xff] %v8191_v10  ;;  %v8196_v16 = vpop.eup %6050 }
 0x249   : > { %10075 = vst [vmem:[#allocation3_spill] sm:$0xff] %v8196_v16 }
 0x252   : > { %3836 = vadd.xlane.f32.xlu1 %v3835_v44  ;;  %v1848_v44 = vmul.f32 %v8188_v51, %v5568_v1  ;;  %v4959_v51 = vmul.f32 -1.442695, %v8044_v3 }
 0x253   : > { %3833 = vadd.xlane.f32.xlu0 %v3832_v25  ;;  %v5564_v25 = vunpack.i.h.bf16 %v10074_v58 }
 0x254   : > { %v1883_v43 = vpack.c.bf16 %v1849_v56, %v1848_v44 }
 0x255   : > { %v1847_v45 = vmul.f32 %v8191_v10, %v5564_v25  ;;  %v4961_v10 = vmul.f32 -1.442695, %v8032_v9 }
 0x256   : > { %3830 = vadd.xlane.f32.xlu1 %v3829_v5  ;;  %v1846_v5 = vmul.f32 %v8196_v16, %v5563_v40  ;;  %v4960_v16 = vmul.f32 -1.442695, %v8052_v21 }
 0x257   : > { %3827 = vadd.xlane.f32.xlu0 %v3826_v2 }
 0x258   : > { %v1882_v38 = vpack.c.bf16 %v1847_v45, %v1846_v5 }
 0x265   : > { %v8203_v2 = vpop.xlane.xlu1 %3803 }
 0x266   : > { %v8198_v22 = vpop.xlane.xlu0 %3809  ;;  %10077 = vst [vmem:[#allocation174_spill] sm:$0xff] %v8203_v2 }
 0x267   : > { %10076 = vst [vmem:[#allocation173_spill] sm:$0xff] %v8198_v22  ;;  %1980 = vrot.lane.b32.xlu1 %v1883_v43, %s6461_s8 }
 0x269   : > { %v8210_v47 = vpop.xlane.xlu1 %3812 }
 0x26a   : > { %v8206_v54 = vpop.xlane.xlu0 %3806  ;;  %10079 = vst [vmem:[#allocation176_spill] sm:$0xff] %v8210_v47 }
 0x26b   : > { %10078 = vst [vmem:[#allocation175_spill] sm:$0xff] %v8206_v54 }
 0x26d   : > { %1978 = vrot.lane.b32.xlu0 %v1882_v38, %s6461_s8  ;;  %v8214_v58 = vpop.permute.xlu1 %3733  ;;  %v4962_v38 = vmul.f32 -1.442695, %v8038_v33 }
 0x26e   : > { %v8212_v23 = vpop.permute.xlu0 %3735  ;;  %10081 = vst [vmem:[#allocation178_spill] sm:$0xff] %v8214_v58  ;;  %v3844_v58 = vsel %vm3801_vm14, %v7821_v0, 0.0 }
 0x26f   : > { %10080 = vst [vmem:[#allocation177_spill] sm:$0xff] %v8212_v23  ;;  %6052 = vpow2.f32 %v4962_v38 }
 0x270   : > { %6054 = vpow2.f32 %v4961_v10 }
 0x271   : > { %v8224_v44 = vpop.permute.xlu1 %3729  ;;  %6056 = vpow2.f32 %v4960_v16  ;;  %v3847_v16 = vsel %vm3801_vm14, %v7814_v14, 0.0 }
 0x272   : > { %v8216_v1 = vpop.permute.xlu0 %3731  ;;  %6058 = vpow2.f32 %v4959_v51  ;;  %v3838_v51 = vsel %vm3801_vm14, %v7853_v63, 0.0 }
 0x274   : > { %v8218_v25 = vpop.f32.mrb[0].mxu1 }
 0x275   : > { %v8220_v56 = vpop.f32.mrb[1].mxu1  ;;  %v1973_v5 = vpop.permute.xlu1 %1972 }
 0x276   : > { %v8222_v40 = vpop.f32.mrb[2].mxu1  ;;  %v1971_v45 = vpop.permute.xlu0 %1970 }
 0x277   : > { %v8226_v43 = vpop.f32.mrb[3].mxu1  ;;  %5392 = vmatprep.mubr.msk.bf16.mxu1 %vm1998_vm5, %v1971_v45 }
 0x278   : > { %5393 = vmatmul.mubr.msk.bf16.gmra.mrb[48].mxu1 %vm1998_vm5, %v1973_v5 }
 0x279   : > { %v6053_v5 = vpop.eup %6052 }
 0x27a   : > { %v6055_v23 = vpop.eup %6054  ;;  %v1213_v3 = vadd.f32 1.0, %v6053_v5  ;;  %v10084_v5 = vld [vmem:[#allocation44_spill] sm:$0xff] }
 0x27b   : > { %v6057_v21 = vpop.eup %6056  ;;  %v1212_v10 = vadd.f32 1.0, %v6055_v23  ;;  %v3841_v23 = vsel %vm3801_vm14, %v7839_v37, 0.0  ;;  %v5578_v37 = vunpack.i.l.bf16 %v10084_v5 }
 0x27c   : > { %v6059_v33 = vpop.eup %6058  ;;  %v1211_v53 = vadd.f32 1.0, %v6057_v21  ;;  %6060 = vrcp.f32 %v1213_v3  ;;  %v10087_v3 = vld [vmem:[#allocation4_spill] sm:$0xff] }
 0x27d   : > { %6062 = vrcp.f32 %v1212_v10  ;;  %v5574_v10 = vunpack.i.h.bf16 %v10087_v3  ;;  %v5573_v36 = vunpack.i.l.bf16 %v10087_v3 }
 0x27e   : > { %6064 = vrcp.f32 %v1211_v53 }
 0x280   : > { %v8234_v42 = vpop.f32.mrb[4].mxu1 }
 0x281   : > { %v8236_v11 = vpop.f32.mrb[5].mxu1 }
 0x282   : > { %v8238_v49 = vpop.f32.mrb[6].mxu1 }
 0x283   : > { %v8240_v45 = vpop.f32.mrb[7].mxu1 }
 0x286   : > { %v8258_v14 = vpop.eup %6060 }
 0x287   : > { %10082 = vst [vmem:[#allocation179_spill] sm:$0xff] %v8258_v14  ;;  %v8262_v63 = vpop.eup %6062 }
 0x288   : > { %10083 = vst [vmem:[#allocation180_spill] sm:$0xff] %v8262_v63  ;;  %v8267_v12 = vpop.eup %6064  ;;  %v1852_v47 = vmul.f32 %v8262_v63, %v5578_v37  ;;  %v3856_v63 = vsel %vm3801_vm14, %v7889_v30, 0.0  ;;  %v3853_v30 = vsel %vm3801_vm14, %v7924_v52, 0.0  ;;  %v3865_v52 = vsel %vm3801_vm14, %v7980_v48, 0.0 }
 0x289   : > { %10086 = vst [vmem:[#allocation181_spill] sm:$0xff] %v8267_v12  ;;  %v1851_v54 = vmul.f32 %v8267_v12, %v5574_v10  ;;  %v3892_v48 = vsel %vm3801_vm14, %v7998_v35, 0.0 }
 0x28b   : > { %3848 = vadd.xlane.f32.xlu1 %v3847_v16  ;;  %v5579_v16 = vunpack.i.h.bf16 %v10084_v5 }
 0x28c   : > { %3845 = vadd.xlane.f32.xlu0 %v3844_v58  ;;  %v8244_v38 = vpop.f32.mrb[8].mxu1  ;;  %v1210_v58 = vadd.f32 1.0, %v6059_v33 }
 0x28d   : > { %v8248_v9 = vpop.f32.mrb[9].mxu1 }
 0x28e   : > { %v8252_v55 = vpop.f32.mrb[10].mxu1  ;;  %6066 = vrcp.f32 %v1210_v58  ;;  %v1853_v58 = vmul.f32 %v8258_v14, %v5579_v16 }
 0x28f   : > { %v8254_v0 = vpop.f32.mrb[11].mxu1  ;;  %3842 = vadd.xlane.f32.xlu1 %v3841_v23 }
 0x290   : > { %3839 = vadd.xlane.f32.xlu0 %v3838_v51  ;;  %v1885_v2 = vpack.c.bf16 %v1853_v58, %v1852_v47 }
 0x298   : > { %v8276_v23 = vpop.eup %6066 }
 0x299   : > { %v8260_v21 = vpop.f32.mrb[12].mxu1  ;;  %10089 = vst [vmem:[#allocation182_spill] sm:$0xff] %v8276_v23  ;;  %v1850_v22 = vmul.f32 %v8276_v23, %v5573_v36 }
 0x29a   : > { %v8265_v51 = vpop.f32.mrb[13].mxu1 }
 0x29b   : > { %10085 = vst [vmem:[#allocation44_spill] sm:$0xff] %v8265_v51  ;;  %v8269_v33 = vpop.f32.mrb[14].mxu1  ;;  %v1884_v51 = vpack.c.bf16 %v1851_v54, %v1850_v22 }
 0x29c   : > { %v8273_v53 = vpop.f32.mrb[15].mxu1 }
 0x29d   : > { %10088 = vst [vmem:[#allocation4_spill] sm:$0xff] %v8273_v53 }
 0x2a0   : > { %1984 = vrot.lane.b32.xlu1 %v1885_v2, %s6461_s8 }
 0x2a6   : > { %1982 = vrot.lane.b32.xlu0 %v1884_v51, %s6461_s8  ;;  %v8286_v53 = vpop.f32.mrb[16].mxu1  ;;  %v8288_v16 = vpop.xlane.xlu1 %3824 }
 0x2a7   : > { %v8284_v5 = vpop.xlane.xlu0 %3821  ;;  %10091 = vst [vmem:[#allocation184_spill] sm:$0xff] %v8288_v16  ;;  %v8290_v14 = vpop.f32.mrb[17].mxu1  ;;  %v3871_v16 = vsel %vm3801_vm14, %v7956_v15, 0.0  ;;  %v3874_v15 = vsel %vm3801_vm14, %v7992_v41, 0.0 }
 0x2a8   : > { %10090 = vst [vmem:[#allocation183_spill] sm:$0xff] %v8284_v5  ;;  %v8294_v37 = vpop.f32.mrb[18].mxu1 }
 0x2a9   : > { %v8296_v47 = vpop.f32.mrb[19].mxu1 }
 0x2aa   : > { %v8298_v36 = vpop.xlane.xlu1 %3818 }
 0x2ab   : > { %v8292_v3 = vpop.xlane.xlu0 %3815  ;;  %10093 = vst [vmem:[#allocation186_spill] sm:$0xff] %v8298_v36 }
 0x2ac   : > { %10092 = vst [vmem:[#allocation185_spill] sm:$0xff] %v8292_v3  ;;  %v3850_v3 = vsel %vm3801_vm14, %v7915_v7, 0.0 }
 0x2ae   : > { %v1977_v54 = vpop.permute.xlu1 %1976 }
 0x2af   : > { %v1975_v2 = vpop.permute.xlu0 %1974 }
 0x2b0   : > { %5396 = vmatprep.mubr.msk.bf16.mxu1 %vm1998_vm5, %v1975_v2 }
 0x2b1   : > { %5397 = vmatmul.mubr.msk.bf16.gmra.mrb[52].mxu1 %vm1998_vm5, %v1977_v54  ;;  %v3859_v54 = vsel %vm3801_vm14, %v7884_v32, 0.0  ;;  %v3862_v32 = vsel %vm3801_vm14, %v7971_v34, 0.0  ;;  %v3883_v34 = vsel %vm3801_vm14, %v7990_v6, 0.0  ;;  %v3895_v6 = vsel %vm3801_vm14, %v8000_v57, 0.0 }
 0x2b2   : > { %v8302_v22 = vpop.f32.mrb[20].mxu1 }
 0x2b3   : > { %v8304_v51 = vpop.f32.mrb[21].mxu1 }
 0x2b4   : > { %v8306_v10 = vpop.f32.mrb[22].mxu1 }
 0x2b5   : > { %v8308_v58 = vpop.f32.mrb[23].mxu1 }
 0x2be   : > { %v8312_v12 = vpop.f32.mrb[24].mxu1 }
 0x2bf   : > { %v8314_v23 = vpop.f32.mrb[25].mxu1 }
 0x2c0   : > { %v8316_v2 = vpop.f32.mrb[26].mxu1 }
 0x2c1   : > { %v8320_v36 = vpop.f32.mrb[27].mxu1 }
 0x2c4   : > { %3860 = vadd.xlane.f32.xlu1 %v3859_v54  ;;  %v3880_v54 = vsel %vm3801_vm14, %v7988_v26, 0.0 }
 0x2c5   : > { %3857 = vadd.xlane.f32.xlu0 %v3856_v63  ;;  %v3868_v63 = vsel %vm3801_vm14, %v7951_v29, 0.0 }
 0x2c8   : > { %3854 = vadd.xlane.f32.xlu1 %v3853_v30 }
 0x2c9   : > { %3851 = vadd.xlane.f32.xlu0 %v3850_v3 }
 0x2cc   : > { %3872 = vadd.xlane.f32.xlu1 %v3871_v16  ;;  %v8332_v5 = vpop.f32.mrb[28].mxu1  ;;  %v3877_v16 = vsel %vm3801_vm14, %v7994_v28, 0.0  ;;  %v3886_v28 = vsel %vm3801_vm14, %v8002_v31, 0.0 }
 0x2cd   : > { %3869 = vadd.xlane.f32.xlu0 %v3868_v63  ;;  %v8334_v7 = vpop.f32.mrb[29].mxu1 }
 0x2ce   : > { %v8336_v3 = vpop.f32.mrb[30].mxu1 }
 0x2cf   : > { %v8340_v29 = vpop.f32.mrb[31].mxu1 }
 0x2d0   : > { %3866 = vadd.xlane.f32.xlu1 %v3865_v52  ;;  %v3889_v52 = vsel %vm3801_vm14, %v8004_v61, 0.0 }
 0x2d1   : > { %3863 = vadd.xlane.f32.xlu0 %v3862_v32 }
 0x2d4   : > { %3884 = vadd.xlane.f32.xlu1 %v3883_v34  ;;  %v3904_v34 = vsel %vm3801_vm14, %v8012_v17, 0.0 }
 0x2d5   : > { %3881 = vadd.xlane.f32.xlu0 %v3880_v54 }
 0x2d8   : > { %3878 = vadd.xlane.f32.xlu1 %v3877_v16  ;;  %v8352_v30 = vpop.f32.mrb[32].mxu1  ;;  %v3898_v16 = vsel %vm3801_vm14, %v8022_v19, 0.0  ;;  %v10098_v19 = vld [vmem:[#allocation151_spill] sm:$0xff] }
 0x2d9   : > { %3875 = vadd.xlane.f32.xlu0 %v3874_v15  ;;  %v8354_v26 = vpop.f32.mrb[33].mxu1  ;;  %v3907_v15 = vsel %vm3801_vm14, %v8016_v27, 0.0  ;;  %v10097_v27 = vld [vmem:[#allocation149_spill] sm:$0xff] }
 0x2da   : > { %v8356_v63 = vpop.f32.mrb[34].mxu1 }
 0x2db   : > { %v8360_v41 = vpop.f32.mrb[35].mxu1 }
 0x2dc   : > { %3896 = vadd.xlane.f32.xlu1 %v3895_v6 }
 0x2dd   : > { %3893 = vadd.xlane.f32.xlu0 %v3892_v48 }
 0x2df   : > { %v8366_v35 = vpop.xlane.xlu1 %3836 }
 0x2e0   : > { %v8362_v32 = vpop.xlane.xlu0 %3833  ;;  %10094 = vst [vmem:[#allocation187_spill] sm:$0xff] %v8366_v35  ;;  %3890 = vadd.xlane.f32.xlu1 %v3889_v52 }
 0x2e1   : > { %3887 = vadd.xlane.f32.xlu0 %v3886_v28  ;;  %v3901_v28 = vsel %vm3801_vm14, %v8024_v20, 0.0 }
 0x2e3   : > { %v8374_v57 = vpop.xlane.xlu1 %3830 }
 0x2e4   : > { %v8370_v54 = vpop.xlane.xlu0 %3827  ;;  %10096 = vst [vmem:[#allocation189_spill] sm:$0xff] %v8374_v57  ;;  %3908 = vadd.xlane.f32.xlu1 %v3907_v15  ;;  %v3919_v15 = vsel %vm3801_vm14, %v10098_v19, 0.0  ;;  %v10100_v57 = vld [vmem:[#allocation155_spill] sm:$0xff] }
 0x2e5   : > { %10095 = vst [vmem:[#allocation188_spill] sm:$0xff] %v8370_v54  ;;  %3905 = vadd.xlane.f32.xlu0 %v3904_v34  ;;  %v3916_v34 = vsel %vm3801_vm14, %v10097_v27, 0.0  ;;  %v3913_v20 = vsel %vm3801_vm14, %v10100_v57, 0.0  ;;  %v10101_v54 = vld [vmem:[#allocation159_spill] sm:$0xff]  ;;  %v3943_v57 = vsel %vm3801_vm14, %v8106_v4, 0.0  ;;  %v3955_v4 = vsel %vm3801_vm14, %v8119_v13, 0.0 }
 0x2e6   : > { %v3928_v35 = vsel %vm3801_vm14, %v10101_v54, 0.0  ;;  %v3925_v54 = vsel %vm3801_vm14, %v8098_v24, 0.0  ;;  %v3937_v24 = vsel %vm3801_vm14, %v8110_v50, 0.0  ;;  %v10105_v13 = vld [vmem:[#allocation164_spill] sm:$0xff] }
 0x2e7   : > { %v1981_v6 = vpop.permute.xlu1 %1980 }
 0x2e8   : > { %v1979_v31 = vpop.permute.xlu0 %1978  ;;  %3902 = vadd.xlane.f32.xlu1 %v3901_v28 }
 0x2e9   : > { %3899 = vadd.xlane.f32.xlu0 %v3898_v16  ;;  %v8380_v48 = vpop.f32.mrb[36].mxu1  ;;  %5400 = vmatprep.mubr.msk.bf16.mxu1 %vm1998_vm5, %v1979_v31  ;;  %v10099_v31 = vld [vmem:[#allocation153_spill] sm:$0xff] }
 0x2ea   : > { %v8383_v61 = vpop.f32.mrb[37].mxu1  ;;  %5401 = vmatmul.mubr.msk.bf16.gmra.mrb[56].mxu1 %vm1998_vm5, %v1981_v6  ;;  %v3910_v16 = vsel %vm3801_vm14, %v10099_v31, 0.0 }
 0x2eb   : > { %v8385_v17 = vpop.f32.mrb[38].mxu1 }
 0x2ec   : > { %v8389_v52 = vpop.f32.mrb[39].mxu1  ;;  %3920 = vadd.xlane.f32.xlu1 %v3919_v15  ;;  %v3922_v15 = vsel %vm3801_vm14, %v8094_v46, 0.0 }
 0x2ed   : > { %3917 = vadd.xlane.f32.xlu0 %v3916_v34  ;;  %v3931_v34 = vsel %vm3801_vm14, %v8087_v18, 0.0  ;;  %v3934_v18 = vsel %vm3801_vm14, %v8108_v39, 0.0  ;;  %v3946_v39 = vsel %vm3801_vm14, %v8122_v59, 0.0  ;;  %v3961_v59 = vsel %vm3801_vm14, %v10105_v13, 0.0 }
 0x2f0   : > { %3914 = vadd.xlane.f32.xlu1 %v3913_v20  ;;  %v3952_v20 = vsel %vm3801_vm14, %v8115_v60, 0.0 }
 0x2f1   : > { %3911 = vadd.xlane.f32.xlu0 %v3910_v16 }
 0x2f4   : > { %3932 = vadd.xlane.f32.xlu1 %v3931_v34  ;;  %v3949_v34 = vsel %vm3801_vm14, %v8124_v62, 0.0  ;;  %v10107_v62 = vld [vmem:[#allocation166_spill] sm:$0xff] }
 0x2f5   : > { %3929 = vadd.xlane.f32.xlu0 %v3928_v35  ;;  %v8402_v28 = vpop.f32.mrb[40].mxu1  ;;  %v3940_v35 = vsel %vm3801_vm14, %v8104_v8, 0.0 }
 0x2f6   : > { %v8404_v6 = vpop.f32.mrb[41].mxu1 }
 0x2f7   : > { %v8406_v27 = vpop.f32.mrb[42].mxu1 }
 0x2f8   : > { %v8410_v19 = vpop.f32.mrb[43].mxu1  ;;  %3926 = vadd.xlane.f32.xlu1 %v3925_v54  ;;  %v10103_v54 = vld [vmem:[#allocation162_spill] sm:$0xff] }
 0x2f9   : > { %3923 = vadd.xlane.f32.xlu0 %v3922_v15  ;;  %v10102_v15 = vld [vmem:[#allocation161_spill] sm:$0xff]  ;;  %v3967_v60 = vsel %vm3801_vm14, %v10103_v54, 0.0  ;;  %v3982_v54 = vsel %vm3801_vm14, %v8224_v44, 0.0 }
 0x2fa   : > { %v3964_v50 = vsel %vm3801_vm14, %v10102_v15, 0.0  ;;  %v10109_v15 = vld [vmem:[#allocation168_spill] sm:$0xff] }
 0x2fc   : > { %3944 = vadd.xlane.f32.xlu1 %v3943_v57 }
 0x2fd   : > { %3941 = vadd.xlane.f32.xlu0 %v3940_v35  ;;  %v10104_v35 = vld [vmem:[#allocation163_spill] sm:$0xff] }
 0x2fe   : > { %v3958_v57 = vsel %vm3801_vm14, %v10104_v35, 0.0 }
 0x300   : > { %3938 = vadd.xlane.f32.xlu1 %v3937_v24 }
 0x301   : > { %3935 = vadd.xlane.f32.xlu0 %v3934_v18  ;;  %v8422_v31 = vpop.f32.mrb[44].mxu1  ;;  %v10106_v18 = vld [vmem:[#allocation165_spill] sm:$0xff] }
 0x302   : > { %v8424_v46 = vpop.f32.mrb[45].mxu1  ;;  %v3976_v24 = vsel %vm3801_vm14, %v10106_v18, 0.0 }
 0x303   : > { %v8426_v16 = vpop.f32.mrb[46].mxu1 }
 0x304   : > { %v8430_v8 = vpop.f32.mrb[47].mxu1  ;;  %3956 = vadd.xlane.f32.xlu1 %v3955_v4  ;;  %v10108_v4 = vld [vmem:[#allocation167_spill] sm:$0xff] }
 0x305   : > { %3953 = vadd.xlane.f32.xlu0 %v3952_v20  ;;  %v3979_v20 = vsel %vm3801_vm14, %v10107_v62, 0.0 }
 0x308   : > { %3950 = vadd.xlane.f32.xlu1 %v3949_v34 }
 0x309   : > { %3947 = vadd.xlane.f32.xlu0 %v3946_v39  ;;  %v3970_v39 = vsel %vm3801_vm14, %v10108_v4, 0.0 }
 0x30c   : > { %3968 = vadd.xlane.f32.xlu1 %v3967_v60 }
 0x30d   : > { %3965 = vadd.xlane.f32.xlu0 %v3964_v50  ;;  %v3973_v50 = vsel %vm3801_vm14, %v10109_v15, 0.0 }
 0x310   : > { %3962 = vadd.xlane.f32.xlu1 %v3961_v59 }
 0x311   : > { %3959 = vadd.xlane.f32.xlu0 %v3958_v57  ;;  %v3985_v57 = vsel %vm3801_vm14, %v8216_v1, 0.0 }
 0x314   : > { %3980 = vadd.xlane.f32.xlu1 %v3979_v20 }
 0x315   : > { %3977 = vadd.xlane.f32.xlu0 %v3976_v24 }
 0x318   : > { %v8460_v60 = vpop.xlane.xlu1 %3848  ;;  %3974 = vadd.xlane.f32.xlu1 %v3973_v50 }
 0x319   : > { %3971 = vadd.xlane.f32.xlu0 %v3970_v39  ;;  %v8454_v34 = vpop.xlane.xlu0 %3845 }
 0x31c   : > { %v8466_v13 = vpop.xlane.xlu1 %3842  ;;  %3986 = vadd.xlane.f32.xlu1 %v3985_v57 }
 0x31d   : > { %3983 = vadd.xlane.f32.xlu0 %v3982_v54  ;;  %v8462_v35 = vpop.xlane.xlu0 %3839 }
 0x320   : > { %v1985_v18 = vpop.permute.xlu1 %1984 }
 0x321   : > { %v1983_v59 = vpop.permute.xlu0 %1982 }
 0x322   : > { %5404 = vmatprep.mubr.msk.bf16.mxu1 %vm1998_vm5, %v1983_v59 }
 0x323   : > { %5405 = vmatmul.mubr.msk.bf16.gmra.mrb[60].mxu1 %vm1998_vm5, %v1985_v18 }
 0x32d   : > { %2454 = vrot.lane.b32.xlu1 %v8222_v40, %s6463_s26 }
 0x331   : > { %2450 = vrot.lane.b32.xlu1 %v8226_v43, %s6463_s26 }
 0x333   : > { %2452 = vrot.lane.b32.xlu0 %v8218_v25, %s6463_s26 }
 0x335   : > { %2462 = vrot.lane.b32.xlu1 %v8238_v49, %s6463_s26  ;;  %v10111_v49 = vld [vmem:[#allocation44_spill] sm:$0xff] }
 0x337   : > { %2448 = vrot.lane.b32.xlu0 %v8220_v56, %s6463_s26 }
 0x339   : > { %2458 = vrot.lane.b32.xlu1 %v8240_v45, %s6463_s26 }
 0x33b   : > { %2460 = vrot.lane.b32.xlu0 %v8234_v42, %s6463_s26  ;;  %v10110_v42 = vld [vmem:[#allocation4_spill] sm:$0xff] }
 0x33d   : > { %2470 = vrot.lane.b32.xlu1 %v8252_v55, %s6463_s26 }
 0x33f   : > { %2456 = vrot.lane.b32.xlu0 %v8236_v11, %s6463_s26 }
 0x341   : > { %2466 = vrot.lane.b32.xlu1 %v8254_v0, %s6463_s26 }
 0x343   : > { %2468 = vrot.lane.b32.xlu0 %v8244_v38, %s6463_s26 }
 0x345   : > { %2478 = vrot.lane.b32.xlu1 %v8269_v33, %s6463_s26 }
 0x347   : > { %2464 = vrot.lane.b32.xlu0 %v8248_v9, %s6463_s26 }
 0x349   : > { %2474 = vrot.lane.b32.xlu1 %v10110_v42, %s6463_s26 }
 0x34b   : > { %2476 = vrot.lane.b32.xlu0 %v8260_v21, %s6463_s26  ;;  %v8500_v11 = vpop.f32.mrb[48].mxu1 }
 0x34c   : > { %v8502_v55 = vpop.f32.mrb[49].mxu1 }
 0x34d   : > { %v8506_v1 = vpop.f32.mrb[50].mxu1  ;;  %2486 = vrot.lane.b32.xlu1 %v8294_v37, %s6463_s26 }
 0x34e   : > { %v8508_v25 = vpop.f32.mrb[51].mxu1 }
 0x34f   : > { %2472 = vrot.lane.b32.xlu0 %v10111_v49, %s6463_s26 }
 0x351   : > { %v8516_v56 = vpop.xlane.xlu1 %3860  ;;  %2482 = vrot.lane.b32.xlu1 %v8296_v47, %s6463_s26 }
 0x352   : > { %v8512_v9 = vpop.xlane.xlu0 %3857 }
 0x353   : > { %2484 = vrot.lane.b32.xlu0 %v8286_v53, %s6463_s26 }
 0x355   : > { %v8524_v44 = vpop.xlane.xlu1 %3854  ;;  %2494 = vrot.lane.b32.xlu1 %v8306_v10, %s6463_s26 }
 0x356   : > { %v8520_v40 = vpop.xlane.xlu0 %3851 }
 0x357   : > { %2480 = vrot.lane.b32.xlu0 %v8290_v14, %s6463_s26 }
 0x359   : > { %v8532_v45 = vpop.xlane.xlu1 %3872  ;;  %2490 = vrot.lane.b32.xlu1 %v8308_v58, %s6463_s26 }
 0x35a   : > { %v8528_v43 = vpop.xlane.xlu0 %3869 }
 0x35b   : > { %2492 = vrot.lane.b32.xlu0 %v8302_v22, %s6463_s26 }
 0x35d   : > { %v8540_v0 = vpop.xlane.xlu1 %3866  ;;  %2502 = vrot.lane.b32.xlu1 %v8316_v2, %s6463_s26 }
 0x35e   : > { %v8536_v38 = vpop.xlane.xlu0 %3863 }
 0x35f   : > { %2488 = vrot.lane.b32.xlu0 %v8304_v51, %s6463_s26 }
 0x361   : > { %v8548_v21 = vpop.xlane.xlu1 %3884  ;;  %2498 = vrot.lane.b32.xlu1 %v8320_v36, %s6463_s26 }
 0x362   : > { %v8544_v14 = vpop.xlane.xlu0 %3881 }
 0x363   : > { %2500 = vrot.lane.b32.xlu0 %v8312_v12, %s6463_s26 }
 0x365   : > { %v8556_v53 = vpop.xlane.xlu1 %3878  ;;  %2510 = vrot.lane.b32.xlu1 %v8336_v3, %s6463_s26 }
 0x366   : > { %v8552_v33 = vpop.xlane.xlu0 %3875 }
 0x367   : > { %2496 = vrot.lane.b32.xlu0 %v8314_v23, %s6463_s26 }
 0x369   : > { %v8564_v12 = vpop.xlane.xlu1 %3896  ;;  %2506 = vrot.lane.b32.xlu1 %v8340_v29, %s6463_s26 }
 0x36a   : > { %v8560_v37 = vpop.xlane.xlu0 %3893 }
 0x36b   : > { %2508 = vrot.lane.b32.xlu0 %v8332_v5, %s6463_s26 }
 0x36d   : > { %v8572_v23 = vpop.xlane.xlu1 %3890  ;;  %2518 = vrot.lane.b32.xlu1 %v8356_v63, %s6463_s26 }
 0x36e   : > { %v8568_v47 = vpop.xlane.xlu0 %3887 }
 0x36f   : > { %2504 = vrot.lane.b32.xlu0 %v8334_v7, %s6463_s26 }
 0x371   : > { %v8580_v5 = vpop.xlane.xlu1 %3908  ;;  %2514 = vrot.lane.b32.xlu1 %v8360_v41, %s6463_s26 }
 0x372   : > { %v8576_v36 = vpop.xlane.xlu0 %3905 }
 0x373   : > { %2516 = vrot.lane.b32.xlu0 %v8352_v30, %s6463_s26 }
 0x375   : > { %v8588_v51 = vpop.xlane.xlu1 %3902  ;;  %2526 = vrot.lane.b32.xlu1 %v8385_v17, %s6463_s26 }
 0x376   : > { %v8584_v22 = vpop.xlane.xlu0 %3899 }
 0x377   : > { %2512 = vrot.lane.b32.xlu0 %v8354_v26, %s6463_s26 }
 0x379   : > { %v8596_v58 = vpop.xlane.xlu1 %3920  ;;  %2522 = vrot.lane.b32.xlu1 %v8389_v52, %s6463_s26 }
 0x37a   : > { %v8592_v10 = vpop.xlane.xlu0 %3917  ;;  %10112 = vst [vmem:[#allocation149_spill] sm:$0xff] %v8596_v58 }
 0x37b   : > { %2524 = vrot.lane.b32.xlu0 %v8380_v48, %s6463_s26 }
 0x37d   : > { %v8604_v7 = vpop.xlane.xlu1 %3914  ;;  %2534 = vrot.lane.b32.xlu1 %v8406_v27, %s6463_s26 }
 0x37e   : > { %v8600_v2 = vpop.xlane.xlu0 %3911  ;;  %10113 = vst [vmem:[#allocation151_spill] sm:$0xff] %v8604_v7 }
 0x37f   : > { %2520 = vrot.lane.b32.xlu0 %v8383_v61, %s6463_s26 }
 0x381   : > { %v8612_v29 = vpop.xlane.xlu1 %3932  ;;  %2530 = vrot.lane.b32.xlu1 %v8410_v19, %s6463_s26 }
 0x382   : > { %v8608_v3 = vpop.xlane.xlu0 %3929  ;;  %10115 = vst [vmem:[#allocation155_spill] sm:$0xff] %v8612_v29 }
 0x383   : > { %10114 = vst [vmem:[#allocation153_spill] sm:$0xff] %v8608_v3  ;;  %2532 = vrot.lane.b32.xlu0 %v8402_v28, %s6463_s26 }
 0x384   : > { %v5398_v26 = vpop.f32.mrb[52].mxu1 }
 0x385   : > { %v2337_v63 = vpop.f32.mrb[53].mxu1  ;;  %v8620_v48 = vpop.xlane.xlu1 %3926  ;;  %2542 = vrot.lane.b32.xlu1 %v8426_v16, %s6463_s26 }
 0x386   : > { %v8616_v30 = vpop.xlane.xlu0 %3923  ;;  %v5399_v41 = vpop.f32.mrb[54].mxu1  ;;  %10117 = vst [vmem:[#allocation161_spill] sm:$0xff] %v8620_v48  ;;  %v10141_v48 = vld [vmem:[#allocation22_spill] sm:$0xff] }
 0x387   : > { %10116 = vst [vmem:[#allocation159_spill] sm:$0xff] %v8616_v30  ;;  %2528 = vrot.lane.b32.xlu0 %v8404_v6, %s6463_s26  ;;  %v2340_v61 = vpop.f32.mrb[55].mxu1  ;;  %v10142_v30 = vld [vmem:[#allocation19_spill] sm:$0xff] }
 0x389   : > { %v8628_v52 = vpop.xlane.xlu1 %3944  ;;  %2538 = vrot.lane.b32.xlu1 %v8430_v8, %s6463_s26 }
 0x38a   : > { %v8624_v17 = vpop.xlane.xlu0 %3941  ;;  %10119 = vst [vmem:[#allocation163_spill] sm:$0xff] %v8628_v52  ;;  %v10140_v52 = vld [vmem:[#allocation176_spill] sm:$0xff] }
 0x38b   : > { %10118 = vst [vmem:[#allocation162_spill] sm:$0xff] %v8624_v17  ;;  %2540 = vrot.lane.b32.xlu0 %v8422_v31, %s6463_s26 }
 0x38d   : > { %v8636_v6 = vpop.xlane.xlu1 %3938  ;;  %2550 = vrot.lane.b32.xlu1 %v8506_v1, %s6463_s26 }
 0x38e   : > { %v8632_v28 = vpop.xlane.xlu0 %3935  ;;  %10121 = vst [vmem:[#allocation165_spill] sm:$0xff] %v8636_v6  ;;  %v10139_v6 = vld [vmem:[#allocation23_spill] sm:$0xff] }
 0x38f   : > { %10120 = vst [vmem:[#allocation164_spill] sm:$0xff] %v8632_v28  ;;  %2536 = vrot.lane.b32.xlu0 %v8424_v46, %s6463_s26  ;;  %v5001_v28 = vmul.f32 -1.442695, %v10140_v52 }
 0x391   : > { %v8644_v19 = vpop.xlane.xlu1 %3956  ;;  %2546 = vrot.lane.b32.xlu1 %v8508_v25, %s6463_s26 }
 0x392   : > { %v8640_v27 = vpop.xlane.xlu0 %3953  ;;  %10123 = vst [vmem:[#allocation167_spill] sm:$0xff] %v8644_v19  ;;  %v10138_v19 = vld [vmem:[#allocation175_spill] sm:$0xff] }
 0x393   : > { %10122 = vst [vmem:[#allocation166_spill] sm:$0xff] %v8640_v27  ;;  %2548 = vrot.lane.b32.xlu0 %v8500_v11, %s6463_s26 }
 0x395   : > { %v8652_v46 = vpop.xlane.xlu1 %3950  ;;  %2558 = vrot.lane.b32.xlu1 %v5399_v41, %s6463_s26 }
 0x396   : > { %v8648_v31 = vpop.xlane.xlu0 %3947  ;;  %10125 = vst [vmem:[#allocation4_spill] sm:$0xff] %v8652_v46 }
 0x397   : > { %10124 = vst [vmem:[#allocation168_spill] sm:$0xff] %v8648_v31  ;;  %2544 = vrot.lane.b32.xlu0 %v8502_v55, %s6463_s26  ;;  %v4999_v31 = vmul.f32 -1.442695, %v10138_v19  ;;  %v10144_v19 = vld [vmem:[#allocation20_spill] sm:$0xff] }
 0x399   : > { %v8658_v8 = vpop.xlane.xlu1 %3968  ;;  %2554 = vrot.lane.b32.xlu1 %v2340_v61, %s6463_s26 }
 0x39a   : > { %v8655_v16 = vpop.xlane.xlu0 %3965  ;;  %10127 = vst [vmem:[#allocation190_spill] sm:$0xff] %v8658_v8 }
 0x39b   : > { %10126 = vst [vmem:[#allocation44_spill] sm:$0xff] %v8655_v16  ;;  %2556 = vrot.lane.b32.xlu0 %v5398_v26, %s6463_s26  ;;  %v10137_v16 = vld [vmem:[#allocation174_spill] sm:$0xff] }
 0x39c   : > { %v4998_v46 = vmul.f32 -1.442695, %v10137_v16 }
 0x39d   : > { %v8664_v62 = vpop.xlane.xlu1 %3962 }
 0x39e   : > { %v8661_v24 = vpop.xlane.xlu0 %3959  ;;  %10129 = vst [vmem:[#allocation192_spill] sm:$0xff] %v8664_v62 }
 0x39f   : > { %10128 = vst [vmem:[#allocation191_spill] sm:$0xff] %v8661_v24  ;;  %2552 = vrot.lane.b32.xlu0 %v2337_v63, %s6463_s26 }
 0x3a1   : > { %v8668_v4 = vpop.xlane.xlu1 %3980 }
 0x3a2   : > { %v8666_v20 = vpop.xlane.xlu0 %3977  ;;  %10131 = vst [vmem:[#allocation194_spill] sm:$0xff] %v8668_v4 }
 0x3a3   : > { %10130 = vst [vmem:[#allocation193_spill] sm:$0xff] %v8666_v20  ;;  %v10136_v20 = vld [vmem:[#allocation173_spill] sm:$0xff] }
 0x3a4   : > { %v5000_v62 = vmul.f32 -1.442695, %v10136_v20 }
 0x3a5   : > { %v8672_v15 = vpop.xlane.xlu1 %3974 }
 0x3a6   : > { %v8670_v39 = vpop.xlane.xlu0 %3971  ;;  %10133 = vst [vmem:[#allocation196_spill] sm:$0xff] %v8672_v15  ;;  %6068 = vpow2.f32 %v5000_v62  ;;  %v10143_v62 = vld [vmem:[#allocation183_spill] sm:$0xff] }
 0x3a7   : > { %10132 = vst [vmem:[#allocation195_spill] sm:$0xff] %v8670_v39  ;;  %6070 = vpow2.f32 %v4998_v46  ;;  %v5004_v16 = vmul.f32 -1.442695, %v10143_v62 }
 0x3a8   : > { %6072 = vpow2.f32 %v4999_v31  ;;  %v10146_v31 = vld [vmem:[#allocation26_spill] sm:$0xff] }
 0x3a9   : > { %v8676_v54 = vpop.xlane.xlu1 %3986 }
 0x3aa   : > { %v8674_v50 = vpop.xlane.xlu0 %3983  ;;  %10135 = vst [vmem:[#allocation198_spill] sm:$0xff] %v8676_v54 }
 0x3ab   : > { %10134 = vst [vmem:[#allocation197_spill] sm:$0xff] %v8674_v50 }
 0x3ad   : > { %v2455_v59 = vpop.permute.xlu1 %2454 }
 0x3ae   : > { %v2453_v57 = vpop.permute.xlu0 %2452  ;;  %v2643_v29 = vadd.f32 %v2455_v59, %v10141_v48 }
 0x3af   : > { %v2642_v27 = vadd.f32 %v2453_v57, %v10139_v6  ;;  %v10145_v57 = vld [vmem:[#allocation184_spill] sm:$0xff] }
 0x3b0   : > { %v5005_v52 = vmul.f32 -1.442695, %v10145_v57  ;;  %v6069_v48 = vpop.eup %6068 }
 0x3b1   : > { %v2451_v42 = vpop.permute.xlu1 %2450  ;;  %6074 = vtanh.f32 %v2642_v27  ;;  %v6071_v62 = vpop.eup %6070 }
 0x3b2   : > { %v2449_v18 = vpop.permute.xlu0 %2448  ;;  %6076 = vpow2.f32 %v5001_v28  ;;  %v2641_v3 = vadd.f32 %v2451_v42, %v10144_v19  ;;  %v10147_v28 = vld [vmem:[#allocation25_spill] sm:$0xff]  ;;  %v4188_v42 = vadd.f32 1.0, %v6069_v48  ;;  %v10148_v19 = vld [vmem:[#allocation28_spill] sm:$0xff] }
 0x3b3   : > { %v2640_v7 = vadd.f32 %v2449_v18, %v10142_v30  ;;  %6078 = vtanh.f32 %v2643_v29 }
 0x3b5   : > { %v2463_v26 = vpop.permute.xlu1 %2462  ;;  %6080 = vtanh.f32 %v2640_v7 }
 0x3b6   : > { %v2461_v25 = vpop.permute.xlu0 %2460  ;;  %6082 = vpow2.f32 %v5004_v16  ;;  %v2647_v18 = vadd.f32 %v2463_v26, %v10147_v28 }
 0x3b7   : > { %v2646_v27 = vadd.f32 %v2461_v25, %v10146_v31  ;;  %6084 = vtanh.f32 %v2641_v3  ;;  %v10149_v25 = vld [vmem:[#allocation185_spill] sm:$0xff]  ;;  %v10150_v3 = vld [vmem:[#allocation27_spill] sm:$0xff] }
 0x3b8   : > { %6086 = vpow2.f32 %v5005_v52  ;;  %v5002_v57 = vmul.f32 -1.442695, %v10149_v25  ;;  %v4186_v52 = vadd.f32 1.0, %v6071_v62  ;;  %v10153_v25 = vld [vmem:[#allocation32_spill] sm:$0xff] }
 0x3b9   : > { %v2459_v41 = vpop.permute.xlu1 %2458  ;;  %6088 = vtanh.f32 %v2646_v27 }
 0x3ba   : > { %v2457_v63 = vpop.permute.xlu0 %2456  ;;  %6090 = vtanh.f32 %v2647_v18 }
 0x3bb   : > { %v2644_v7 = vadd.f32 %v2457_v63, %v10148_v19  ;;  %6092 = vrcp.f32 %v4188_v42 }
 0x3bd   : > { %v5402_v11 = vpop.f32.mrb[56].mxu1  ;;  %v8684_v54 = vpop.permute.xlu1 %2470  ;;  %6094 = vtanh.f32 %v2644_v7 }
 0x3be   : > { %v2353_v55 = vpop.f32.mrb[57].mxu1  ;;  %2564 = vrot.lane.b32.xlu0 %v5402_v11, %s6463_s26  ;;  %v8682_v61 = vpop.permute.xlu0 %2468  ;;  %6096 = vpow2.f32 %v5002_v57  ;;  %v10154_v57 = vld [vmem:[#allocation186_spill] sm:$0xff] }
 0x3bf   : > { %v5403_v49 = vpop.f32.mrb[58].mxu1 }
 0x3c0   : > { %2566 = vrot.lane.b32.xlu1 %v5403_v49, %s6463_s26  ;;  %v2356_v1 = vpop.f32.mrb[59].mxu1 }
 0x3c1   : > { %v8688_v15 = vpop.permute.xlu1 %2466 }
 0x3c2   : > { %2560 = vrot.lane.b32.xlu0 %v2353_v55, %s6463_s26  ;;  %v8686_v50 = vpop.permute.xlu0 %2464 }
 0x3c4   : > { %2562 = vrot.lane.b32.xlu1 %v2356_v1, %s6463_s26 }
 0x3c5   : > { %v8692_v49 = vpop.permute.xlu1 %2478 }
 0x3c6   : > { %v8690_v11 = vpop.permute.xlu0 %2476 }
 0x3c9   : > { %v8696_v55 = vpop.permute.xlu1 %2474 }
 0x3ca   : > { %v8694_v4 = vpop.permute.xlu0 %2472 }
 0x3cd   : > { %v8700_v1 = vpop.permute.xlu1 %2486 }
 0x3ce   : > { %v8698_v39 = vpop.permute.xlu0 %2484 }
 0x3d1   : > { %v8705_v8 = vpop.permute.xlu1 %2482 }
 0x3d2   : > { %v8703_v24 = vpop.permute.xlu0 %2480 }
 0x3d5   : > { %v8714_v20 = vpop.permute.xlu1 %2494 }
 0x3d6   : > { %v8711_v17 = vpop.permute.xlu0 %2492 }
 0x3d9   : > { %v8724_v30 = vpop.permute.xlu1 %2490 }
 0x3da   : > { %v8720_v58 = vpop.permute.xlu0 %2488 }
 0x3dd   : > { %v8735_v48 = vpop.permute.xlu1 %2502 }
 0x3de   : > { %v8731_v16 = vpop.permute.xlu0 %2500 }
 0x3e2   : > { %v8743_v19 = vpop.permute.xlu0 %2496 }
 0x3f6   : > { %v5406_v6 = vpop.f32.mrb[60].mxu1 }
 0x3f7   : > { %v2369_v46 = vpop.f32.mrb[61].mxu1  ;;  %2572 = vrot.lane.b32.xlu0 %v5406_v6, %s6463_s26  ;;  %v6073_v6 = vpop.eup %6072 }
 0x3f8   : > { %v5407_v59 = vpop.f32.mrb[62].mxu1  ;;  %v6075_v31 = vpop.eup %6074  ;;  %v4187_v28 = vadd.f32 1.0, %v6073_v6 }
 0x3f9   : > { %2574 = vrot.lane.b32.xlu1 %v5407_v59, %s6463_s26  ;;  %v2372_v29 = vpop.f32.mrb[63].mxu1  ;;  %v2645_v59 = vadd.f32 %v2459_v41, %v10150_v3  ;;  %v6077_v26 = vpop.eup %6076  ;;  %v10152_v41 = vld [vmem:[#allocation29_spill] sm:$0xff] }
 0x3fa   : > { %v6079_v63 = vpop.eup %6078  ;;  %v2651_v18 = vadd.f32 %v8684_v54, %v10152_v41  ;;  %v4189_v62 = vadd.f32 1.0, %v6077_v26  ;;  %v8749_v3 = vpop.permute.xlu1 %2498 }
 0x3fb   : > { %2568 = vrot.lane.b32.xlu0 %v2369_v46, %s6463_s26  ;;  %v10151_v46 = vld [vmem:[#allocation30_spill] sm:$0xff]  ;;  %6098 = vtanh.f32 %v2645_v59  ;;  %v10155_v59 = vld [vmem:[#allocation31_spill] sm:$0xff] }
 0x3fc   : > { %v2650_v27 = vadd.f32 %v8682_v61, %v10151_v46  ;;  %6100 = vrcp.f32 %v4186_v52  ;;  %v2648_v61 = vadd.f32 %v8686_v50, %v10153_v25  ;;  %v2649_v26 = vadd.f32 %v8688_v15, %v10155_v59  ;;  %v10156_v50 = vld [vmem:[#allocation34_spill] sm:$0xff]  ;;  %v10157_v15 = vld [vmem:[#allocation33_spill] sm:$0xff] }
 0x3fd   : > { %2570 = vrot.lane.b32.xlu1 %v2372_v29, %s6463_s26  ;;  %v6081_v29 = vpop.eup %6080  ;;  %v2654_v46 = vadd.f32 %v8690_v11, %v10156_v50  ;;  %v10158_v25 = vld [vmem:[#allocation37_spill] sm:$0xff] }
 0x3fe   : > { %v6083_v42 = vpop.eup %6082  ;;  %6102 = vtanh.f32 %v2650_v27 }
 0x3ff   : > { %3156 = vrot.lane.b32.xlu0 %v6075_v31, %s6464_s28  ;;  %v6085_v7 = vpop.eup %6084  ;;  %6104 = vrcp.f32 %v4187_v28  ;;  %v5003_v31 = vmul.f32 -1.442695, %v10154_v57  ;;  %v4192_v52 = vadd.f32 1.0, %v6083_v42  ;;  %v10159_v57 = vld [vmem:[#allocation187_spill] sm:$0xff] }
 0x400   : > { %v6087_v6 = vpop.eup %6086  ;;  %6106 = vtanh.f32 %v2651_v18  ;;  %v2655_v18 = vadd.f32 %v8692_v49, %v10157_v15 }
 0x401   : > { %3158 = vrot.lane.b32.xlu1 %v6079_v63, %s6464_s28  ;;  %v6089_v54 = vpop.eup %6088  ;;  %6108 = vrcp.f32 %v4189_v62  ;;  %v4193_v28 = vadd.f32 1.0, %v6087_v6  ;;  %v5008_v62 = vmul.f32 -1.442695, %v8362_v32 }
 0x402   : > { %v6091_v63 = vpop.eup %6090  ;;  %6110 = vtanh.f32 %v2648_v61  ;;  %v2652_v61 = vadd.f32 %v8694_v4, %v10158_v25 }
 0x403   : > { %3152 = vrot.lane.b32.xlu0 %v6081_v29, %s6464_s28  ;;  %v8757_v27 = vpop.eup %6092  ;;  %6112 = vpow2.f32 %v5003_v31  ;;  %v8759_v29 = vpop.permute.xlu0 %2508  ;;  %v5009_v31 = vmul.f32 -1.442695, %v10159_v57 }
 0x404   : > { %v6095_v41 = vpop.eup %6094  ;;  %6114 = vtanh.f32 %v2649_v26 }
 0x405   : > { %3154 = vrot.lane.b32.xlu1 %v6085_v7, %s6464_s28  ;;  %v6097_v42 = vpop.eup %6096  ;;  %6116 = vrcp.f32 %v4192_v52  ;;  %v8765_v7 = vpop.permute.xlu1 %2510 }
 0x406   : > { %v6099_v11 = vpop.eup %6098  ;;  %6118 = vtanh.f32 %v2654_v46  ;;  %v4190_v26 = vadd.f32 1.0, %v6097_v42 }
 0x407   : > { %3164 = vrot.lane.b32.xlu0 %v6089_v54, %s6464_s28  ;;  %v8770_v6 = vpop.eup %6100  ;;  %6120 = vrcp.f32 %v4193_v28  ;;  %v10160_v54 = vld [vmem:[#allocation36_spill] sm:$0xff]  ;;  %v8778_v52 = vpop.permute.xlu0 %2504 }
 0x408   : > { %v6103_v49 = vpop.eup %6102  ;;  %6122 = vtanh.f32 %v2655_v18  ;;  %v2653_v32 = vadd.f32 %v8696_v55, %v10160_v54  ;;  %v10162_v28 = vld [vmem:[#allocation188_spill] sm:$0xff]  ;;  %v10163_v18 = vld [vmem:[#allocation43_spill] sm:$0xff] }
 0x409   : > { %3166 = vrot.lane.b32.xlu1 %v6091_v63, %s6464_s28  ;;  %v8776_v59 = vpop.eup %6104  ;;  %6124 = vpow2.f32 %v5008_v62  ;;  %v10161_v63 = vld [vmem:[#allocation42_spill] sm:$0xff]  ;;  %v8786_v15 = vpop.permute.xlu1 %2506  ;;  %v2659_v42 = vadd.f32 %v8700_v1, %v10163_v18  ;;  %v10168_v18 = vld [vmem:[#allocation55_spill] sm:$0xff] }
 0x40a   : > { %v6107_v4 = vpop.eup %6106  ;;  %6126 = vtanh.f32 %v2652_v61  ;;  %v2658_v50 = vadd.f32 %v8698_v39, %v10161_v63  ;;  %v10165_v61 = vld [vmem:[#allocation46_spill] sm:$0xff]  ;;  %v5013_v63 = vmul.f32 -1.442695, %v8460_v60 }
 0x40b   : > { %3160 = vrot.lane.b32.xlu0 %v6095_v41, %s6464_s28  ;;  %v8783_v46 = vpop.eup %6108  ;;  %v5006_v41 = vmul.f32 -1.442695, %v10162_v28  ;;  %6128 = vpow2.f32 %v5009_v31  ;;  %v2656_v57 = vadd.f32 %v8703_v24, %v10165_v61  ;;  %v8798_v54 = vpop.permute.xlu0 %2516 }
 0x40c   : > { %v6111_v55 = vpop.eup %6110  ;;  %6130 = vtanh.f32 %v2653_v32  ;;  %v10166_v32 = vld [vmem:[#allocation47_spill] sm:$0xff] }
 0x40d   : > { %3162 = vrot.lane.b32.xlu1 %v6099_v11, %s6464_s28  ;;  %v6113_v62 = vpop.eup %6112  ;;  %6132 = vrcp.f32 %v4190_v26  ;;  %v10164_v11 = vld [vmem:[#allocation189_spill] sm:$0xff]  ;;  %v2657_v26 = vadd.f32 %v8705_v8, %v10166_v32  ;;  %v8806_v24 = vpop.permute.xlu1 %2518 }
 0x40e   : > { %v5007_v25 = vmul.f32 -1.442695, %v10164_v11  ;;  %v6115_v39 = vpop.eup %6114  ;;  %6134 = vtanh.f32 %v2658_v50  ;;  %v5010_v11 = vmul.f32 -1.442695, %v8462_v35  ;;  %v10170_v35 = vld [vmem:[#allocation59_spill] sm:$0xff] }
 0x40f   : > { %3172 = vrot.lane.b32.xlu0 %v6103_v49, %s6464_s28  ;;  %v8795_v31 = vpop.eup %6116  ;;  %6136 = vpow2.f32 %v5006_v41  ;;  %v5012_v49 = vmul.f32 -1.442695, %v8454_v34  ;;  %v10167_v34 = vld [vmem:[#allocation54_spill] sm:$0xff] }
 0x410   : > { %v6119_v1 = vpop.eup %6118  ;;  %6138 = vtanh.f32 %v2659_v42  ;;  %v2662_v28 = vadd.f32 %v8711_v17, %v10167_v34  ;;  %v2663_v42 = vadd.f32 %v8714_v20, %v10168_v18  ;;  %v10169_v17 = vld [vmem:[#allocation57_spill] sm:$0xff] }
 0x411   : > { %3174 = vrot.lane.b32.xlu1 %v6107_v4, %s6464_s28  ;;  %v8803_v4 = vpop.eup %6120  ;;  %6140 = vpow2.f32 %v5007_v25  ;;  %v8815_v25 = vpop.permute.xlu0 %2512 }
 0x412   : > { %v6123_v50 = vpop.eup %6122  ;;  %6142 = vtanh.f32 %v2656_v57 }
 0x413   : > { %3168 = vrot.lane.b32.xlu0 %v6111_v55, %s6464_s28  ;;  %v6125_v41 = vpop.eup %6124  ;;  %v4191_v55 = vadd.f32 1.0, %v6113_v62  ;;  %6144 = vpow2.f32 %v5012_v49  ;;  %v2660_v62 = vadd.f32 %v8720_v58, %v10169_v17  ;;  %v8822_v49 = vpop.permute.xlu1 %2514  ;;  %v10171_v58 = vld [vmem:[#allocation66_spill] sm:$0xff] }
 0x414   : > { %v6127_v8 = vpop.eup %6126  ;;  %6146 = vtanh.f32 %v2657_v26  ;;  %v4196_v57 = vadd.f32 1.0, %v6125_v41 }
 0x415   : > { %3170 = vrot.lane.b32.xlu1 %v6115_v39, %s6464_s28  ;;  %v6129_v60 = vpop.eup %6128  ;;  %6148 = vpow2.f32 %v5013_v63  ;;  %v8831_v41 = vpop.permute.xlu0 %2524 }
 0x416   : > { %v6131_v39 = vpop.eup %6130  ;;  %6150 = vtanh.f32 %v2662_v28  ;;  %v4197_v26 = vadd.f32 1.0, %v6129_v60  ;;  %v5011_v28 = vmul.f32 -1.442695, %v8466_v13 }
 0x417   : > { %3180 = vrot.lane.b32.xlu0 %v6119_v1, %s6464_s28  ;;  %v8820_v61 = vpop.eup %6132  ;;  %6152 = vrcp.f32 %v4191_v55  ;;  %v2661_v1 = vadd.f32 %v8724_v30, %v10170_v35  ;;  %v10172_v30 = vld [vmem:[#allocation68_spill] sm:$0xff]  ;;  %v8836_v60 = vpop.permute.xlu1 %2526 }
 0x418   : > { %v6135_v20 = vpop.eup %6134  ;;  %6154 = vtanh.f32 %v2663_v42 }
 0x419   : > { %3182 = vrot.lane.b32.xlu1 %v6123_v50, %s6464_s28  ;;  %v6137_v32 = vpop.eup %6136  ;;  %6156 = vpow2.f32 %v5010_v11  ;;  %v2666_v50 = vadd.f32 %v8731_v16, %v10171_v58  ;;  %v10173_v11 = vld [vmem:[#allocation67_spill] sm:$0xff] }
 0x41a   : > { %v6139_v63 = vpop.eup %6138  ;;  %6158 = vtanh.f32 %v2660_v62  ;;  %v4194_v42 = vadd.f32 1.0, %v6137_v32  ;;  %v2664_v13 = vadd.f32 %v8743_v19, %v10173_v11  ;;  %v10175_v19 = vld [vmem:[#allocation75_spill] sm:$0xff] }
 0x41b   : > { %3176 = vrot.lane.b32.xlu0 %v6127_v8, %s6464_s28  ;;  %v6141_v34 = vpop.eup %6140  ;;  %6160 = vrcp.f32 %v4196_v57  ;;  %v2667_v8 = vadd.f32 %v8735_v48, %v10172_v30  ;;  %v10174_v48 = vld [vmem:[#allocation70_spill] sm:$0xff]  ;;  %v5016_v30 = vmul.f32 -1.442695, %v8512_v9 }
 0x41c   : > { %v6143_v55 = vpop.eup %6142  ;;  %6162 = vtanh.f32 %v2661_v1  ;;  %v4195_v17 = vadd.f32 1.0, %v6141_v34  ;;  %v2665_v57 = vadd.f32 %v8749_v3, %v10174_v48  ;;  %v8846_v1 = vpop.permute.xlu0 %2520  ;;  %v10176_v34 = vld [vmem:[#allocation78_spill] sm:$0xff]  ;;  %v10179_v48 = vld [vmem:[#allocation87_spill] sm:$0xff] }
 0x41d   : > { %3178 = vrot.lane.b32.xlu1 %v6131_v39, %s6464_s28  ;;  %v6145_v18 = vpop.eup %6144  ;;  %6164 = vrcp.f32 %v4197_v26  ;;  %v2670_v26 = vadd.f32 %v8759_v29, %v10175_v19  ;;  %v10180_v19 = vld [vmem:[#allocation88_spill] sm:$0xff] }
 0x41e   : > { %v6147_v16 = vpop.eup %6146  ;;  %6166 = vtanh.f32 %v2666_v50  ;;  %v4200_v35 = vadd.f32 1.0, %v6145_v18  ;;  %v8851_v50 = vpop.permute.xlu1 %2522 }
 0x41f   : > { %3188 = vrot.lane.b32.xlu0 %v6135_v20, %s6464_s28  ;;  %v6149_v39 = vpop.eup %6148  ;;  %6168 = vpow2.f32 %v5011_v28  ;;  %v2671_v28 = vadd.f32 %v8765_v7, %v10176_v34 }
 0x420   : > { %v6151_v62 = vpop.eup %6150  ;;  %6170 = vtanh.f32 %v2667_v8  ;;  %v4201_v58 = vadd.f32 1.0, %v6149_v39  ;;  %v10177_v8 = vld [vmem:[#allocation79_spill] sm:$0xff]  ;;  %v8864_v11 = vpop.permute.xlu0 %2532 }
 0x421   : > { %3190 = vrot.lane.b32.xlu1 %v6139_v63, %s6464_s28  ;;  %v8844_v20 = vpop.eup %6152  ;;  %6172 = vrcp.f32 %v4194_v42  ;;  %v2668_v18 = vadd.f32 %v8778_v52, %v10177_v8 }
 0x422   : > { %v6155_v32 = vpop.eup %6154  ;;  %6174 = vtanh.f32 %v2664_v13  ;;  %v10178_v13 = vld [vmem:[#allocation80_spill] sm:$0xff] }
 0x423   : > { %3184 = vrot.lane.b32.xlu0 %v6143_v55, %s6464_s28  ;;  %v6157_v63 = vpop.eup %6156  ;;  %6176 = vrcp.f32 %v4195_v17  ;;  %v2669_v9 = vadd.f32 %v8786_v15, %v10178_v13  ;;  %v5017_v17 = vmul.f32 -1.442695, %v8516_v56  ;;  %v2675_v56 = vadd.f32 %v8806_v24, %v10180_v19 }
 0x424   : > { %v6159_v3 = vpop.eup %6158  ;;  %6178 = vtanh.f32 %v2665_v57  ;;  %v2674_v57 = vadd.f32 %v8798_v54, %v10179_v48  ;;  %v5018_v48 = vmul.f32 -1.442695, %v8536_v38  ;;  %v5019_v38 = vmul.f32 -1.442695, %v8540_v0 }
 0x425   : > { %3186 = vrot.lane.b32.xlu1 %v6147_v16, %s6464_s28  ;;  %v8856_v55 = vpop.eup %6160  ;;  %6180 = vrcp.f32 %v4200_v35  ;;  %v4198_v16 = vadd.f32 1.0, %v6157_v63 }
 0x426   : > { %v6163_v29 = vpop.eup %6162  ;;  %6182 = vtanh.f32 %v2670_v26 }
 0x427   : > { %3196 = vrot.lane.b32.xlu0 %v6151_v62, %s6464_s28  ;;  %v8862_v42 = vpop.eup %6164  ;;  %6184 = vrcp.f32 %v4201_v58  ;;  %v8870_v62 = vpop.permute.xlu1 %2534 }
 0x428   : > { %v6167_v7 = vpop.eup %6166  ;;  %6186 = vtanh.f32 %v2671_v28  ;;  %v8883_v58 = vpop.permute.xlu0 %2528  ;;  %v5015_v28 = vmul.f32 -1.442695, %v8524_v44 }
 0x429   : > { %3198 = vrot.lane.b32.xlu1 %v6155_v32, %s6464_s28  ;;  %v6169_v39 = vpop.eup %6168  ;;  %6188 = vpow2.f32 %v5016_v30  ;;  %v5014_v32 = vmul.f32 -1.442695, %v8520_v40 }
 0x42a   : > { %v6171_v52 = vpop.eup %6170  ;;  %6190 = vtanh.f32 %v2668_v18  ;;  %v4199_v63 = vadd.f32 1.0, %v6169_v39 }
 0x42b   : > { %3192 = vrot.lane.b32.xlu0 %v6159_v3, %s6464_s28  ;;  %v8875_v35 = vpop.eup %6172  ;;  %6192 = vrcp.f32 %v4198_v16  ;;  %v10181_v3 = vld [vmem:[#allocation89_spill] sm:$0xff]  ;;  %v8891_v30 = vpop.permute.xlu1 %2530  ;;  %v5020_v16 = vmul.f32 -1.442695, %v8528_v43 }
 0x42c   : > { %v6175_v15 = vpop.eup %6174  ;;  %6194 = vtanh.f32 %v2669_v9  ;;  %v2672_v40 = vadd.f32 %v8815_v25, %v10181_v3  ;;  %v5021_v9 = vmul.f32 -1.442695, %v8532_v45  ;;  %v2541_v39 = vpop.permute.xlu0 %2540 }
 0x42d   : > { %3194 = vrot.lane.b32.xlu1 %v6163_v29, %s6464_s28  ;;  %v8881_v26 = vpop.eup %6176  ;;  %6196 = vpow2.f32 %v5017_v17  ;;  %v10182_v29 = vld [vmem:[#allocation91_spill] sm:$0xff]  ;;  %v10184_v17 = vld [vmem:[#allocation98_spill] sm:$0xff] }
 0x42e   : > { %v6179_v54 = vpop.eup %6178  ;;  %6198 = vtanh.f32 %v2674_v57  ;;  %v2673_v8 = vadd.f32 %v8822_v49, %v10182_v29 }
 0x42f   : > { %3204 = vrot.lane.b32.xlu0 %v6167_v7, %s6464_s28  ;;  %v8888_v34 = vpop.eup %6180  ;;  %6200 = vpow2.f32 %v5014_v32  ;;  %v10183_v7 = vld [vmem:[#allocation97_spill] sm:$0xff]  ;;  %v2543_v57 = vpop.permute.xlu1 %2542  ;;  %v10185_v32 = vld [vmem:[#allocation100_spill] sm:$0xff] }
 0x430   : > { %v6183_v24 = vpop.eup %6182  ;;  %6202 = vtanh.f32 %v2675_v56  ;;  %v2678_v44 = vadd.f32 %v8831_v41, %v10183_v7  ;;  %v2676_v45 = vadd.f32 %v8846_v1, %v10185_v32  ;;  %v2537_v3 = vpop.permute.xlu0 %2536  ;;  %v10187_v1 = vld [vmem:[#allocation107_spill] sm:$0xff]  ;;  %v5025_v32 = vmul.f32 -1.442695, %v8548_v21 }
 0x431   : > { %3206 = vrot.lane.b32.xlu1 %v6171_v52, %s6464_s28  ;;  %v8896_v18 = vpop.eup %6184  ;;  %6204 = vrcp.f32 %v4199_v63  ;;  %v2679_v52 = vadd.f32 %v8836_v60, %v10184_v17  ;;  %v10186_v60 = vld [vmem:[#allocation101_spill] sm:$0xff] }
 0x432   : > { %v6187_v25 = vpop.eup %6186  ;;  %6206 = vtanh.f32 %v2672_v40  ;;  %v2677_v63 = vadd.f32 %v8851_v50, %v10186_v60 }
 0x433   : > { %3200 = vrot.lane.b32.xlu0 %v6175_v15, %s6464_s28  ;;  %v6189_v13 = vpop.eup %6188  ;;  %6208 = vpow2.f32 %v5015_v28  ;;  %v2682_v28 = vadd.f32 %v8864_v11, %v10187_v1  ;;  %v10189_v11 = vld [vmem:[#allocation110_spill] sm:$0xff] }
 0x434   : > { %v6191_v49 = vpop.eup %6190  ;;  %6210 = vtanh.f32 %v2673_v8  ;;  %v4204_v19 = vadd.f32 1.0, %v6189_v13  ;;  %v2539_v8 = vpop.permute.xlu1 %2538  ;;  %v2680_v13 = vadd.f32 %v8883_v58, %v10189_v11  ;;  %v10193_v1 = vld [vmem:[#allocation118_spill] sm:$0xff] }
 0x435   : > { %3202 = vrot.lane.b32.xlu1 %v6179_v54, %s6464_s28  ;;  %v8906_v43 = vpop.eup %6192  ;;  %6212 = vpow2.f32 %v5020_v16  ;;  %v10188_v16 = vld [vmem:[#allocation108_spill] sm:$0xff]  ;;  %v2549_v17 = vpop.permute.xlu0 %2548 }
 0x436   : > { %v6195_v41 = vpop.eup %6194  ;;  %6214 = vtanh.f32 %v2678_v44  ;;  %v2683_v0 = vadd.f32 %v8870_v62, %v10188_v16  ;;  %v10190_v62 = vld [vmem:[#allocation111_spill] sm:$0xff] }
 0x437   : > { %3212 = vrot.lane.b32.xlu0 %v6183_v24, %s6464_s28  ;;  %v6197_v15 = vpop.eup %6196  ;;  %6216 = vpow2.f32 %v5021_v9 }
 0x438   : > { %v6199_v56 = vpop.eup %6198  ;;  %6218 = vtanh.f32 %v2679_v52  ;;  %v4205_v29 = vadd.f32 1.0, %v6197_v15  ;;  %v10191_v15 = vld [vmem:[#allocation113_spill] sm:$0xff] }
 0x439   : > { %3214 = vrot.lane.b32.xlu1 %v6187_v25, %s6464_s28  ;;  %v6201_v54 = vpop.eup %6200  ;;  %6220 = vpow2.f32 %v5018_v48  ;;  %v2681_v48 = vadd.f32 %v8891_v30, %v10190_v62  ;;  %v2545_v21 = vpop.permute.xlu0 %2544 }
 0x43a   : > { %v6203_v40 = vpop.eup %6202  ;;  %6222 = vtanh.f32 %v2676_v45  ;;  %v4202_v7 = vadd.f32 1.0, %v6201_v54  ;;  %v2551_v45 = vpop.permute.xlu1 %2550 }
 0x43b   : > { %3208 = vrot.lane.b32.xlu0 %v6191_v49, %s6464_s28  ;;  %v8919_v24 = vpop.eup %6204  ;;  %6224 = vrcp.f32 %v4204_v19  ;;  %v5024_v49 = vmul.f32 -1.442695, %v8544_v14  ;;  %v2686_v19 = vadd.f32 %v2541_v39, %v10191_v15  ;;  %v2684_v39 = vadd.f32 %v2537_v3, %v10193_v1  ;;  %v10195_v3 = vld [vmem:[#allocation121_spill] sm:$0xff]  ;;  %v10213_v15 = vld [vmem:[#allocation58_spill] sm:$0xff] }
 0x43c   : > { %v6207_v50 = vpop.eup %6206  ;;  %6226 = vtanh.f32 %v2677_v63  ;;  %v10192_v63 = vld [vmem:[#allocation116_spill] sm:$0xff]  ;;  %v2690_v11 = vadd.f32 %v2549_v17, %v10195_v3  ;;  %v5029_v3 = vmul.f32 -1.442695, %v8564_v12 }
 0x43d   : > { %3210 = vrot.lane.b32.xlu1 %v6195_v41, %s6464_s28  ;;  %v6209_v25 = vpop.eup %6208  ;;  %6228 = vpow2.f32 %v5019_v38  ;;  %v2687_v30 = vadd.f32 %v2543_v57, %v10192_v63  ;;  %v10194_v57 = vld [vmem:[#allocation119_spill] sm:$0xff] }
 0x43e   : > { %v6211_v44 = vpop.eup %6210  ;;  %6230 = vtanh.f32 %v2682_v28 }
 0x43f   : > { %3220 = vrot.lane.b32.xlu0 %v6199_v56, %s6464_s28  ;;  %v6213_v9 = vpop.eup %6212  ;;  %6232 = vrcp.f32 %v4205_v29  ;;  %v4203_v56 = vadd.f32 1.0, %v6209_v25  ;;  %v5022_v29 = vmul.f32 -1.442695, %v8552_v33 }
 0x440   : > { %v6215_v52 = vpop.eup %6214  ;;  %6234 = vtanh.f32 %v2683_v0  ;;  %v4208_v38 = vadd.f32 1.0, %v6213_v9  ;;  %v2685_v0 = vadd.f32 %v2539_v8, %v10194_v57  ;;  %v2557_v9 = vpop.permute.xlu0 %2556  ;;  %v10196_v8 = vld [vmem:[#allocation124_spill] sm:$0xff] }
 0x441   : > { %3222 = vrot.lane.b32.xlu1 %v6203_v40, %s6464_s28  ;;  %v6217_v41 = vpop.eup %6216  ;;  %6236 = vrcp.f32 %v4202_v7  ;;  %v5023_v7 = vmul.f32 -1.442695, %v8556_v53  ;;  %v10221_v53 = vld [vmem:[#allocation65_spill] sm:$0xff] }
 0x442   : > { %v6219_v58 = vpop.eup %6218  ;;  %6238 = vtanh.f32 %v2680_v13  ;;  %v4209_v33 = vadd.f32 1.0, %v6217_v41  ;;  %v10198_v41 = vld [vmem:[#allocation6_spill] sm:$0xff] }
 0x443   : > { %3216 = vrot.lane.b32.xlu0 %v6207_v50, %s6464_s28  ;;  %v6221_v14 = vpop.eup %6220  ;;  %6240 = vpow2.f32 %v5024_v49  ;;  %v2547_v50 = vpop.permute.xlu1 %2546 }
 0x444   : > { %v6223_v60 = vpop.eup %6222  ;;  %6242 = vtanh.f32 %v2681_v48  ;;  %v10197_v48 = vld [vmem:[#allocation5_spill] sm:$0xff] }
 0x445   : > { %3218 = vrot.lane.b32.xlu1 %v6211_v44, %s6464_s28  ;;  %v8936_v54 = vpop.eup %6224  ;;  %6244 = vpow2.f32 %v5025_v32  ;;  %v4206_v32 = vadd.f32 1.0, %v6221_v14  ;;  %v5028_v14 = vmul.f32 -1.442695, %v8560_v37  ;;  %v2553_v37 = vpop.permute.xlu0 %2552 }
 0x446   : > { %v6227_v40 = vpop.eup %6226  ;;  %6246 = vtanh.f32 %v2686_v19  ;;  %v5026_v19 = vmul.f32 -1.442695, %v8568_v47 }
 0x447   : > { %3228 = vrot.lane.b32.xlu0 %v6215_v52, %s6464_s28  ;;  %v6229_v28 = vpop.eup %6228  ;;  %6248 = vrcp.f32 %v4203_v56  ;;  %v2691_v52 = vadd.f32 %v2551_v45, %v10196_v8  ;;  %v10199_v56 = vld [vmem:[#allocation126_spill] sm:$0xff]  ;;  %v10200_v45 = vld [vmem:[#allocation7_spill] sm:$0xff] }
 0x448   : > { %v6231_v16 = vpop.eup %6230  ;;  %6250 = vtanh.f32 %v2687_v30  ;;  %v10214_v30 = vld [vmem:[#allocation135_spill] sm:$0xff] }
 0x449   : > { %3230 = vrot.lane.b32.xlu1 %v6219_v58, %s6464_s28  ;;  %v8943_v25 = vpop.eup %6232  ;;  %6252 = vrcp.f32 %v4208_v38  ;;  %v2559_v58 = vpop.permute.xlu1 %2558 }
 0x44a   : > { %v6235_v44 = vpop.eup %6234  ;;  %6254 = vtanh.f32 %v2684_v39  ;;  %v10201_v39 = vld [vmem:[#allocation8_spill] sm:$0xff] }
 0x44b   : > { %3224 = vrot.lane.b32.xlu0 %v6223_v60, %s6464_s28  ;;  %v8948_v13 = vpop.eup %6236  ;;  %6256 = vpow2.f32 %v5022_v29  ;;  %v2688_v60 = vadd.f32 %v2545_v21, %v10199_v56  ;;  %v10206_v56 = vld [vmem:[#allocation10_spill] sm:$0xff]  ;;  %v10210_v29 = vld [vmem:[#allocation56_spill] sm:$0xff] }
 0x44c   : > { %v6239_v49 = vpop.eup %6238  ;;  %6258 = vtanh.f32 %v2685_v0 }
 0x44d   : > { %3226 = vrot.lane.b32.xlu1 %v6227_v40, %s6464_s28  ;;  %v6241_v62 = vpop.eup %6240  ;;  %6260 = vpow2.f32 %v5023_v7  ;;  %v10203_v7 = vld [vmem:[#allocation9_spill] sm:$0xff]  ;;  %v2555_v12 = vpop.permute.xlu1 %2554 }
 0x44e   : > { %v6243_v17 = vpop.eup %6242  ;;  %6262 = vtanh.f32 %v2690_v11 }
 0x44f   : > { %3236 = vrot.lane.b32.xlu0 %v6231_v16, %s6464_s28  ;;  %v6245_v63 = vpop.eup %6244  ;;  %6264 = vrcp.f32 %v4209_v33  ;;  %v10202_v16 = vld [vmem:[#allocation127_spill] sm:$0xff] }
 0x450   : > { %v6247_v40 = vpop.eup %6246  ;;  %6266 = vtanh.f32 %v2691_v52  ;;  %v2689_v57 = vadd.f32 %v2547_v50, %v10202_v16  ;;  %v10205_v52 = vld [vmem:[#allocation129_spill] sm:$0xff]  ;;  %v10207_v33 = vld [vmem:[#allocation51_spill] sm:$0xff]  ;;  %v4212_v16 = vadd.f32 1.0, %v6241_v62  ;;  %v4213_v1 = vadd.f32 1.0, %v6245_v63 }
 0x451   : > { %3238 = vrot.lane.b32.xlu1 %v6235_v44, %s6464_s28  ;;  %v8964_v0 = vpop.eup %6248  ;;  %6268 = vrcp.f32 %v4206_v32  ;;  %v2694_v50 = vadd.f32 %v2557_v9, %v10205_v52  ;;  %v4207_v32 = vadd.f32 1.0, %v6229_v28  ;;  %v2565_v28 = vpop.permute.xlu0 %2564  ;;  %v5032_v63 = vmul.f32 -1.442695, %v8576_v36  ;;  %v10242_v52 = vld [vmem:[#allocation152_spill] sm:$0xff] }
 0x452   : > { %v6251_v11 = vpop.eup %6250  ;;  %6270 = vtanh.f32 %v2688_v60  ;;  %v10208_v60 = vld [vmem:[#allocation132_spill] sm:$0xff]  ;;  %v2567_v47 = vpop.permute.xlu1 %2566 }
 0x453   : > { %3232 = vrot.lane.b32.xlu0 %v6239_v49, %s6464_s28  ;;  %v10204_v49 = vld [vmem:[#allocation48_spill] sm:$0xff]  ;;  %6272 = vpow2.f32 %v5028_v14  ;;  %v2695_v38 = vadd.f32 %v2559_v58, %v10208_v60  ;;  %v5036_v60 = vmul.f32 -1.442695, %v8592_v10 }
 0x454   : > { %6274 = vtanh.f32 %v2689_v57  ;;  %v10211_v57 = vld [vmem:[#allocation134_spill] sm:$0xff]  ;;  %v10249_v10 = vunpack.i.l.bf16 %v10204_v49 }
 0x455   : > { %3234 = vrot.lane.b32.xlu1 %v6243_v17, %s6464_s28  ;;  %v8973_v17 = vpop.eup %6252  ;;  %6276 = vpow2.f32 %v5029_v3  ;;  %v2692_v21 = vadd.f32 %v2553_v37, %v10211_v57  ;;  %v10228_v57 = vld [vmem:[#allocation143_spill] sm:$0xff] }
 0x456   : > { %6278 = vtanh.f32 %v2694_v50  ;;  %v2693_v50 = vadd.f32 %v2555_v12, %v10214_v30  ;;  %v2563_v36 = vpop.permute.xlu1 %2562 }
 0x457   : > { %3244 = vrot.lane.b32.xlu0 %v6247_v40, %s6464_s28  ;;  %v6255_v40 = vpop.eup %6254  ;;  %6280 = vrcp.f32 %v4207_v32  ;;  %v2697_v30 = vadd.f32 %v2563_v36, %v10228_v57  ;;  %v10252_v32 = vld [vmem:[#allocation52_spill] sm:$0xff] }
 0x458   : > { %v6257_v9 = vpop.eup %6256  ;;  %6282 = vtanh.f32 %v2695_v38 }
 0x459   : > { %3246 = vrot.lane.b32.xlu1 %v6251_v11, %s6464_s28  ;;  %v6259_v14 = vpop.eup %6258  ;;  %6284 = vpow2.f32 %v5026_v19  ;;  %v10218_v11 = vld [vmem:[#allocation137_spill] sm:$0xff]  ;;  %v2561_v19 = vpop.permute.xlu0 %2560  ;;  %v4210_v12 = vadd.f32 1.0, %v6257_v9 }
 0x45a   : > { %v6261_v58 = vpop.eup %6260  ;;  %6286 = vtanh.f32 %v2692_v21  ;;  %v2698_v38 = vadd.f32 %v2565_v28, %v10218_v11  ;;  %v10222_v21 = vld [vmem:[#allocation140_spill] sm:$0xff] }
 0x45b   : > { %3240 = vrot.lane.b32.xlu0 %v6255_v40, %s6464_s28  ;;  %v6263_v3 = vpop.eup %6262  ;;  %6288 = vrcp.f32 %v4212_v16  ;;  %v2699_v28 = vadd.f32 %v2567_v47, %v10222_v21  ;;  %v5027_v16 = vmul.f32 -1.442695, %v8572_v23  ;;  %v4211_v37 = vadd.f32 1.0, %v6261_v58  ;;  %v10246_v21 = vld [vmem:[#allocation39_spill] sm:$0xff] }
 0x45c   : > { %v8994_v8 = vpop.eup %6264  ;;  %6290 = vtanh.f32 %v2693_v50  ;;  %v10225_v50 = vld [vmem:[#allocation142_spill] sm:$0xff] }
 0x45d   : > { %3242 = vrot.lane.b32.xlu1 %v6259_v14, %s6464_s28  ;;  %10215 = vst [vmem:[#allocation173_spill] sm:$0xff] %v8994_v8  ;;  %v6267_v62 = vpop.eup %6266  ;;  %v10217_v14 = vld [vmem:[#allocation60_spill] sm:$0xff]  ;;  %6292 = vrcp.f32 %v4213_v1  ;;  %v2696_v40 = vadd.f32 %v2561_v19, %v10225_v50  ;;  %v5030_v50 = vmul.f32 -1.442695, %v8584_v22  ;;  %v5033_v22 = vmul.f32 -1.442695, %v8580_v5 }
 0x45e   : > { %v9002_v44 = vpop.eup %6268  ;;  %6294 = vtanh.f32 %v2698_v38  ;;  %v10234_v1 = vld [vmem:[#allocation148_spill] sm:$0xff]  ;;  %v2775_v8 = vsub.f32 1.0, %v10252_v32 }
 0x45f   : > { %3252 = vrot.lane.b32.xlu0 %v6263_v3, %s6464_s28  ;;  %10219 = vst [vmem:[#allocation174_spill] sm:$0xff] %v9002_v44  ;;  %v6271_v3 = vpop.eup %6270  ;;  %6296 = vpow2.f32 %v5032_v63 }
 0x460   : > { %v6273_v11 = vpop.eup %6272  ;;  %6298 = vtanh.f32 %v2699_v28 }
 0x461   : > { %3254 = vrot.lane.b32.xlu1 %v6267_v62, %s6464_s28  ;;  %v6275_v62 = vpop.eup %6274  ;;  %6300 = vpow2.f32 %v5027_v16 }
 0x462   : > { %v6277_v47 = vpop.eup %6276  ;;  %6302 = vtanh.f32 %v2696_v40 }
 0x463   : > { %3248 = vrot.lane.b32.xlu0 %v6271_v3, %s6464_s28  ;;  %v6279_v23 = vpop.eup %6278  ;;  %6304 = vrcp.f32 %v4210_v12  ;;  %v4217_v57 = vadd.f32 1.0, %v6277_v47 }
 0x464   : > { %v9024_v38 = vpop.eup %6280  ;;  %6306 = vtanh.f32 %v2697_v30  ;;  %v10238_v30 = vld [vmem:[#allocation150_spill] sm:$0xff] }
 0x465   : > { %3250 = vrot.lane.b32.xlu1 %v6275_v62, %s6464_s28  ;;  %10229 = vst [vmem:[#allocation175_spill] sm:$0xff] %v9024_v38  ;;  %v6283_v9 = vpop.eup %6282  ;;  %6308 = vrcp.f32 %v4211_v37  ;;  %v4216_v37 = vadd.f32 1.0, %v6273_v11  ;;  %v10244_v11 = vld [vmem:[#allocation41_spill] sm:$0xff] }
 0x466   : > { %v6285_v28 = vpop.eup %6284  ;;  %v10248_v62 = vld [vmem:[#allocation49_spill] sm:$0xff] }
 0x467   : > { %3260 = vrot.lane.b32.xlu0 %v6279_v23, %s6464_s28  ;;  %v6287_v16 = vpop.eup %6286  ;;  %v10245_v23 = vld [vmem:[#allocation154_spill] sm:$0xff]  ;;  %v4214_v3 = vadd.f32 1.0, %v6285_v28  ;;  %v5034_v28 = vmul.f32 -1.442695, %v8600_v2  ;;  %v10254_v2 = vld [vmem:[#allocation149_spill] sm:$0xff] }
 0x468   : > { %v9039_v40 = vpop.eup %6288 }
 0x469   : > { %3262 = vrot.lane.b32.xlu1 %v6283_v9, %s6464_s28  ;;  %v2573_v58 = vpop.permute.xlu0 %2572  ;;  %10235 = vst [vmem:[#allocation23_spill] sm:$0xff] %v9039_v40  ;;  %v6291_v9 = vpop.eup %6290  ;;  %v5031_v40 = vmul.f32 -1.442695, %v8588_v51 }
 0x46a   : > { %v2702_v44 = vadd.f32 %v2573_v58, %v10234_v1  ;;  %v9048_v58 = vpop.eup %6292 }
 0x46b   : > { %v2575_v12 = vpop.permute.xlu1 %2574  ;;  %3256 = vrot.lane.b32.xlu0 %v6287_v16, %s6464_s28  ;;  %10239 = vst [vmem:[#allocation176_spill] sm:$0xff] %v9048_v58  ;;  %v6295_v16 = vpop.eup %6294 }
 0x46c   : > { %6310 = vtanh.f32 %v2702_v44  ;;  %v2703_v1 = vadd.f32 %v2575_v12, %v10238_v30  ;;  %v10243_v44 = vld [vmem:[#allocation45_spill] sm:$0xff]  ;;  %v6297_v12 = vpop.eup %6296 }
 0x46d   : > { %6312 = vpow2.f32 %v5030_v50  ;;  %3258 = vrot.lane.b32.xlu1 %v6291_v9, %s6464_s28  ;;  %v2569_v5 = vpop.permute.xlu0 %2568  ;;  %v2770_v19 = vsub.f32 1.0, %v10243_v44  ;;  %v2771_v50 = vsub.f32 1.0, %v10244_v11  ;;  %v6299_v9 = vpop.eup %6298 }
 0x46e   : > { %6314 = vtanh.f32 %v2703_v1  ;;  %v2700_v63 = vadd.f32 %v2569_v5, %v10242_v52  ;;  %v2768_v52 = vsub.f32 1.0, %v10246_v21  ;;  %v6301_v5 = vpop.eup %6300 }
 0x46f   : > { %6316 = vpow2.f32 %v5033_v22  ;;  %v2571_v36 = vpop.permute.xlu1 %2570  ;;  %3268 = vrot.lane.b32.xlu0 %v6295_v16, %s6464_s28  ;;  %v10247_v22 = vld [vmem:[#allocation40_spill] sm:$0xff]  ;;  %v2774_v16 = vsub.f32 1.0, %v10248_v62  ;;  %v6303_v58 = vpop.eup %6302 }
 0x470   : > { %6318 = vtanh.f32 %v2700_v63  ;;  %v2701_v1 = vadd.f32 %v2571_v36, %v10245_v23  ;;  %v2769_v30 = vsub.f32 1.0, %v10247_v22  ;;  %v3026_v63 = vmul.f32 %v10249_v10, %v2770_v19  ;;  %v9069_v23 = vpop.eup %6304 }
 0x471   : > { %6320 = vrcp.f32 %v4216_v37  ;;  %3270 = vrot.lane.b32.xlu1 %v6299_v9, %s6464_s28  ;;  %v3157_v47 = vpop.permute.xlu0 %3156  ;;  %10250 = vst [vmem:[#allocation22_spill] sm:$0xff] %v9069_v23  ;;  %v10251_v37 = vunpack.i.h.bf16 %v10204_v49  ;;  %v6307_v51 = vpop.eup %6306  ;;  %v10255_v49 = vunpack.i.l.bf16 %v10197_v48 }
 0x472   : > { %6322 = vtanh.f32 %v2701_v1  ;;  %v3346_v36 = vmul.f32 %v10243_v44, %v3157_v47  ;;  %v10253_v44 = vld [vmem:[#allocation50_spill] sm:$0xff]  ;;  %v9078_v10 = vpop.eup %6308 }
 0x473   : > { %6324 = vrcp.f32 %v4217_v57  ;;  %v3027_v9 = vmul.f32 %v10251_v37, %v2771_v50  ;;  %v3159_v38 = vpop.permute.xlu1 %3158  ;;  %3264 = vrot.lane.b32.xlu0 %v6303_v58, %s6464_s28  ;;  %v2772_v47 = vsub.f32 1.0, %v10253_v44  ;;  %v5037_v57 = vmul.f32 -1.442695, %v10254_v2  ;;  %v10256_v37 = vld [vmem:[#allocation53_spill] sm:$0xff] }
 0x474   : > { %6326 = vpow2.f32 %v5036_v60  ;;  %v3410_v1 = vadd.f32 %v3346_v36, %v3026_v63  ;;  %v3347_v19 = vmul.f32 %v10244_v11, %v3159_v38  ;;  %v3024_v58 = vmul.f32 %v10255_v49, %v2768_v52 }
 0x475   : > { %6328 = vrcp.f32 %v4214_v3  ;;  %3266 = vrot.lane.b32.xlu1 %v6307_v51, %s6464_s28  ;;  %v3153_v50 = vpop.permute.xlu0 %3152  ;;  %v2773_v23 = vsub.f32 1.0, %v10256_v37  ;;  %v4220_v3 = vadd.f32 1.0, %v6297_v12  ;;  %v10257_v52 = vunpack.i.h.bf16 %v10197_v48 }
 0x476   : > { %v6311_v60 = vpop.eup %6310  ;;  %6330 = vpow2.f32 %v5031_v40  ;;  %v4380_v63 = vmul.f32 %v8757_v27, %v3410_v1  ;;  %v3411_v38 = vadd.f32 %v3347_v19, %v3027_v9  ;;  %v3344_v11 = vmul.f32 %v10246_v21, %v3153_v50 }
 0x477   : > { %v6313_v36 = vpop.eup %6312  ;;  %6332 = vpow2.f32 %v5034_v28  ;;  %v3025_v51 = vmul.f32 %v10257_v52, %v2769_v30  ;;  %v3155_v40 = vpop.permute.xlu1 %3154  ;;  %3276 = vrot.lane.b32.xlu0 %v6311_v60, %s6464_s28  ;;  %v4215_v49 = vadd.f32 1.0, %v6301_v5  ;;  %v10258_v12 = vunpack.i.l.bf16 %v10207_v33 }
 0x478   : > { %v6315_v27 = vpop.eup %6314  ;;  %v5130_v9 = vpack.c.bf16 %v4380_v63, %v4380_v63  ;;  %v4381_v21 = vmul.f32 %v8783_v46, %v3411_v38  ;;  %v3408_v1 = vadd.f32 %v3344_v11, %v3024_v58  ;;  %v3345_v19 = vmul.f32 %v10247_v22, %v3155_v40  ;;  %v10260_v63 = vld [vmem:[#allocation153_spill] sm:$0xff] }
 0x479   : > { %v6317_v2 = vpop.eup %6316  ;;  %6334 = vpow2.f32 %v5037_v57  ;;  %3278 = vrot.lane.b32.xlu1 %v6315_v27, %s6464_s28  ;;  %v3030_v48 = vmul.f32 %v10258_v12, %v2774_v16  ;;  %v3165_v30 = vpop.permute.xlu0 %3164  ;;  %v10259_v28 = vunpack.i.h.bf16 %v10207_v33  ;;  %v5040_v38 = vmul.f32 -1.442695, %v10260_v63 }
 0x47a   : > { %v6319_v60 = vpop.eup %6318  ;;  %4701 = vst.msk [vmem:[%s9092_s6 + $0x8] sm:$0xf] %vm4698_vm3, %v5130_v9  ;;  %v5131_v46 = vpack.c.bf16 %v4381_v21, %v4381_v21  ;;  %v4378_v58 = vmul.f32 %v8770_v6, %v3408_v1  ;;  %v3409_v22 = vadd.f32 %v3345_v19, %v3025_v51  ;;  %v3350_v5 = vmul.f32 %v10248_v62, %v3165_v30  ;;  %v10263_v9 = vld [vmem:[#allocation151_spill] sm:$0xff]  ;;  %v10265_v1 = vld [vmem:[#allocation61_spill] sm:$0xff] }
 0x47b   : > { %v3031_v50 = vmul.f32 %v10259_v28, %v2775_v8  ;;  %v9108_v57 = vpop.eup %6320  ;;  %6336 = vrcp.f32 %v4220_v3  ;;  %v3167_v16 = vpop.permute.xlu1 %3166  ;;  %3272 = vrot.lane.b32.xlu0 %v6319_v60, %s6464_s28  ;;  %v10261_v33 = vunpack.i.l.bf16 %v10198_v41  ;;  %v10262_v11 = vunpack.i.h.bf16 %v10198_v41  ;;  %v10264_v41 = vld [vmem:[#allocation62_spill] sm:$0xff] }
 0x47c   : > { %v6323_v40 = vpop.eup %6322  ;;  %4702 = vst.msk [vmem:[%s9092_s6 + $0xc] sm:$0xf] %vm4698_vm3, %v5131_v46  ;;  %v5128_v6 = vpack.c.bf16 %v4378_v58, %v4378_v58  ;;  %v4379_v62 = vmul.f32 %v8776_v59, %v3409_v22  ;;  %v3414_v51 = vadd.f32 %v3350_v5, %v3030_v48  ;;  %v3351_v3 = vmul.f32 %v10252_v32, %v3167_v16  ;;  %v10266_v46 = vld [vmem:[#allocation64_spill] sm:$0xff]  ;;  %v10267_v22 = vld [vmem:[#allocation63_spill] sm:$0xff] }
 0x47d   : > { %v3028_v8 = vmul.f32 %v10261_v33, %v2772_v47  ;;  %v3029_v52 = vmul.f32 %v10262_v11, %v2773_v23  ;;  %v9120_v27 = vpop.eup %6324  ;;  %6338 = vrcp.f32 %v4215_v49  ;;  %v5035_v21 = vmul.f32 -1.442695, %v10263_v9  ;;  %3274 = vrot.lane.b32.xlu1 %v6323_v40, %s6464_s28  ;;  %v3161_v47 = vpop.permute.xlu0 %3160 }
 0x47e   : > { %v2778_v23 = vsub.f32 1.0, %v10264_v41  ;;  %v2779_v19 = vsub.f32 1.0, %v10265_v1  ;;  %v6327_v12 = vpop.eup %6326  ;;  %4699 = vst.msk [vmem:[%s9092_s6] sm:$0xf] %vm4698_vm3, %v5128_v6  ;;  %v5129_v59 = vpack.c.bf16 %v4379_v62, %v4379_v62  ;;  %v4384_v48 = vmul.f32 %v8795_v31, %v3414_v51  ;;  %v10269_v6 = vld [vmem:[#allocation72_spill] sm:$0xff] }
 0x47f   : > { %v3415_v32 = vadd.f32 %v3351_v3, %v3031_v50  ;;  %v3348_v30 = vmul.f32 %v10253_v44, %v3161_v47  ;;  %v9130_v49 = vpop.eup %6328  ;;  %v4218_v28 = vadd.f32 1.0, %v6313_v36  ;;  %6340 = vpow2.f32 %v5040_v38  ;;  %v3163_v60 = vpop.permute.xlu1 %3162 }
 0x480   : > { %v2776_v58 = vsub.f32 1.0, %v10266_v46  ;;  %v2777_v5 = vsub.f32 1.0, %v10267_v22  ;;  %v6331_v63 = vpop.eup %6330  ;;  %4700 = vst.msk [vmem:[%s9092_s6 + $0x4] sm:$0xf] %vm4698_vm3, %v5129_v59  ;;  %v5134_v16 = vpack.c.bf16 %v4384_v48, %v4384_v48  ;;  %v3349_v50 = vmul.f32 %v10256_v37, %v3163_v60  ;;  %v10272_v59 = vld [vmem:[#allocation73_spill] sm:$0xff] }
 0x481   : > { %v4385_v33 = vmul.f32 %v8803_v4, %v3415_v32  ;;  %v3412_v31 = vadd.f32 %v3348_v30, %v3028_v8  ;;  %v9138_v44 = vpop.eup %6332  ;;  %v4221_v11 = vadd.f32 1.0, %v6317_v2  ;;  %6342 = vpow2.f32 %v5035_v21  ;;  %v3173_v40 = vpop.permute.xlu0 %3172  ;;  %v10270_v2 = vld [vmem:[#allocation159_spill] sm:$0xff] }
 0x482   : > { %v10268_v36 = vunpack.i.l.bf16 %v10210_v29  ;;  %v2782_v62 = vsub.f32 1.0, %v10269_v6  ;;  %4705 = vst.msk [vmem:[%s9092_s6 + $0x18] sm:$0xf] %vm4698_vm3, %v5134_v16  ;;  %v3413_v4 = vadd.f32 %v3349_v50, %v3029_v52  ;;  %v3354_v8 = vmul.f32 %v10264_v41, %v3173_v40 }
 0x483   : > { %v5135_v51 = vpack.c.bf16 %v4385_v33, %v4385_v33  ;;  %v4382_v3 = vmul.f32 %v8820_v61, %v3412_v31  ;;  %v9147_v37 = vpop.eup %6334  ;;  %6344 = vrcp.f32 %v4218_v28  ;;  %v5038_v9 = vmul.f32 -1.442695, %v10270_v2  ;;  %v10273_v28 = vld [vmem:[#allocation155_spill] sm:$0xff]  ;;  %v10275_v33 = vld [vmem:[#allocation76_spill] sm:$0xff] }
 0x484   : > { %v3034_v38 = vmul.f32 %v10268_v36, %v2778_v23  ;;  %v10271_v21 = vunpack.i.h.bf16 %v10210_v29  ;;  %v3175_v23 = vpop.permute.xlu1 %3174  ;;  %v2783_v48 = vsub.f32 1.0, %v10272_v59  ;;  %v4383_v61 = vmul.f32 %v8844_v20, %v3413_v4 }
 0x485   : > { %4706 = vst.msk [vmem:[%s9092_s6 + $0x1c] sm:$0xf] %vm4698_vm3, %v5135_v51  ;;  %v5132_v32 = vpack.c.bf16 %v4382_v3, %v4382_v3  ;;  %v3355_v41 = vmul.f32 %v10265_v1, %v3175_v23  ;;  %v9157_v30 = vpop.eup %6336  ;;  %6346 = vrcp.f32 %v4221_v11  ;;  %v5041_v60 = vmul.f32 -1.442695, %v10273_v28  ;;  %v3169_v16 = vpop.permute.xlu0 %3168  ;;  %v10277_v3 = vld [vmem:[#allocation74_spill] sm:$0xff] }
 0x486   : > { %v3035_v47 = vmul.f32 %v10271_v21, %v2779_v19  ;;  %v3418_v52 = vadd.f32 %v3354_v8, %v3034_v38  ;;  %v10274_v29 = vunpack.i.l.bf16 %v10200_v45  ;;  %v2780_v31 = vsub.f32 1.0, %v10275_v33 }
 0x487   : > { %4703 = vst.msk [vmem:[%s9092_s6 + $0x10] sm:$0xf] %vm4698_vm3, %v5132_v32  ;;  %v5133_v50 = vpack.c.bf16 %v4383_v61, %v4383_v61  ;;  %v3352_v1 = vmul.f32 %v10266_v46, %v3169_v16  ;;  %v9167_v38 = vpop.eup %6338  ;;  %v4224_v11 = vadd.f32 1.0, %v6327_v12  ;;  %6348 = vpow2.f32 %v5038_v9  ;;  %v10278_v12 = vld [vmem:[#allocation161_spill] sm:$0xff] }
 0x488   : > { %v3032_v19 = vmul.f32 %v10274_v29, %v2776_v58  ;;  %v4388_v20 = vmul.f32 %v8856_v55, %v3418_v52  ;;  %v3419_v36 = vadd.f32 %v3355_v41, %v3035_v47  ;;  %v10276_v40 = vunpack.i.h.bf16 %v10200_v45  ;;  %v3171_v58 = vpop.permute.xlu1 %3170 }
 0x489   : > { %v2781_v4 = vsub.f32 1.0, %v10277_v3  ;;  %4704 = vst.msk [vmem:[%s9092_s6 + $0x14] sm:$0xf] %vm4698_vm3, %v5133_v50  ;;  %v3353_v21 = vmul.f32 %v10267_v22, %v3171_v58  ;;  %v9176_v46 = vpop.eup %6340  ;;  %6350 = vpow2.f32 %v5041_v60  ;;  %v5039_v9 = vmul.f32 -1.442695, %v10278_v12  ;;  %v3181_v47 = vpop.permute.xlu0 %3180 }
 0x48a   : > { %v3033_v51 = vmul.f32 %v10276_v40, %v2777_v5  ;;  %v5138_v8 = vpack.c.bf16 %v4388_v20, %v4388_v20  ;;  %v4389_v2 = vmul.f32 %v8862_v42, %v3419_v36  ;;  %v3416_v55 = vadd.f32 %v3352_v1, %v3032_v19  ;;  %v10283_v36 = vld [vmem:[#allocation82_spill] sm:$0xff]  ;;  %v10284_v1 = vld [vmem:[#allocation84_spill] sm:$0xff] }
 0x48b   : > { %v10279_v45 = vunpack.i.l.bf16 %v10213_v15  ;;  %v10280_v23 = vunpack.i.h.bf16 %v10213_v15  ;;  %v3358_v22 = vmul.f32 %v10269_v6, %v3181_v47  ;;  %v9187_v41 = vpop.eup %6342  ;;  %6352 = vrcp.f32 %v4224_v11 }
 0x48c   : > { %4709 = vst.msk [vmem:[%s9092_s6 + $0x28] sm:$0xf] %vm4698_vm3, %v5138_v8  ;;  %v5139_v61 = vpack.c.bf16 %v4389_v2, %v4389_v2  ;;  %v4386_v42 = vmul.f32 %v8875_v35, %v3416_v55  ;;  %v3417_v52 = vadd.f32 %v3353_v21, %v3033_v51  ;;  %v4219_v28 = vadd.f32 1.0, %v6331_v63  ;;  %v3183_v60 = vpop.permute.xlu1 %3182  ;;  %v10286_v2 = vld [vmem:[#allocation86_spill] sm:$0xff] }
 0x48d   : > { %v3038_v5 = vmul.f32 %v10279_v45, %v2782_v62  ;;  %v3039_v32 = vmul.f32 %v10280_v23, %v2783_v48  ;;  %v10281_v62 = vunpack.i.l.bf16 %v10201_v39  ;;  %v10282_v15 = vunpack.i.h.bf16 %v10201_v39  ;;  %v9197_v50 = vpop.eup %6344  ;;  %v3177_v63 = vpop.permute.xlu0 %3176  ;;  %v10287_v45 = vld [vmem:[#allocation162_spill] sm:$0xff] }
 0x48e   : > { %4710 = vst.msk [vmem:[%s9092_s6 + $0x2c] sm:$0xf] %vm4698_vm3, %v5139_v61  ;;  %v5136_v19 = vpack.c.bf16 %v4386_v42, %v4386_v42  ;;  %v4387_v35 = vmul.f32 %v8881_v26, %v3417_v52  ;;  %v3359_v6 = vmul.f32 %v10272_v59, %v3183_v60  ;;  %v4222_v20 = vadd.f32 1.0, %v9138_v44 }
 0x48f   : > { %v3036_v29 = vmul.f32 %v10281_v62, %v2780_v31  ;;  %v3037_v48 = vmul.f32 %v10282_v15, %v2781_v4  ;;  %v3422_v16 = vadd.f32 %v3358_v22, %v3038_v5  ;;  %6354 = vpow2.f32 %v5039_v9  ;;  %v9206_v59 = vpop.eup %6346  ;;  %v10285_v4 = vld [vmem:[#allocation83_spill] sm:$0xff] }
 0x490   : > { %v2786_v31 = vsub.f32 1.0, %v10283_v36  ;;  %v2787_v39 = vsub.f32 1.0, %v10284_v1  ;;  %4707 = vst.msk [vmem:[%s9092_s6 + $0x20] sm:$0xf] %vm4698_vm3, %v5136_v19  ;;  %v5137_v11 = vpack.c.bf16 %v4387_v35, %v4387_v35  ;;  %v3423_v26 = vadd.f32 %v3359_v6, %v3039_v32  ;;  %v3179_v58 = vpop.permute.xlu1 %3178  ;;  %v10289_v32 = vld [vmem:[#allocation95_spill] sm:$0xff]  ;;  %v10292_v19 = vld [vmem:[#allocation92_spill] sm:$0xff] }
 0x491   : > { %v4392_v40 = vmul.f32 %v8888_v34, %v3422_v16  ;;  %v3356_v51 = vmul.f32 %v10275_v33, %v3177_v63  ;;  %6356 = vrcp.f32 %v4219_v28  ;;  %v4225_v44 = vadd.f32 1.0, %v9147_v37  ;;  %v9215_v33 = vpop.eup %6348  ;;  %v3189_v23 = vpop.permute.xlu0 %3188  ;;  %v10290_v28 = vld [vmem:[#allocation164_spill] sm:$0xff] }
 0x492   : > { %v2784_v8 = vsub.f32 1.0, %v10285_v4  ;;  %v2785_v55 = vsub.f32 1.0, %v10286_v2  ;;  %4708 = vst.msk [vmem:[%s9092_s6 + $0x24] sm:$0xf] %vm4698_vm3, %v5137_v11  ;;  %v4393_v12 = vmul.f32 %v8896_v18, %v3423_v26  ;;  %v3357_v9 = vmul.f32 %v10277_v3, %v3179_v58 }
 0x493   : > { %v5142_v21 = vpack.c.bf16 %v4392_v40, %v4392_v40  ;;  %v3420_v34 = vadd.f32 %v3356_v51, %v3036_v29  ;;  %6358 = vrcp.f32 %v4222_v20  ;;  %v5044_v5 = vmul.f32 -1.442695, %v10287_v45  ;;  %v9225_v22 = vpop.eup %6350 }
 0x494   : > { %v10288_v37 = vunpack.i.l.bf16 %v10217_v14  ;;  %v2790_v61 = vsub.f32 1.0, %v10289_v32  ;;  %v5143_v42 = vpack.c.bf16 %v4393_v12, %v4393_v12  ;;  %v3421_v52 = vadd.f32 %v3357_v9, %v3037_v48  ;;  %v3191_v15 = vpop.permute.xlu1 %3190 }
 0x495   : > { %4713 = vst.msk [vmem:[%s9092_s6 + $0x38] sm:$0xf] %vm4698_vm3, %v5142_v21  ;;  %v4390_v18 = vmul.f32 %v8906_v43, %v3420_v34  ;;  %v3362_v3 = vmul.f32 %v10283_v36, %v3189_v23  ;;  %6360 = vrcp.f32 %v4225_v44  ;;  %v5042_v60 = vmul.f32 -1.442695, %v10290_v28  ;;  %v9235_v20 = vpop.eup %6352 }
 0x496   : > { %v3042_v47 = vmul.f32 %v10288_v37, %v2786_v31  ;;  %v10291_v62 = vunpack.i.h.bf16 %v10217_v14  ;;  %v2791_v35 = vsub.f32 1.0, %v10292_v19  ;;  %4714 = vst.msk [vmem:[%s9092_s6 + $0x3c] sm:$0xf] %vm4698_vm3, %v5143_v42  ;;  %v4391_v43 = vmul.f32 %v8919_v24, %v3421_v52  ;;  %v3185_v31 = vpop.permute.xlu0 %3184  ;;  %v10300_v52 = vld [vmem:[#allocation166_spill] sm:$0xff] }
 0x497   : > { %v5140_v16 = vpack.c.bf16 %v4390_v18, %v4390_v18  ;;  %v3363_v6 = vmul.f32 %v10284_v1, %v3191_v15  ;;  %v4228_v63 = vadd.f32 1.0, %v9176_v46  ;;  %6362 = vpow2.f32 %v5044_v5 }
 0x498   : > { %v3043_v29 = vmul.f32 %v10291_v62, %v2787_v39  ;;  %v3426_v48 = vadd.f32 %v3362_v3, %v3042_v47  ;;  %v10293_v14 = vunpack.i.l.bf16 %v10203_v7  ;;  %v10294_v39 = vld [vmem:[#allocation96_spill] sm:$0xff]  ;;  %v5141_v40 = vpack.c.bf16 %v4391_v43, %v4391_v43  ;;  %v10302_v62 = vld [vmem:[#allocation93_spill] sm:$0xff] }
 0x499   : > { %v2788_v11 = vsub.f32 1.0, %v10294_v39  ;;  %4711 = vst.msk [vmem:[%s9092_s6 + $0x30] sm:$0xf] %vm4698_vm3, %v5140_v16  ;;  %v3360_v1 = vmul.f32 %v10285_v4, %v3185_v31  ;;  %v9245_v51 = vpop.eup %6354  ;;  %v4223_v46 = vadd.f32 1.0, %v9187_v41  ;;  %6364 = vpow2.f32 %v5042_v60  ;;  %v10297_v41 = vld [vmem:[#allocation163_spill] sm:$0xff] }
 0x49a   : > { %v3040_v36 = vmul.f32 %v10293_v14, %v2784_v8  ;;  %v4396_v24 = vmul.f32 %v8936_v54, %v3426_v48  ;;  %v3427_v26 = vadd.f32 %v3363_v6, %v3043_v29  ;;  %v10295_v44 = vunpack.i.h.bf16 %v10203_v7  ;;  %v3187_v8 = vpop.permute.xlu1 %3186  ;;  %4712 = vst.msk [vmem:[%s9092_s6 + $0x34] sm:$0xf] %vm4698_vm3, %v5141_v40  ;;  %v3197_v7 = vpop.permute.xlu0 %3196  ;;  %v10303_v6 = vld [vmem:[#allocation103_spill] sm:$0xff]  ;;  %v10304_v14 = vld [vmem:[#allocation105_spill] sm:$0xff] }
 0x49b   : > { %v10296_v21 = vunpack.i.l.bf16 %v10221_v53  ;;  %v3361_v4 = vmul.f32 %v10286_v2, %v3187_v8  ;;  %v9256_v45 = vpop.eup %6356  ;;  %6366 = vrcp.f32 %v4228_v63  ;;  %v5045_v5 = vmul.f32 -1.442695, %v10297_v41  ;;  %v10311_v41 = vld [vmem:[#allocation104_spill] sm:$0xff] }
 0x49c   : > { %v3041_v58 = vmul.f32 %v10295_v44, %v2785_v55  ;;  %v5146_v34 = vpack.c.bf16 %v4396_v24, %v4396_v24  ;;  %v4397_v54 = vmul.f32 %v8943_v25, %v3427_v26  ;;  %v3424_v9 = vadd.f32 %v3360_v1, %v3040_v36  ;;  %v10298_v55 = vld [vmem:[#allocation178_spill] sm:$0xff] }
 0x49d   : > { %v3046_v12 = vmul.f32 %v10296_v21, %v2790_v61  ;;  %v3988_v37 = vsel %vm3801_vm14, %v10298_v55, 0.0  ;;  %v10299_v47 = vunpack.i.h.bf16 %v10221_v53  ;;  %v3366_v2 = vmul.f32 %v10289_v32, %v3197_v7  ;;  %v9267_v18 = vpop.eup %6358  ;;  %v10312_v55 = vld [vmem:[#allocation174_spill] sm:$0xff] }
 0x49e   : > { %4717 = vst.msk [vmem:[%s9092_s6 + $0x48] sm:$0xf] %vm4698_vm3, %v5146_v34  ;;  %v5147_v61 = vpack.c.bf16 %v4397_v54, %v4397_v54  ;;  %v4394_v25 = vmul.f32 %v8948_v13, %v3424_v9  ;;  %v3425_v42 = vadd.f32 %v3361_v4, %v3041_v58  ;;  %3989 = vadd.xlane.f32.xlu0 %v3988_v37  ;;  %6368 = vrcp.f32 %v4223_v46  ;;  %v3199_v28 = vpop.permute.xlu1 %3198  ;;  %v3193_v48 = vpop.permute.xlu0 %3192  ;;  %v10306_v46 = vld [vmem:[#allocation177_spill] sm:$0xff] }
 0x49f   : > { %v3047_v23 = vmul.f32 %v10299_v47, %v2791_v35  ;;  %v5048_v3 = vmul.f32 -1.442695, %v10300_v52  ;;  %v10301_v60 = vunpack.i.l.bf16 %v10206_v56  ;;  %v2789_v29 = vsub.f32 1.0, %v10302_v62  ;;  %v9277_v16 = vpop.eup %6360 }
 0x4a0   : > { %4718 = vst.msk [vmem:[%s9092_s6 + $0x4c] sm:$0xf] %vm4698_vm3, %v5147_v61  ;;  %v5144_v15 = vpack.c.bf16 %v4394_v25, %v4394_v25  ;;  %v4395_v13 = vmul.f32 %v8964_v0, %v3425_v42  ;;  %v3430_v35 = vadd.f32 %v3366_v2, %v3046_v12  ;;  %v3367_v32 = vmul.f32 %v10292_v19, %v3199_v28 }
 0x4a1   : > { %v3044_v53 = vmul.f32 %v10301_v60, %v2788_v11  ;;  %v4226_v43 = vadd.f32 1.0, %v9215_v33  ;;  %6370 = vpow2.f32 %v5045_v5  ;;  %v2794_v63 = vsub.f32 1.0, %v10303_v6  ;;  %v9286_v19 = vpop.eup %6362 }
 0x4a2   : > { %v2795_v36 = vsub.f32 1.0, %v10304_v14  ;;  %4715 = vst.msk [vmem:[%s9092_s6 + $0x40] sm:$0xf] %vm4698_vm3, %v5144_v15  ;;  %v5145_v31 = vpack.c.bf16 %v4395_v13, %v4395_v13  ;;  %v4400_v11 = vmul.f32 %v8973_v17, %v3430_v35  ;;  %v3431_v0 = vadd.f32 %v3367_v32, %v3047_v23  ;;  %v3195_v1 = vpop.permute.xlu1 %3194  ;;  %v10307_v17 = vld [vmem:[#allocation173_spill] sm:$0xff]  ;;  %v3205_v4 = vpop.permute.xlu0 %3204  ;;  %v10316_v35 = vld [vmem:[#allocation168_spill] sm:$0xff]  ;;  %v10317_v32 = vld [vmem:[#allocation11_spill] sm:$0xff] }
 0x4a3   : > { %v3364_v40 = vmul.f32 %v10294_v39, %v3193_v48  ;;  %v4229_v24 = vadd.f32 1.0, %v9225_v22  ;;  %6372 = vpow2.f32 %v5048_v3  ;;  %v10305_v33 = vunpack.i.h.bf16 %v10206_v56  ;;  %v9297_v12 = vpop.eup %6364  ;;  %v10308_v22 = vld [vmem:[#allocation165_spill] sm:$0xff]  ;;  %v10314_v3 = vld [vmem:[#allocation106_spill] sm:$0xff] }
 0x4a4   : > { %v3991_v44 = vsel %vm3801_vm14, %v10306_v46, 0.0  ;;  %4716 = vst.msk [vmem:[%s9092_s6 + $0x44] sm:$0xf] %vm4698_vm3, %v5145_v31  ;;  %v5150_v58 = vpack.c.bf16 %v4400_v11, %v4400_v11  ;;  %v4401_v8 = vmul.f32 %v10307_v17, %v3431_v0  ;;  %v3365_v39 = vmul.f32 %v10302_v62, %v3195_v1  ;;  %v10309_v56 = vld [vmem:[#allocation69_spill] sm:$0xff]  ;;  %v10320_v11 = vld [vmem:[#allocation23_spill] sm:$0xff] }
 0x4a5   : > { %v3045_v26 = vmul.f32 %v10305_v33, %v2789_v29  ;;  %v3428_v21 = vadd.f32 %v3364_v40, %v3044_v53  ;;  %6374 = vrcp.f32 %v4226_v43  ;;  %v5043_v34 = vmul.f32 -1.442695, %v10308_v22  ;;  %3992 = vadd.xlane.f32.xlu1 %v3991_v44  ;;  %v9307_v61 = vpop.eup %6366  ;;  %v10315_v53 = vld [vmem:[#allocation175_spill] sm:$0xff] }
 0x4a6   : > { %v10310_v54 = vunpack.i.l.bf16 %v10309_v56  ;;  %v2792_v5 = vsub.f32 1.0, %v10311_v41  ;;  %4721 = vst.msk [vmem:[%s9092_s6 + $0x58] sm:$0xf] %vm4698_vm3, %v5150_v58  ;;  %v5151_v7 = vpack.c.bf16 %v4401_v8, %v4401_v8  ;;  %v3370_v23 = vmul.f32 %v10303_v6, %v3205_v4  ;;  %v3207_v52 = vpop.permute.xlu1 %3206  ;;  %v3201_v6 = vpop.permute.xlu0 %3200  ;;  %v10321_v33 = vld [vmem:[#allocation167_spill] sm:$0xff]  ;;  %v10323_v58 = vld [vmem:[#allocation112_spill] sm:$0xff] }
 0x4a7   : > { %v4398_v37 = vmul.f32 %v10312_v55, %v3428_v21  ;;  %v3429_v47 = vadd.f32 %v3365_v39, %v3045_v26  ;;  %6376 = vrcp.f32 %v4229_v24  ;;  %v4227_v25 = vadd.f32 1.0, %v9245_v51  ;;  %v10324_v21 = vld [vmem:[#allocation176_spill] sm:$0xff]  ;;  %v10326_v4 = vld [vmem:[#allocation71_spill] sm:$0xff]  ;;  %v10328_v55 = vld [vmem:[#allocation117_spill] sm:$0xff] }
 0x4a8   : > { %v3050_v9 = vmul.f32 %v10310_v54, %v2794_v63  ;;  %v10313_v42 = vunpack.i.h.bf16 %v10309_v56  ;;  %v2793_v28 = vsub.f32 1.0, %v10314_v3  ;;  %4722 = vst.msk [vmem:[%s9092_s6 + $0x5c] sm:$0xf] %vm4698_vm3, %v5151_v7  ;;  %v3371_v15 = vmul.f32 %v10304_v14, %v3207_v52  ;;  %v9317_v13 = vpop.eup %6368  ;;  %v10319_v63 = vld [vmem:[#allocation114_spill] sm:$0xff]  ;;  %v10325_v54 = vld [vmem:[#allocation4_spill] sm:$0xff] }
 0x4a9   : > { %v5148_v60 = vpack.c.bf16 %v4398_v37, %v4398_v37  ;;  %v4399_v62 = vmul.f32 %v10315_v53, %v3429_v47  ;;  %6378 = vpow2.f32 %v5043_v34  ;;  %v5046_v51 = vmul.f32 -1.442695, %v10316_v35 }
 0x4aa   : > { %v3051_v2 = vmul.f32 %v10313_v42, %v2795_v36  ;;  %v3434_v29 = vadd.f32 %v3370_v23, %v3050_v9  ;;  %v10318_v43 = vunpack.i.l.bf16 %v10317_v32  ;;  %v2798_v36 = vsub.f32 1.0, %v10319_v63  ;;  %v3203_v44 = vpop.permute.xlu1 %3202  ;;  %v3213_v7 = vpop.permute.xlu0 %3212  ;;  %v10329_v23 = vld [vmem:[#allocation22_spill] sm:$0xff] }
 0x4ab   : > { %4719 = vst.msk [vmem:[%s9092_s6 + $0x50] sm:$0xf] %vm4698_vm3, %v5148_v60  ;;  %v5149_v31 = vpack.c.bf16 %v4399_v62, %v4399_v62  ;;  %v3368_v14 = vmul.f32 %v10311_v41, %v3201_v6  ;;  %v9327_v24 = vpop.eup %6370  ;;  %6380 = vrcp.f32 %v4227_v25  ;;  %v5049_v26 = vmul.f32 -1.442695, %v10321_v33  ;;  %v10331_v62 = vld [vmem:[#allocation115_spill] sm:$0xff] }
 0x4ac   : > { %v3048_v48 = vmul.f32 %v10318_v43, %v2792_v5  ;;  %v4404_v0 = vmul.f32 %v10320_v11, %v3434_v29  ;;  %v3435_v40 = vadd.f32 %v3371_v15, %v3051_v2  ;;  %v10322_v1 = vunpack.i.h.bf16 %v10317_v32 }
 0x4ad   : > { %v2799_v17 = vsub.f32 1.0, %v10323_v58  ;;  %4720 = vst.msk [vmem:[%s9092_s6 + $0x54] sm:$0xf] %vm4698_vm3, %v5149_v31  ;;  %v3369_v34 = vmul.f32 %v10314_v3, %v3203_v44  ;;  %v9337_v56 = vpop.eup %6372  ;;  %6382 = vpow2.f32 %v5046_v51  ;;  %v5047_v9 = vmul.f32 -1.442695, %v10325_v54  ;;  %v10334_v31 = vld [vmem:[#allocation122_spill] sm:$0xff] }
 0x4ae   : > { %v3049_v46 = vmul.f32 %v10322_v1, %v2793_v28  ;;  %v5154_v8 = vpack.c.bf16 %v4404_v0, %v4404_v0  ;;  %v4405_v39 = vmul.f32 %v10324_v21, %v3435_v40  ;;  %v3432_v22 = vadd.f32 %v3368_v14, %v3048_v48  ;;  %v3215_v53 = vpop.permute.xlu1 %3214  ;;  %v10332_v48 = vld [vmem:[#allocation12_spill] sm:$0xff] }
 0x4af   : > { %v10327_v41 = vunpack.i.l.bf16 %v10326_v4  ;;  %v2796_v37 = vsub.f32 1.0, %v10328_v55  ;;  %v3374_v2 = vmul.f32 %v10319_v63, %v3213_v7  ;;  %v9347_v52 = vpop.eup %6374  ;;  %v4232_v3 = vadd.f32 1.0, %v9286_v19  ;;  %v10341_v7 = vld [vmem:[#allocation125_spill] sm:$0xff] }
 0x4b0   : > { %4725 = vst.msk [vmem:[%s9092_s6 + $0x68] sm:$0xf] %vm4698_vm3, %v5154_v8  ;;  %v5155_v47 = vpack.c.bf16 %v4405_v39, %v4405_v39  ;;  %v4402_v25 = vmul.f32 %v10329_v23, %v3432_v22  ;;  %v3433_v42 = vadd.f32 %v3369_v34, %v3049_v46  ;;  %6384 = vpow2.f32 %v5049_v26  ;;  %v10338_v34 = vld [vmem:[#allocation190_spill] sm:$0xff] }
 0x4b1   : > { %v3054_v5 = vmul.f32 %v10327_v41, %v2798_v36  ;;  %v10330_v28 = vunpack.i.h.bf16 %v10326_v4  ;;  %v2797_v29 = vsub.f32 1.0, %v10331_v62  ;;  %v3375_v32 = vmul.f32 %v10323_v58, %v3215_v53  ;;  %v9357_v43 = vpop.eup %6376  ;;  %v3209_v36 = vpop.permute.xlu0 %3208  ;;  %v10337_v58 = vld [vmem:[#allocation120_spill] sm:$0xff] }
 0x4b2   : > { %4726 = vst.msk [vmem:[%s9092_s6 + $0x6c] sm:$0xf] %vm4698_vm3, %v5155_v47  ;;  %v5152_v15 = vpack.c.bf16 %v4402_v25, %v4402_v25  ;;  %v4403_v35 = vmul.f32 %v9078_v10, %v3433_v42  ;;  %v4230_v19 = vadd.f32 1.0, %v9297_v12  ;;  %6386 = vpow2.f32 %v5047_v9  ;;  %v10335_v12 = vld [vmem:[#allocation44_spill] sm:$0xff]  ;;  %v3211_v44 = vpop.permute.xlu1 %3210  ;;  %v10339_v9 = vld [vmem:[#allocation77_spill] sm:$0xff] }
 0x4b3   : > { %v3055_v60 = vmul.f32 %v10330_v28, %v2799_v17  ;;  %v3438_v51 = vadd.f32 %v3374_v2, %v3054_v5  ;;  %v10333_v6 = vunpack.i.l.bf16 %v10332_v48  ;;  %v2802_v11 = vsub.f32 1.0, %v10334_v31  ;;  %v9367_v33 = vpop.eup %6378 }
 0x4b4   : > { %4723 = vst.msk [vmem:[%s9092_s6 + $0x60] sm:$0xf] %vm4698_vm3, %v5152_v15  ;;  %v5153_v0 = vpack.c.bf16 %v4403_v35, %v4403_v35  ;;  %v3372_v14 = vmul.f32 %v10328_v55, %v3209_v36  ;;  %6388 = vrcp.f32 %v4232_v3  ;;  %v5052_v26 = vmul.f32 -1.442695, %v10335_v12 }
 0x4b5   : > { %v3052_v63 = vmul.f32 %v10333_v6, %v2796_v37  ;;  %v4408_v10 = vmul.f32 %v9108_v57, %v3438_v51  ;;  %v3439_v40 = vadd.f32 %v3375_v32, %v3055_v60  ;;  %v10336_v1 = vunpack.i.h.bf16 %v10332_v48  ;;  %v9377_v22 = vpop.eup %6380  ;;  %v3221_v5 = vpop.permute.xlu0 %3220  ;;  %v10343_v60 = vld [vmem:[#allocation123_spill] sm:$0xff]  ;;  %v10344_v51 = vld [vmem:[#allocation13_spill] sm:$0xff]  ;;  %v10346_v6 = vld [vmem:[#allocation130_spill] sm:$0xff] }
 0x4b6   : > { %v2803_v17 = vsub.f32 1.0, %v10337_v58  ;;  %4724 = vst.msk [vmem:[%s9092_s6 + $0x64] sm:$0xf] %vm4698_vm3, %v5153_v0  ;;  %v3373_v39 = vmul.f32 %v10331_v62, %v3211_v44  ;;  %6390 = vrcp.f32 %v4230_v19  ;;  %v5053_v54 = vmul.f32 -1.442695, %v10338_v34  ;;  %v3223_v28 = vpop.permute.xlu1 %3222 }
 0x4b7   : > { %v3053_v46 = vmul.f32 %v10336_v1, %v2797_v29  ;;  %v5158_v8 = vpack.c.bf16 %v4408_v10, %v4408_v10  ;;  %v4409_v57 = vmul.f32 %v9120_v27, %v3439_v40  ;;  %v3436_v21 = vadd.f32 %v3372_v14, %v3052_v63  ;;  %v9387_v25 = vpop.eup %6382 }
 0x4b8   : > { %v10340_v4 = vunpack.i.l.bf16 %v10339_v9  ;;  %v2800_v55 = vsub.f32 1.0, %v10341_v7  ;;  %v3378_v23 = vmul.f32 %v10334_v31, %v3221_v5  ;;  %v4233_v42 = vadd.f32 1.0, %v9327_v24 }
 0x4b9   : > { %4729 = vst.msk [vmem:[%s9092_s6 + $0x78] sm:$0xf] %vm4698_vm3, %v5158_v8  ;;  %v5159_v37 = vpack.c.bf16 %v4409_v57, %v4409_v57  ;;  %v4406_v27 = vmul.f32 %v9130_v49, %v3436_v21  ;;  %v3437_v47 = vadd.f32 %v3373_v39, %v3053_v46  ;;  %6392 = vpow2.f32 %v5052_v26  ;;  %v3217_v48 = vpop.permute.xlu0 %3216  ;;  %v10349_v26 = vld [vmem:[#allocation128_spill] sm:$0xff]  ;;  %v10351_v21 = vld [vmem:[#allocation81_spill] sm:$0xff] }
 0x4ba   : > { %v3058_v41 = vmul.f32 %v10340_v4, %v2802_v11  ;;  %v10342_v2 = vunpack.i.h.bf16 %v10339_v9  ;;  %v2801_v53 = vsub.f32 1.0, %v10343_v60  ;;  %v3379_v15 = vmul.f32 %v10337_v58, %v3223_v28  ;;  %v9397_v35 = vpop.eup %6384  ;;  %v3219_v12 = vpop.permute.xlu1 %3218  ;;  %v10350_v8 = vld [vmem:[#allocation192_spill] sm:$0xff]  ;;  %v10353_v9 = vld [vmem:[#allocation133_spill] sm:$0xff] }
 0x4bb   : > { %4730 = vst.msk [vmem:[%s9092_s6 + $0x7c] sm:$0xf] %vm4698_vm3, %v5159_v37  ;;  %v5156_v62 = vpack.c.bf16 %v4406_v27, %v4406_v27  ;;  %v4407_v49 = vmul.f32 %v9167_v38, %v3437_v47  ;;  %v4236_v24 = vadd.f32 1.0, %v9337_v56  ;;  %6394 = vpow2.f32 %v5053_v54  ;;  %v10347_v56 = vld [vmem:[#allocation191_spill] sm:$0xff] }
 0x4bc   : > { %v3059_v3 = vmul.f32 %v10342_v2, %v2803_v17  ;;  %v3442_v29 = vadd.f32 %v3378_v23, %v3058_v41  ;;  %v10345_v32 = vunpack.i.l.bf16 %v10344_v51  ;;  %v2806_v63 = vsub.f32 1.0, %v10346_v6  ;;  %v9407_v0 = vpop.eup %6386 }
 0x4bd   : > { %4727 = vst.msk [vmem:[%s9092_s6 + $0x70] sm:$0xf] %vm4698_vm3, %v5156_v62  ;;  %v5157_v36 = vpack.c.bf16 %v4407_v49, %v4407_v49  ;;  %v3376_v11 = vmul.f32 %v10341_v7, %v3217_v48  ;;  %6396 = vrcp.f32 %v4233_v42  ;;  %v5050_v10 = vmul.f32 -1.442695, %v10347_v56  ;;  %v3229_v54 = vpop.permute.xlu0 %3228  ;;  %v10355_v42 = vld [vmem:[#allocation131_spill] sm:$0xff]  ;;  %v10356_v62 = vld [vmem:[#allocation193_spill] sm:$0xff] }
 0x4be   : > { %v3056_v19 = vmul.f32 %v10345_v32, %v2800_v55  ;;  %v4412_v38 = vmul.f32 %v9157_v30, %v3442_v29  ;;  %v3443_v31 = vadd.f32 %v3379_v15, %v3059_v3  ;;  %v10348_v40 = vunpack.i.h.bf16 %v10344_v51  ;;  %v9417_v17 = vpop.eup %6388  ;;  %v3231_v23 = vpop.permute.xlu1 %3230  ;;  %v10357_v49 = vld [vmem:[#allocation14_spill] sm:$0xff]  ;;  %v10361_v56 = vld [vmem:[#allocation136_spill] sm:$0xff] }
 0x4bf   : > { %v2807_v1 = vsub.f32 1.0, %v10349_v26  ;;  %4728 = vst.msk [vmem:[%s9092_s6 + $0x74] sm:$0xf] %vm4698_vm3, %v5157_v36  ;;  %v3377_v58 = vmul.f32 %v10343_v60, %v3219_v12  ;;  %6398 = vrcp.f32 %v4236_v24  ;;  %v5051_v57 = vmul.f32 -1.442695, %v10350_v8  ;;  %v10359_v51 = vld [vmem:[#allocation138_spill] sm:$0xff] }
 0x4c0   : > { %v3057_v14 = vmul.f32 %v10348_v40, %v2801_v53  ;;  %v5162_v46 = vpack.c.bf16 %v4412_v38, %v4412_v38  ;;  %v4413_v30 = vmul.f32 %v9206_v59, %v3443_v31  ;;  %v3440_v44 = vadd.f32 %v3376_v11, %v3056_v19  ;;  %v9427_v55 = vpop.eup %6390 }
 0x4c1   : > { %v10352_v39 = vunpack.i.l.bf16 %v10351_v21  ;;  %v2804_v4 = vsub.f32 1.0, %v10353_v9  ;;  %v3382_v7 = vmul.f32 %v10346_v6, %v3229_v54  ;;  %v4231_v37 = vadd.f32 1.0, %v9367_v33  ;;  %v3225_v24 = vpop.permute.xlu0 %3224 }
 0x4c2   : > { %4733 = vst.msk [vmem:[%s9092_s6 + $0x88] sm:$0xf] %vm4698_vm3, %v5162_v46  ;;  %v5163_v41 = vpack.c.bf16 %v4413_v30, %v4413_v30  ;;  %v4410_v59 = vmul.f32 %v9197_v50, %v3440_v44  ;;  %v3441_v5 = vadd.f32 %v3377_v58, %v3057_v14  ;;  %6400 = vpow2.f32 %v5050_v10  ;;  %v3227_v11 = vpop.permute.xlu1 %3226  ;;  %v10364_v58 = vld [vmem:[#allocation141_spill] sm:$0xff] }
 0x4c3   : > { %v3062_v34 = vmul.f32 %v10352_v39, %v2806_v63  ;;  %v10354_v27 = vunpack.i.h.bf16 %v10351_v21  ;;  %v2805_v2 = vsub.f32 1.0, %v10355_v42  ;;  %v3383_v60 = vmul.f32 %v10349_v26, %v3231_v23  ;;  %v9437_v53 = vpop.eup %6392  ;;  %v10368_v23 = vld [vmem:[#allocation15_spill] sm:$0xff] }
 0x4c4   : > { %4734 = vst.msk [vmem:[%s9092_s6 + $0x8c] sm:$0xf] %vm4698_vm3, %v5163_v41  ;;  %v5160_v3 = vpack.c.bf16 %v4410_v59, %v4410_v59  ;;  %v4411_v50 = vmul.f32 %v9256_v45, %v3441_v5  ;;  %v5056_v33 = vmul.f32 -1.442695, %v10356_v62  ;;  %6402 = vpow2.f32 %v5051_v57  ;;  %v10366_v41 = vld [vmem:[#allocation139_spill] sm:$0xff] }
 0x4c5   : > { %v3063_v47 = vmul.f32 %v10354_v27, %v2807_v1  ;;  %v3446_v28 = vadd.f32 %v3382_v7, %v3062_v34  ;;  %v10358_v29 = vunpack.i.l.bf16 %v10357_v49  ;;  %v2810_v32 = vsub.f32 1.0, %v10359_v51  ;;  %v9447_v63 = vpop.eup %6394  ;;  %v3237_v44 = vpop.permute.xlu0 %3236 }
 0x4c6   : > { %4731 = vst.msk [vmem:[%s9092_s6 + $0x80] sm:$0xf] %vm4698_vm3, %v5160_v3  ;;  %v5161_v19 = vpack.c.bf16 %v4411_v50, %v4411_v50  ;;  %v3380_v6 = vmul.f32 %v10353_v9, %v3225_v24  ;;  %6404 = vrcp.f32 %v4231_v37  ;;  %v4234_v36 = vadd.f32 1.0, %v9387_v25  ;;  %v10362_v25 = vld [vmem:[#allocation85_spill] sm:$0xff] }
 0x4c7   : > { %v3060_v15 = vmul.f32 %v10358_v29, %v2804_v4  ;;  %v4416_v45 = vmul.f32 %v9235_v20, %v3446_v28  ;;  %v3447_v48 = vadd.f32 %v3383_v60, %v3063_v47  ;;  %v10360_v38 = vunpack.i.h.bf16 %v10357_v49  ;;  %v9457_v26 = vpop.eup %6396  ;;  %v3239_v4 = vpop.permute.xlu1 %3238  ;;  %v10367_v47 = vld [vmem:[#allocation195_spill] sm:$0xff]  ;;  %v10370_v50 = vld [vmem:[#allocation145_spill] sm:$0xff]  ;;  %v10371_v29 = vld [vmem:[#allocation194_spill] sm:$0xff] }
 0x4c8   : > { %v2811_v10 = vsub.f32 1.0, %v10361_v56  ;;  %4732 = vst.msk [vmem:[%s9092_s6 + $0x84] sm:$0xf] %vm4698_vm3, %v5161_v19  ;;  %v3381_v12 = vmul.f32 %v10355_v42, %v3227_v11  ;;  %v4237_v1 = vadd.f32 1.0, %v9397_v35  ;;  %6406 = vpow2.f32 %v5056_v33  ;;  %v10373_v19 = vld [vmem:[#allocation144_spill] sm:$0xff]  ;;  %v10374_v11 = vld [vmem:[#allocation90_spill] sm:$0xff] }
 0x4c9   : > { %v3061_v31 = vmul.f32 %v10360_v38, %v2805_v2  ;;  %v5166_v40 = vpack.c.bf16 %v4416_v45, %v4416_v45  ;;  %v4417_v20 = vmul.f32 %v9277_v16, %v3447_v48  ;;  %v3444_v14 = vadd.f32 %v3380_v6, %v3060_v15  ;;  %v9467_v34 = vpop.eup %6398  ;;  %v3233_v3 = vpop.permute.xlu0 %3232 }
 0x4ca   : > { %v10363_v46 = vunpack.i.l.bf16 %v10362_v25  ;;  %v2808_v8 = vsub.f32 1.0, %v10364_v58  ;;  %v3386_v39 = vmul.f32 %v10359_v51, %v3237_v44  ;;  %6408 = vrcp.f32 %v4234_v36 }
 0x4cb   : > { %4737 = vst.msk [vmem:[%s9092_s6 + $0x98] sm:$0xf] %vm4698_vm3, %v5166_v40  ;;  %v5167_v57 = vpack.c.bf16 %v4417_v20, %v4417_v20  ;;  %v4414_v16 = vmul.f32 %v9267_v18, %v3444_v14  ;;  %v3445_v21 = vadd.f32 %v3381_v12, %v3061_v31  ;;  %v4235_v35 = vadd.f32 1.0, %v9407_v0  ;;  %v10376_v20 = vld [vmem:[#allocation147_spill] sm:$0xff] }
 0x4cc   : > { %v3066_v30 = vmul.f32 %v10363_v46, %v2810_v32  ;;  %v10365_v54 = vunpack.i.h.bf16 %v10362_v25  ;;  %v2809_v59 = vsub.f32 1.0, %v10366_v41  ;;  %v3387_v37 = vmul.f32 %v10361_v56, %v3239_v4  ;;  %v9477_v27 = vpop.eup %6400  ;;  %v3235_v32 = vpop.permute.xlu1 %3234  ;;  %v10380_v4 = vld [vmem:[#allocation16_spill] sm:$0xff] }
 0x4cd   : > { %4738 = vst.msk [vmem:[%s9092_s6 + $0x9c] sm:$0xf] %vm4698_vm3, %v5167_v57  ;;  %v5164_v5 = vpack.c.bf16 %v4414_v16, %v4414_v16  ;;  %v4415_v18 = vmul.f32 %v9317_v13, %v3445_v21  ;;  %6410 = vrcp.f32 %v4237_v1  ;;  %v5054_v0 = vmul.f32 -1.442695, %v10367_v47  ;;  %v3245_v40 = vpop.permute.xlu0 %3244  ;;  %v10379_v57 = vld [vmem:[#allocation146_spill] sm:$0xff] }
 0x4ce   : > { %v3067_v9 = vmul.f32 %v10365_v54, %v2811_v10  ;;  %v3450_v7 = vadd.f32 %v3386_v39, %v3066_v30  ;;  %v10369_v42 = vunpack.i.l.bf16 %v10368_v23  ;;  %v2814_v28 = vsub.f32 1.0, %v10370_v50  ;;  %v9487_v49 = vpop.eup %6402 }
 0x4cf   : > { %4735 = vst.msk [vmem:[%s9092_s6 + $0x90] sm:$0xf] %vm4698_vm3, %v5164_v5  ;;  %v5165_v60 = vpack.c.bf16 %v4415_v18, %v4415_v18  ;;  %v3384_v33 = vmul.f32 %v10364_v58, %v3233_v3  ;;  %6412 = vrcp.f32 %v4235_v35  ;;  %v5057_v15 = vmul.f32 -1.442695, %v10371_v29  ;;  %v10382_v18 = vld [vmem:[#allocation157_spill] sm:$0xff] }
 0x4d0   : > { %v3064_v2 = vmul.f32 %v10369_v42, %v2808_v8  ;;  %v4420_v13 = vmul.f32 %v9307_v61, %v3450_v7  ;;  %v3451_v62 = vadd.f32 %v3387_v37, %v3067_v9  ;;  %v10372_v24 = vunpack.i.h.bf16 %v10368_v23  ;;  %v9497_v38 = vpop.eup %6404  ;;  %v3247_v8 = vpop.permute.xlu1 %3246  ;;  %v10383_v42 = vld [vmem:[#allocation197_spill] sm:$0xff] }
 0x4d1   : > { %v2815_v45 = vsub.f32 1.0, %v10373_v19  ;;  %4736 = vst.msk [vmem:[%s9092_s6 + $0x94] sm:$0xf] %vm4698_vm3, %v5165_v60  ;;  %v3385_v36 = vmul.f32 %v10366_v41, %v3235_v32  ;;  %v4240_v31 = vadd.f32 1.0, %v9437_v53  ;;  %6414 = vpow2.f32 %v5054_v0  ;;  %v10377_v53 = vld [vmem:[#allocation196_spill] sm:$0xff]  ;;  %v3241_v5 = vpop.permute.xlu0 %3240 }
 0x4d2   : > { %v3065_v51 = vmul.f32 %v10372_v24, %v2809_v59  ;;  %v5170_v48 = vpack.c.bf16 %v4420_v13, %v4420_v13  ;;  %v4421_v61 = vmul.f32 %v9357_v43, %v3451_v62  ;;  %v3448_v6 = vadd.f32 %v3384_v33, %v3064_v2  ;;  %v9507_v46 = vpop.eup %6406  ;;  %v10386_v24 = vld [vmem:[#allocation94_spill] sm:$0xff] }
 0x4d3   : > { %v10375_v56 = vunpack.i.l.bf16 %v10374_v11  ;;  %v2812_v14 = vsub.f32 1.0, %v10376_v20  ;;  %v3390_v25 = vmul.f32 %v10370_v50, %v3245_v40  ;;  %6416 = vpow2.f32 %v5057_v15 }
 0x4d4   : > { %4741 = vst.msk [vmem:[%s9092_s6 + $0xa8] sm:$0xf] %vm4698_vm3, %v5170_v48  ;;  %v5171_v12 = vpack.c.bf16 %v4421_v61, %v4421_v61  ;;  %v4418_v43 = vmul.f32 %v9347_v52, %v3448_v6  ;;  %v3449_v1 = vadd.f32 %v3385_v36, %v3065_v51  ;;  %v5055_v30 = vmul.f32 -1.442695, %v10377_v53  ;;  %v9517_v54 = vpop.eup %6408  ;;  %v3243_v50 = vpop.permute.xlu1 %3242 }
 0x4d5   : > { %v3070_v10 = vmul.f32 %v10375_v56, %v2814_v28  ;;  %v10378_v44 = vunpack.i.h.bf16 %v10374_v11  ;;  %v2813_v16 = vsub.f32 1.0, %v10379_v57  ;;  %v3391_v35 = vmul.f32 %v10373_v19, %v3247_v8  ;;  %v10385_v28 = vld [vmem:[#allocation156_spill] sm:$0xff]  ;;  %v3253_v19 = vpop.permute.xlu0 %3252  ;;  %v10389_v11 = vld [vmem:[#allocation198_spill] sm:$0xff] }
 0x4d6   : > { %4742 = vst.msk [vmem:[%s9092_s6 + $0xac] sm:$0xf] %vm4698_vm3, %v5171_v12  ;;  %v5168_v21 = vpack.c.bf16 %v4418_v43, %v4418_v43  ;;  %v4419_v52 = vmul.f32 %v9377_v22, %v3449_v1  ;;  %6418 = vrcp.f32 %v4240_v31  ;;  %v4241_v9 = vadd.f32 1.0, %v9447_v63 }
 0x4d7   : > { %v3071_v58 = vmul.f32 %v10378_v44, %v2815_v45  ;;  %v3454_v39 = vadd.f32 %v3390_v25, %v3070_v10  ;;  %v10381_v41 = vunpack.i.l.bf16 %v10380_v4  ;;  %v2818_v7 = vsub.f32 1.0, %v10382_v18  ;;  %v6411_v23 = vpop.eup %6410  ;;  %v10388_v45 = vld [vmem:[#allocation160_spill] sm:$0xff] }
 0x4d8   : > { %4739 = vst.msk [vmem:[%s9092_s6 + $0xa0] sm:$0xf] %vm4698_vm3, %v5168_v21  ;;  %v5169_v37 = vpack.c.bf16 %v4419_v52, %v4419_v52  ;;  %v3388_v0 = vmul.f32 %v10376_v20, %v3241_v5  ;;  %v5058_v2 = vmul.f32 -1.442695, %v10383_v42  ;;  %6420 = vpow2.f32 %v5055_v30  ;;  %v3255_v40 = vpop.permute.xlu1 %3254  ;;  %v10391_v20 = vld [vmem:[#allocation158_spill] sm:$0xff]  ;;  %v10392_v30 = vld [vmem:[#allocation17_spill] sm:$0xff] }
 0x4d9   : > { %v3068_v59 = vmul.f32 %v10381_v41, %v2812_v14  ;;  %v4424_v22 = vmul.f32 %v9417_v17, %v3454_v39  ;;  %v3455_v47 = vadd.f32 %v3391_v35, %v3071_v58  ;;  %v10384_v63 = vunpack.i.h.bf16 %v10380_v4  ;;  %v9535_v29 = vpop.eup %6412  ;;  %v3249_v8 = vpop.permute.xlu0 %3248 }
 0x4da   : > { %v2819_v60 = vsub.f32 1.0, %v10385_v28  ;;  %4740 = vst.msk [vmem:[%s9092_s6 + $0xa4] sm:$0xf] %vm4698_vm3, %v5169_v37  ;;  %v3389_v33 = vmul.f32 %v10379_v57, %v3243_v50  ;;  %v4238_v15 = vadd.f32 1.0, %v9477_v27  ;;  %6422 = vrcp.f32 %v4241_v9  ;;  %v10394_v57 = vld [vmem:[#allocation170_spill] sm:$0xff] }
 0x4db   : > { %v3069_v3 = vmul.f32 %v10384_v63, %v2813_v16  ;;  %v5174_v13 = vpack.c.bf16 %v4424_v22, %v4424_v22  ;;  %v4425_v62 = vmul.f32 %v9457_v26, %v3455_v47  ;;  %v3452_v17 = vadd.f32 %v3388_v0, %v3068_v59  ;;  %v6415_v31 = vpop.eup %6414  ;;  %v10396_v59 = vld [vmem:[#allocation169_spill] sm:$0xff]  ;;  %v10399_v63 = vld [vmem:[#allocation2_spill] sm:$0xff] }
 0x4dc   : > { %v10387_v51 = vunpack.i.l.bf16 %v10386_v24  ;;  %v2816_v48 = vsub.f32 1.0, %v10388_v45  ;;  %v3394_v36 = vmul.f32 %v10382_v18, %v3253_v19  ;;  %6424 = vpow2.f32 %v5058_v2  ;;  %v3251_v41 = vpop.permute.xlu1 %3250 }
 0x4dd   : > { %4745 = vst.msk [vmem:[%s9092_s6 + $0xb8] sm:$0xf] %vm4698_vm3, %v5174_v13  ;;  %v5175_v61 = vpack.c.bf16 %v4425_v62, %v4425_v62  ;;  %v4422_v26 = vmul.f32 %v9427_v55, %v3452_v17  ;;  %v3453_v6 = vadd.f32 %v3389_v33, %v3069_v3  ;;  %v5059_v27 = vmul.f32 -1.442695, %v10389_v11  ;;  %v6417_v25 = vpop.eup %6416  ;;  %v3261_v2 = vpop.permute.xlu0 %3260  ;;  %v10404_v11 = vld [vmem:[#allocation172_spill] sm:$0xff] }
 0x4de   : > { %v3074_v32 = vmul.f32 %v10387_v51, %v2818_v7  ;;  %v10390_v56 = vunpack.i.h.bf16 %v10386_v24  ;;  %v2817_v14 = vsub.f32 1.0, %v10391_v20  ;;  %v3395_v1 = vmul.f32 %v10385_v28, %v3255_v40  ;;  %v10401_v24 = vld [vmem:[#allocation35_spill] sm:$0xff] }
 0x4df   : > { %4746 = vst.msk [vmem:[%s9092_s6 + $0xbc] sm:$0xf] %vm4698_vm3, %v5175_v61  ;;  %v5172_v12 = vpack.c.bf16 %v4422_v26, %v4422_v26  ;;  %v4423_v43 = vmul.f32 %v9497_v38, %v3453_v6  ;;  %6426 = vrcp.f32 %v4238_v15  ;;  %v4239_v53 = vadd.f32 1.0, %v9487_v49  ;;  %v10402_v26 = vld [vmem:[#allocation18_spill] sm:$0xff] }
 0x4e0   : > { %v3075_v10 = vmul.f32 %v10390_v56, %v2819_v60  ;;  %v3458_v55 = vadd.f32 %v3394_v36, %v3074_v32  ;;  %v10393_v44 = vunpack.i.l.bf16 %v10392_v30  ;;  %v2822_v16 = vsub.f32 1.0, %v10394_v57  ;;  %v6419_v35 = vpop.eup %6418  ;;  %v3263_v15 = vpop.permute.xlu1 %3262 }
 0x4e1   : > { %4743 = vst.msk [vmem:[%s9092_s6 + $0xb0] sm:$0xf] %vm4698_vm3, %v5172_v12  ;;  %v5173_v21 = vpack.c.bf16 %v4423_v43, %v4423_v43  ;;  %v3392_v39 = vmul.f32 %v10388_v45, %v3249_v8  ;;  %v4244_v9 = vadd.f32 1.0, %v9507_v46  ;;  %6428 = vpow2.f32 %v5059_v27  ;;  %v10397_v46 = vld [vmem:[#allocation99_spill] sm:$0xff] }
 0x4e2   : > { %v3072_v58 = vmul.f32 %v10393_v44, %v2816_v48  ;;  %v4428_v52 = vmul.f32 %v9467_v34, %v3458_v55  ;;  %v3459_v38 = vadd.f32 %v3395_v1, %v3075_v10  ;;  %v10395_v49 = vunpack.i.h.bf16 %v10392_v30  ;;  %v6421_v22 = vpop.eup %6420 }
 0x4e3   : > { %v2823_v5 = vsub.f32 1.0, %v10396_v59  ;;  %4744 = vst.msk [vmem:[%s9092_s6 + $0xb4] sm:$0xf] %vm4698_vm3, %v5173_v21  ;;  %v3393_v34 = vmul.f32 %v10391_v20, %v3251_v41  ;;  %6430 = vrcp.f32 %v4239_v53  ;;  %v4245_v47 = vadd.f32 1.0, %v6417_v25  ;;  %v10407_v25 = vld [vmem:[#allocation171_spill] sm:$0xff] }
 0x4e4   : > { %v3073_v4 = vmul.f32 %v10395_v49, %v2817_v14  ;;  %v5178_v18 = vpack.c.bf16 %v4428_v52, %v4428_v52  ;;  %v4429_v7 = vmul.f32 %v6411_v23, %v3459_v38  ;;  %v3456_v37 = vadd.f32 %v3392_v39, %v3072_v58  ;;  %v6423_v13 = vpop.eup %6422  ;;  %v10405_v14 = vld [vmem:[#allocation102_spill] sm:$0xff]  ;;  %v3259_v1 = vpop.permute.xlu1 %3258  ;;  %v10408_v38 = vld [vmem:[#allocation3_spill] sm:$0xff] }
 0x4e5   : > { %v10398_v0 = vunpack.i.l.bf16 %v10397_v46  ;;  %v2820_v3 = vsub.f32 1.0, %v10399_v63  ;;  %v3398_v23 = vmul.f32 %v10394_v57, %v3261_v2  ;;  %6432 = vrcp.f32 %v4244_v9 }
 0x4e6   : > { %4749 = vst.msk [vmem:[%s9092_s6 + $0xc8] sm:$0xf] %vm4698_vm3, %v5178_v18  ;;  %v5179_v50 = vpack.c.bf16 %v4429_v7, %v4429_v7  ;;  %v4426_v28 = vmul.f32 %v9517_v54, %v3456_v37  ;;  %v3457_v60 = vadd.f32 %v3393_v34, %v3073_v4  ;;  %v4242_v62 = vadd.f32 1.0, %v6415_v31  ;;  %v6425_v48 = vpop.eup %6424  ;;  %v3257_v31 = vpop.permute.xlu0 %3256  ;;  %v10410_v34 = vld [vmem:[#allocation38_spill] sm:$0xff] }
 0x4e7   : > { %v3078_v42 = vmul.f32 %v10398_v0, %v2822_v16  ;;  %v10400_v17 = vunpack.i.h.bf16 %v10397_v46  ;;  %v2821_v51 = vsub.f32 1.0, %v10401_v24  ;;  %v3399_v54 = vmul.f32 %v10396_v59, %v3263_v15  ;;  %v10409_v59 = vld [vmem:[#allocation21_spill] sm:$0xff] }
 0x4e8   : > { %4750 = vst.msk [vmem:[%s9092_s6 + $0xcc] sm:$0xf] %vm4698_vm3, %v5179_v50  ;;  %v5176_v32 = vpack.c.bf16 %v4426_v28, %v4426_v28  ;;  %v4427_v19 = vmul.f32 %v9535_v29, %v3457_v60  ;;  %6434 = vrcp.f32 %v4245_v47  ;;  %v4243_v61 = vadd.f32 1.0, %v6421_v22  ;;  %v3271_v37 = vpop.permute.xlu1 %3270 }
 0x4e9   : > { %v3079_v33 = vmul.f32 %v10400_v17, %v2823_v5  ;;  %v3462_v45 = vadd.f32 %v3398_v23, %v3078_v42  ;;  %v10403_v6 = vunpack.i.l.bf16 %v10402_v26  ;;  %v2826_v27 = vsub.f32 1.0, %v10404_v11  ;;  %v6427_v20 = vpop.eup %6426 }
 0x4ea   : > { %4747 = vst.msk [vmem:[%s9092_s6 + $0xc0] sm:$0xf] %vm4698_vm3, %v5176_v32  ;;  %v5177_v56 = vpack.c.bf16 %v4427_v19, %v4427_v19  ;;  %v3396_v29 = vmul.f32 %v10399_v63, %v3257_v31  ;;  %v5728_v12 = vunpack.i.l.bf16 %v10405_v14  ;;  %6436 = vrcp.f32 %v4242_v62  ;;  %v3269_v52 = vpop.permute.xlu0 %3268 }
 0x4eb   : > { %v3076_v36 = vmul.f32 %v10403_v6, %v2820_v3  ;;  %v4432_v10 = vmul.f32 %v6419_v35, %v3462_v45  ;;  %v3463_v40 = vadd.f32 %v3399_v54, %v3079_v33  ;;  %v10406_v43 = vunpack.i.h.bf16 %v10402_v26  ;;  %v6429_v57 = vpop.eup %6428  ;;  %v10411_v6 = vld [vmem:[#allocation182_spill] sm:$0xff] }
 0x4ec   : > { %v2827_v53 = vsub.f32 1.0, %v10407_v25  ;;  %4748 = vst.msk [vmem:[%s9092_s6 + $0xc4] sm:$0xf] %vm4698_vm3, %v5177_v56  ;;  %v3397_v8 = vmul.f32 %v10401_v24, %v3259_v1  ;;  %v5729_v16 = vunpack.i.h.bf16 %v10405_v14  ;;  %6438 = vrcp.f32 %v4243_v61  ;;  %v3267_v15 = vpop.permute.xlu1 %3266 }
 0x4ed   : > { %v3077_v55 = vmul.f32 %v10406_v43, %v2821_v51  ;;  %v5182_v30 = vpack.c.bf16 %v4432_v10, %v4432_v10  ;;  %v4433_v44 = vmul.f32 %v6423_v13, %v3463_v40  ;;  %v3460_v58 = vadd.f32 %v3396_v29, %v3076_v36  ;;  %v6431_v41 = vpop.eup %6430  ;;  %v10413_v29 = vld [vmem:[#allocation181_spill] sm:$0xff] }
 0x4ee   : > { %v3082_v21 = vmul.f32 %v5728_v12, %v2826_v27  ;;  %v2824_v39 = vsub.f32 1.0, %v10408_v38  ;;  %v3402_v4 = vmul.f32 %v10404_v11, %v3269_v52  ;;  %v5723_v5 = vunpack.i.l.bf16 %v10409_v59  ;;  %v3265_v28 = vpop.permute.xlu0 %3264  ;;  %v10412_v27 = vld [vmem:[#allocation24_spill] sm:$0xff] }
 0x4ef   : > { %4753 = vst.msk [vmem:[%s9092_s6 + $0xd8] sm:$0xf] %vm4698_vm3, %v5182_v30  ;;  %v5183_v35 = vpack.c.bf16 %v4433_v44, %v4433_v44  ;;  %v4430_v9 = vmul.f32 %v6427_v20, %v3460_v58  ;;  %v3461_v49 = vadd.f32 %v3397_v8, %v3077_v55  ;;  %v4246_v18 = vadd.f32 1.0, %v6425_v48  ;;  %v6433_v2 = vpop.eup %6432 }
 0x4f0   : > { %v3083_v7 = vmul.f32 %v5729_v16, %v2827_v53  ;;  %v2825_v22 = vsub.f32 1.0, %v10410_v34  ;;  %v3466_v0 = vadd.f32 %v3402_v4, %v3082_v21  ;;  %v3403_v42 = vmul.f32 %v10407_v25, %v3271_v37  ;;  %v3279_v11 = vpop.permute.xlu1 %3278 }
 0x4f1   : > { %4754 = vst.msk [vmem:[%s9092_s6 + $0xdc] sm:$0xf] %vm4698_vm3, %v5183_v35  ;;  %v5180_v47 = vpack.c.bf16 %v4430_v9, %v4430_v9  ;;  %v4431_v46 = vmul.f32 %v6431_v41, %v3461_v49  ;;  %v5724_v63 = vunpack.i.h.bf16 %v10409_v59  ;;  %v4247_v3 = vadd.f32 1.0, %v6429_v57  ;;  %v10414_v59 = vld [vmem:[#allocation180_spill] sm:$0xff] }
 0x4f2   : > { %v3080_v50 = vmul.f32 %v5723_v5, %v2824_v39  ;;  %v4436_v23 = vmul.f32 %v6433_v2, %v3466_v0  ;;  %v3467_v13 = vadd.f32 %v3403_v42, %v3083_v7  ;;  %v3400_v62 = vmul.f32 %v10408_v38, %v3265_v28  ;;  %v6435_v17 = vpop.eup %6434  ;;  %v3277_v54 = vpop.permute.xlu0 %3276  ;;  %v10415_v7 = vld [vmem:[#allocation109_spill] sm:$0xff]  ;;  %v10416_v42 = vld [vmem:[#allocation179_spill] sm:$0xff] }
 0x4f3   : > { %4751 = vst.msk [vmem:[%s9092_s6 + $0xd0] sm:$0xf] %vm4698_vm3, %v5180_v47  ;;  %v5181_v60 = vpack.c.bf16 %v4431_v46, %v4431_v46  ;;  %6440 = vrcp.f32 %v4246_v18  ;;  %v3081_v33 = vmul.f32 %v5724_v63, %v2825_v22  ;;  %v3401_v19 = vmul.f32 %v10410_v34, %v3267_v15 }
 0x4f4   : > { %v5186_v24 = vpack.c.bf16 %v4436_v23, %v4436_v23  ;;  %v4437_v51 = vmul.f32 %v6435_v17, %v3467_v13  ;;  %v3464_v32 = vadd.f32 %v3400_v62, %v3080_v50  ;;  %v6437_v45 = vpop.eup %6436  ;;  %6442 = vrcp.f32 %v4247_v3  ;;  %v3275_v25 = vpop.permute.xlu1 %3274 }
 0x4f5   : > { %4752 = vst.msk [vmem:[%s9092_s6 + $0xd4] sm:$0xf] %vm4698_vm3, %v5181_v60  ;;  %v3465_v26 = vadd.f32 %v3401_v19, %v3081_v33  ;;  %v2828_v36 = vsub.f32 1.0, %v10411_v6  ;;  %v5733_v56 = vunpack.i.l.bf16 %v10412_v27  ;;  %v2829_v20 = vsub.f32 1.0, %v10413_v29 }
 0x4f6   : > { %4757 = vst.msk [vmem:[%s9092_s6 + $0xe8] sm:$0xf] %vm4698_vm3, %v5186_v24  ;;  %v5187_v48 = vpack.c.bf16 %v4437_v51, %v4437_v51  ;;  %v4434_v61 = vmul.f32 %v6437_v45, %v3464_v32  ;;  %v6439_v31 = vpop.eup %6438  ;;  %v3273_v14 = vpop.permute.xlu0 %3272  ;;  %v5734_v12 = vunpack.i.h.bf16 %v10412_v27  ;;  %v3405_v44 = vmul.f32 %v10413_v29, %v3275_v25 }
 0x4f7   : > { %v4435_v40 = vmul.f32 %v6439_v31, %v3465_v26  ;;  %v3084_v55 = vmul.f32 %v5733_v56, %v2828_v36  ;;  %v3404_v1 = vmul.f32 %v10411_v6, %v3273_v14  ;;  %v2830_v5 = vsub.f32 1.0, %v10414_v59 }
 0x4f8   : > { %4758 = vst.msk [vmem:[%s9092_s6 + $0xec] sm:$0xf] %vm4698_vm3, %v5187_v48  ;;  %v5184_v10 = vpack.c.bf16 %v4434_v61, %v4434_v61  ;;  %v3085_v30 = vmul.f32 %v5734_v12, %v2829_v20  ;;  %v5738_v37 = vunpack.i.l.bf16 %v10415_v7  ;;  %v3406_v34 = vmul.f32 %v10414_v59, %v3277_v54 }
 0x4f9   : > { %v5185_v43 = vpack.c.bf16 %v4435_v40, %v4435_v40  ;;  %v3468_v53 = vadd.f32 %v3404_v1, %v3084_v55  ;;  %v2831_v2 = vsub.f32 1.0, %v10416_v42  ;;  %v5739_v3 = vunpack.i.h.bf16 %v10415_v7 }
 0x4fa   : > { %4755 = vst.msk [vmem:[%s9092_s6 + $0xe0] sm:$0xf] %vm4698_vm3, %v5184_v10  ;;  %v3469_v57 = vadd.f32 %v3405_v44, %v3085_v30  ;;  %v3086_v47 = vmul.f32 %v5738_v37, %v2830_v5  ;;  %v3407_v50 = vmul.f32 %v10416_v42, %v3279_v11 }
 0x4fb   : > { %4756 = vst.msk [vmem:[%s9092_s6 + $0xe4] sm:$0xf] %vm4698_vm3, %v5185_v43  ;;  %v3087_v60 = vmul.f32 %v5739_v3, %v2831_v2 }
 0x4fc   : > { %v3470_v46 = vadd.f32 %v3406_v34, %v3086_v47 }
 0x4fd   : > { %v6441_v58 = vpop.eup %6440  ;;  %v3471_v23 = vadd.f32 %v3407_v50, %v3087_v60 }
 0x4fe   : > { %v4438_v8 = vmul.f32 %v6441_v58, %v3468_v53  ;;  %v6443_v16 = vpop.eup %6442 }
 0x4ff   : > { %v4439_v52 = vmul.f32 %v6443_v16, %v3469_v57 }
 0x500   : > { %v5188_v21 = vpack.c.bf16 %v4438_v8, %v4438_v8 }
 0x501   : > { %v5189_v38 = vpack.c.bf16 %v4439_v52, %v4439_v52 }
 0x502   : > { %4759 = vst.msk [vmem:[%s9092_s6 + $0xf0] sm:$0xf] %vm4698_vm3, %v5188_v21 }
 0x503   : > { %4760 = vst.msk [vmem:[%s9092_s6 + $0xf4] sm:$0xf] %vm4698_vm3, %v5189_v38 }
 0x52b   : > { %v3990_v39 = vpop.xlane.xlu0 %3989 }
 0x52c   : > { %v5060_v35 = vmul.f32 -1.442695, %v3990_v39 }
 0x52e   : > { %6444 = vpow2.f32 %v5060_v35 }
 0x532   : > { %v3993_v9 = vpop.xlane.xlu1 %3992 }
 0x533   : > { %v5061_v49 = vmul.f32 -1.442695, %v3993_v9 }
 0x535   : > { %6446 = vpow2.f32 %v5061_v49 }
 0x538   : > { %v6445_v4 = vpop.eup %6444 }
 0x539   : > { %v4248_v41 = vadd.f32 1.0, %v6445_v4 }
 0x53b   : > { %6448 = vrcp.f32 %v4248_v41 }
 0x53f   : > { %v6447_v18 = vpop.eup %6446 }
 0x540   : > { %v4249_v22 = vadd.f32 1.0, %v6447_v18 }
 0x542   : > { %6450 = vrcp.f32 %v4249_v22 }
 0x545   : > { %v6449_v0 = vpop.eup %6448 }
 0x546   : > { %v4440_v63 = vmul.f32 %v6449_v0, %v3470_v46 }
 0x548   : > { %v5190_v28 = vpack.c.bf16 %v4440_v63, %v4440_v63 }
 0x54a   : > { %4761 = vst.msk [vmem:[%s9092_s6 + $0xf8] sm:$0xf] %vm4698_vm3, %v5190_v28 }
 0x54c   : > { %v6451_v13 = vpop.eup %6450 }
 0x54d   : > { %v4441_v62 = vmul.f32 %v6451_v13, %v3471_v23 }
 0x54f   : > { %v5191_v17 = vpack.c.bf16 %v4441_v62, %v4441_v62 }
 0x551   : > { %4762 = vst.msk [vmem:[%s9092_s6 + $0xfc] sm:$0xf] %vm4698_vm3, %v5191_v17 }
 0x552 PF: > { %s15_s18 = sadd.s32 1, %s6459_s18  }
 0x553   : > { %p12_p4 = scmp.ge.s32.totalorder %s15_s18, 5  }
 0x555   :  { %14 = sbr.rel (!%p12_p4) target bundleno = 1 (0x1), region = 70 }

</bundles_post_ra>
